<compile_context>
chip_gen: v7x
topology: tpu7x:2x2x1
jax: 0.10.0
libtpu: 0.0.40
codegen_flags: <defaults>
</compile_context>

<pallas_src>
import functools

import jax
import jax.numpy as jnp
from jax.experimental import pallas as pl
from jax.experimental.pallas import tpu as pltpu

BN_EPS = 1e-5
LANES = 128


def _round_up(x, m):
    return (x + m - 1) // m * m


def _vmem_budget_bytes():
    """~75% of physical VMEM: ~96 MiB on v5e/v6e (128 MiB), ~48 MiB on v7x (64 MiB)."""
    cap = 64 * 1024 * 1024
    try:
        info = pltpu.get_tpu_info()
        cap = int(getattr(info, "vmem_capacity_bytes", cap) or cap)
    except Exception:
        pass
    budget = cap * 3 // 4
    return int(max(32 * 1024 * 1024, min(budget, 96 * 1024 * 1024)))


def _pick_row_tile(h_out, stride, H, W, cin_p, hid_p, cout_p, scratch_itemsize,
                   out_itemsize, n_batch, budget):
    """Largest divisor of h_out whose estimated VMEM footprint fits `budget`,
    preferring tiles that keep >= 2 grid steps (v7x has 2 TensorCores)."""
    w_out = W // stride

    def est(t):
        th_in = (t - 1) * stride + 3
        scratch = th_in * (W + 2) * hid_p * scratch_itemsize
        x_blk = 2 * H * W * cin_p * 4                      # double-buffered f32 input
        o_blk = 2 * t * w_out * cout_p * out_itemsize
        wts = 2 * (cin_p * hid_p * 2 + hid_p * cout_p * 2  # bf16 matmul weights
                   + 9 * hid_p * 4 + 2 * (hid_p + cout_p) * 4)
        live = (th_in * W * (cin_p + hid_p)                 # xin + f32 hidden value
                + 2 * t * w_out * hid_p                     # dw acc + y
                + t * w_out * cout_p) * 4                   # z
        return scratch + x_blk + o_blk + wts + live

    divs = [d for d in range(1, h_out + 1) if h_out % d == 0]
    fits = [d for d in divs if est(d) <= budget] or [1]
    multi = [d for d in fits if n_batch * (h_out // d) >= 2]
    return max(multi) if multi else max(fits)


# ------------------------------ fused kernel --------------------------------

def _fused_ir_kernel(*refs, H, W, stride, th_out, has_pw, use_res):
    """One grid step = `th_out` output rows of the whole inverted-residual block
    for one batch image.  The expanded hidden activation only ever exists in the
    tile-local padded VMEM scratch `hid_ref` (shape (th_in, W+2, hid_p))."""
    if has_pw:
        (x_ref, pw_w_ref, pw_b_ref,
         dw_w_ref, dw_b_ref,
         pwl_w_ref, pwl_b_ref,
         o_ref, hid_ref) = refs
    else:
        (x_ref, dw_w_ref, dw_b_ref,
         pwl_w_ref, pwl_b_ref,
         o_ref, hid_ref) = refs

    s = stride
    tb = th_out * s                    # input body rows handled by this tile
    th_in = (th_out - 1) * s + 3       # scratch rows = body + 3x3 vertical halo
    w_out = W // s
    r = pl.program_id(1)
    row_base = r * tb                  # first body input row of this tile
    hid_c = hid_ref.shape[-1]
    cin_c = x_ref.shape[-1]

    # ---- gather this tile's input rows.  Body rows are always fully in-image;
    # the 1-row top/bottom conv halo is masked to zero when it falls outside the
    # image, so each grid step writes everything it reads (grid stays parallel).
    body = x_ref[0, pl.ds(row_base, tb), :, :]                         # (tb, W, cin)
    top_idx = jnp.maximum(row_base - 1, 0)
    top = x_ref[0, pl.ds(top_idx, 1), :, :] * jnp.where(row_base > 0, 1.0, 0.0)
    rows = [top, body]
    if th_in == tb + 2:                # stride 1: bottom halo row is read by taps
        bot_in = row_base + tb
        bot_idx = jnp.minimum(bot_in, H - 1)
        rows.append(x_ref[0, pl.ds(bot_idx, 1), :, :] * jnp.where(bot_in < H, 1.0, 0.0))
    xin = jnp.concatenate(rows, axis=0)                                # (th_in, W, cin)

    # ---- 1x1 expansion conv (bf16 MXU operands, f32 accumulate) + folded-BN
    # bias + ReLU6; written into the zero-column-padded scratch.
    if has_pw:
        h = jnp.dot(xin.astype(jnp.bfloat16).reshape(th_in * W, cin_c),
                    pw_w_ref[...], preferred_element_type=jnp.float32)
        h = jnp.clip(h + pw_b_ref[0], 0.0, 6.0).reshape(th_in, W, hid_c)
    else:
        h = xin                        # expand_ratio == 1: hidden == input
    hid_ref[:, 1:W + 1, :] = h.astype(hid_ref.dtype)
    zcol = jnp.zeros((th_in, 1, hid_c), hid_ref.dtype)
    hid_ref[:, 0:1, :] = zcol                   # left conv zero-padding column
    hid_ref[:, W + 1:W + 2, :] = zcol           # right conv zero-padding column

    # ---- 3x3 depthwise conv (BN scale folded into weights) + bias + ReLU6,
    # evaluated directly at the output stride; accumulator seeded by tap 0.
    acc = None
    for dy in range(3):                          # static 9-tap unroll
        for dx in range(3):
            if s == 1:
                tap = hid_ref[pl.ds(dy, th_out), pl.ds(dx, w_out), :]
            else:
                tap = hid_ref[pl.ds(dy, th_out, s), pl.ds(dx, w_out, s), :]
            contrib = tap.astype(jnp.float32) * dw_w_ref[dy, dx, :]
            acc = contrib if acc is None else acc + contrib
    y = jnp.clip(acc + dw_b_ref[0], 0.0, 6.0)

    # ---- 1x1 projection (bf16 MXU operands) + folded-BN bias (+ residual),
    # lane-dense output store.
    z = jnp.dot(y.astype(jnp.bfloat16).reshape(th_out * w_out, hid_c),
                pwl_w_ref[...], preferred_element_type=jnp.float32)
    z = z + pwl_b_ref[0]
    if use_res:   # stride == 1 -> body rows are exactly the residual rows (f32, exact)
        z = z + body.reshape(th_out * w_out, cin_c)
    o_ref[0] = z.reshape(th_out, w_out, z.shape[-1]).astype(o_ref.dtype)


# ------------------------------- wrapper -------------------------------------

def inverted_residual_forward(x_nchw, params, *, inp, oup, stride, expand_ratio):
    assert stride in (1, 2)
    hidden = int(round(inp * expand_ratio))
    has_pw = expand_ratio != 1
    use_res = stride == 1 and inp == oup

    N, C, H, W = x_nchw.shape
    assert C == inp
    # TODO(synk): odd spatial sizes with stride 2 (ceil output size) not handled.
    assert H % stride == 0 and W % stride == 0
    h_out, w_out = H // stride, W // stride

    cin_p = _round_up(inp, LANES)
    hid_p = _round_up(hidden, LANES)
    cout_p = _round_up(oup, LANES)

    # bf16 scratch for stride-1 blocks; stride-2 keeps f32 (strided taps).
    scratch_dtype = jnp.bfloat16 if stride == 1 else jnp.float32

    budget = _vmem_budget_bytes()
    th_out = _pick_row_tile(h_out, stride, H, W, cin_p, hid_p, cout_p,
                            jnp.dtype(scratch_dtype).itemsize,
                            jnp.dtype(x_nchw.dtype).itemsize, N, budget)
    n_rt = h_out // th_out
    th_in = (th_out - 1) * stride + 3

    # NCHW -> NHWC, channels zero-padded to a lane multiple (padded channels are
    # inert: padded weight rows/cols and biases are zero).
    # TODO(synk): when chaining blocks, keep activations channel-padded NHWC
    #             across the whole network instead of per-block transpose/pad/slice.
    x = jnp.transpose(x_nchw, (0, 2, 3, 1))
    x = jnp.pad(x, ((0, 0), (0, 0), (0, 0), (0, cin_p - inp)))

    def pad_mat_bf16(w, rows, cols):
        return jnp.pad(w, ((0, rows - w.shape[0]), (0, cols - w.shape[1]))).astype(jnp.bfloat16)

    def pad_bias(v, cols):
        return jnp.pad(v, (0, cols - v.shape[0])).reshape(1, cols).astype(jnp.float32)

    def const_spec(shape):
        # Constant block index -> weight/bias stays VMEM-resident across steps.
        return pl.BlockSpec(shape, lambda n, r: (0,) * len(shape))

    args = [x]
    in_specs = [pl.BlockSpec((1, H, W, cin_p), lambda n, r: (n, 0, 0, 0))]

    if has_pw:
        pw_w = params["pw_w"] * params["pw_s"][None, :]          # fold BN scale
        args += [pad_mat_bf16(pw_w, cin_p, hid_p), pad_bias(params["pw_b"], hid_p)]
        in_specs += [const_spec((cin_p, hid_p)), const_spec((1, hid_p))]

    dw_w = params["dw_w"] * params["dw_s"][None, None, :]        # fold BN scale
    dw_w = jnp.pad(dw_w, ((0, 0), (0, 0), (0, hid_p - hidden))).astype(jnp.float32)
    args += [dw_w, pad_bias(params["dw_b"], hid_p)]
    in_specs += [const_spec((3, 3, hid_p)), const_spec((1, hid_p))]

    pwl_w = params["pwl_w"] * params["pwl_s"][None, :]           # fold BN scale
    args += [pad_mat_bf16(pwl_w, hid_p, cout_p), pad_bias(params["pwl_b"], cout_p)]
    in_specs += [const_spec((hid_p, cout_p)), const_spec((1, cout_p))]

    kernel = functools.partial(_fused_ir_kernel, H=H, W=W, stride=stride,
                               th_out=th_out, has_pw=has_pw, use_res=use_res)

    out = pl.pallas_call(
        kernel,
        out_shape=jax.ShapeDtypeStruct((N, h_out, w_out, cout_p), x_nchw.dtype),
        grid=(N, n_rt),
        in_specs=in_specs,
        out_specs=pl.BlockSpec((1, th_out, w_out, cout_p), lambda n, r: (n, r, 0, 0)),
        scratch_shapes=[pltpu.VMEM((th_in, W + 2, hid_p), scratch_dtype)],
        compiler_params=pltpu.CompilerParams(
            dimension_semantics=("parallel", "parallel"),
            vmem_limit_bytes=budget),
    )(*args)

    out = out[..., :oup]                       # drop channel lane-padding
    return jnp.transpose(out, (0, 3, 1, 2))    # NHWC -> NCHW


# ------------------------- parameter initialization -------------------------

def _fold_bn(gamma, beta, mean, var):
    scale = gamma / jnp.sqrt(var + BN_EPS)
    bias = beta - mean * scale
    return scale, bias


def _bn_params(key, c):
    k1, k2, k3, k4 = jax.random.split(key, 4)
    gamma = jax.random.uniform(k1, (c,), jnp.float32, 0.5, 1.5)
    beta = 0.1 * jax.random.normal(k2, (c,), jnp.float32)
    mean = 0.1 * jax.random.normal(k3, (c,), jnp.float32)
    var = jax.random.uniform(k4, (c,), jnp.float32, 0.5, 1.5)
    return _fold_bn(gamma, beta, mean, var)


def init_params(key, inp, oup, expand_ratio):
    hidden = int(round(inp * expand_ratio))
    keys = jax.random.split(key, 6)
    params = {}
    if expand_ratio != 1:
        params["pw_w"] = 0.1 * jax.random.normal(keys[0], (inp, hidden), jnp.float32)
        params["pw_s"], params["pw_b"] = _bn_params(keys[1], hidden)
    params["dw_w"] = 0.1 * jax.random.normal(keys[2], (3, 3, hidden), jnp.float32)
    params["dw_s"], params["dw_b"] = _bn_params(keys[3], hidden)
    params["pwl_w"] = 0.1 * jax.random.normal(keys[4], (hidden, oup), jnp.float32)
    params["pwl_s"], params["pwl_b"] = _bn_params(keys[5], oup)
    return params


# ----------------------------- pure-JAX reference ---------------------------

def reference_forward(x_nchw, params, *, inp, oup, stride, expand_ratio):
    use_res = (stride == 1 and inp == oup)

    def conv1x1(x, w_mat):  # w_mat: (Cin, Cout)
        w4 = jnp.transpose(w_mat, (1, 0))[:, :, None, None]  # (Cout, Cin, 1, 1)
        return jax.lax.conv_general_dilated(
            x, w4, (1, 1), ((0, 0), (0, 0)),
            dimension_numbers=("NCHW", "OIHW", "NCHW"))

    def dwconv(x, w_dw, s):  # w_dw: (3, 3, C)
        C = w_dw.shape[-1]
        w4 = jnp.transpose(w_dw, (2, 0, 1))[:, None, :, :]  # (C, 1, 3, 3)
        return jax.lax.conv_general_dilated(
            x, w4, (s, s), ((1, 1), (1, 1)),
            dimension_numbers=("NCHW", "OIHW", "NCHW"),
            feature_group_count=C)

    def bn(x, scale, bias):
        return x * scale[None, :, None, None] + bias[None, :, None, None]

    h = x_nchw
    if expand_ratio != 1:
        h = jnp.clip(bn(conv1x1(h, params["pw_w"]), params["pw_s"], params["pw_b"]), 0.0, 6.0)
    h = jnp.clip(bn(dwconv(h, params["dw_w"], stride), params["dw_s"], params["dw_b"]), 0.0, 6.0)
    h = bn(conv1x1(h, params["pwl_w"]), params["pwl_s"], params["pwl_b"])
    return x_nchw + h if use_res else h


# ----------------------------------- main ------------------------------------

if __name__ == "__main__":
    key = jax.random.PRNGKey(0)
    kx, kx3, kp1, kp2, kp3 = jax.random.split(key, 5)

    # bf16 MXU operands / bf16 hidden scratch round slightly vs the all-f32
    # reference convs -> modest tolerance (structure/indexing bugs would be O(1)).
    RTOL, ATOL = 3e-2, 3e-2

    # Config 1: stride 1, inp == oup, expand 6 -> residual connection exercised.
    inp, oup, stride, er = 4, 4, 1, 6
    x = jax.random.normal(kx, (2, inp, 16, 16), jnp.float32)  # NCHW like PyTorch
    params1 = init_params(kp1, inp, oup, er)
    out1 = inverted_residual_forward(x, params1, inp=inp, oup=oup, stride=stride, expand_ratio=er)
    out1 = jax.block_until_ready(out1)
    ref1 = reference_forward(x, params1, inp=inp, oup=oup, stride=stride, expand_ratio=er)
    assert out1.shape == (2, oup, 16, 16)
    assert jnp.allclose(out1, ref1, rtol=RTOL, atol=ATOL), "mismatch (config 1)"

    # Config 2: stride 2, inp != oup, expand 6 -> no residual, in-kernel stride-2 dw.
    inp2, oup2, stride2, er2 = 4, 8, 2, 6
    params2 = init_params(kp2, inp2, oup2, er2)
    out2 = inverted_residual_forward(x, params2, inp=inp2, oup=oup2, stride=stride2, expand_ratio=er2)
    out2 = jax.block_until_ready(out2)
    ref2 = reference_forward(x, params2, inp=inp2, oup=oup2, stride=stride2, expand_ratio=er2)
    assert out2.shape == (2, oup2, 8, 8)
    assert jnp.allclose(out2, ref2, rtol=RTOL, atol=ATOL), "mismatch (config 2)"

    # Config 3: expand_ratio == 1 path (no expansion conv), stride 1, residual.
    inp3, oup3, stride3, er3 = 8, 8, 1, 1
    x3 = jax.random.normal(kx3, (2, inp3, 16, 16), jnp.float32)
    params3 = init_params(kp3, inp3, oup3, er3)
    out3 = inverted_residual_forward(x3, params3, inp=inp3, oup=oup3, stride=stride3, expand_ratio=er3)
    out3 = jax.block_until_ready(out3)
    ref3 = reference_forward(x3, params3, inp=inp3, oup=oup3, stride=stride3, expand_ratio=er3)
    assert out3.shape == (2, oup3, 16, 16)
    assert jnp.allclose(out3, ref3, rtol=RTOL, atol=ATOL), "mismatch (config 3)"

    print("KERNEL_OK")
</pallas_src>

<mosaic_0001>
module attributes {stable_mosaic.version = 11 : i64} {
  func.func @_fused_ir_kernel(%arg0: i32, %arg1: i32, %arg2: memref<1x16x16x128xf32, #tpu.memory_space<vmem>>, %arg3: memref<128x128xbf16, #tpu.memory_space<vmem>>, %arg4: memref<1x128xf32, #tpu.memory_space<vmem>>, %arg5: memref<3x3x128xf32, #tpu.memory_space<vmem>>, %arg6: memref<1x128xf32, #tpu.memory_space<vmem>>, %arg7: memref<128x128xbf16, #tpu.memory_space<vmem>>, %arg8: memref<1x128xf32, #tpu.memory_space<vmem>>, %arg9: memref<1x16x16x128xf32, #tpu.memory_space<vmem>>, %arg10: memref<18x18x128xbf16, #tpu.memory_space<vmem>>) attributes {dimension_semantics = [#tpu.dimension_semantics<parallel>, #tpu.dimension_semantics<parallel>], iteration_bounds = array<i64: 2, 1>, scalar_prefetch = 0 : i64, scratch_operands = 1 : i64, tpu.core_type = #tpu.core_type<tc>, window_params = [{transform_indices = @transform_0, window_bounds = array<i64: 1, 16, 16, 128>}, {pipeline_mode = #tpu.pipeline_mode<synchronous>, transform_indices = @transform_1, window_bounds = array<i64: 128, 128>}, {pipeline_mode = #tpu.pipeline_mode<synchronous>, transform_indices = @transform_2, window_bounds = array<i64: 1, 128>}, {pipeline_mode = #tpu.pipeline_mode<synchronous>, transform_indices = @transform_3, window_bounds = array<i64: 3, 3, 128>}, {pipeline_mode = #tpu.pipeline_mode<synchronous>, transform_indices = @transform_4, window_bounds = array<i64: 1, 128>}, {pipeline_mode = #tpu.pipeline_mode<synchronous>, transform_indices = @transform_5, window_bounds = array<i64: 128, 128>}, {pipeline_mode = #tpu.pipeline_mode<synchronous>, transform_indices = @transform_6, window_bounds = array<i64: 1, 128>}, {transform_indices = @transform_7, window_bounds = array<i64: 1, 16, 16, 128>}]} {
    %c16_i32 = arith.constant 16 : i32
    %0 = arith.muli %arg1, %c16_i32 : i32
    %c0 = arith.constant 0 : index
    %1 = arith.index_cast %0 : i32 to index
    %c0_0 = arith.constant 0 : index
    %c0_1 = arith.constant 0 : index
    %2 = vector.load %arg2[%c0, %1, %c0_0, %c0_1] : memref<1x16x16x128xf32, #tpu.memory_space<vmem>>, vector<1x16x16x128xf32>
    %3 = vector.shape_cast %2 : vector<1x16x16x128xf32> to vector<16x16x128xf32>
    %c1_i32 = arith.constant 1 : i32
    %4 = arith.subi %0, %c1_i32 : i32
    %c0_i32 = arith.constant 0 : i32
    %5 = arith.maxsi %4, %c0_i32 : i32
    %c0_2 = arith.constant 0 : index
    %6 = arith.index_cast %5 : i32 to index
    %c0_3 = arith.constant 0 : index
    %c0_4 = arith.constant 0 : index
    %7 = vector.load %arg2[%c0_2, %6, %c0_3, %c0_4] : memref<1x16x16x128xf32, #tpu.memory_space<vmem>>, vector<1x1x16x128xf32>
    %8 = vector.shape_cast %7 : vector<1x1x16x128xf32> to vector<1x16x128xf32>
    %c0_i32_5 = arith.constant 0 : i32
    %9 = arith.cmpi sgt, %0, %c0_i32_5 : i32
    %cst = arith.constant 1.000000e+00 : f32
    %cst_6 = arith.constant 0.000000e+00 : f32
    %10 = arith.select %9, %cst, %cst_6 : f32
    %11 = vector.broadcast %10 : f32 to vector<1x16x128xf32>
    %12 = arith.mulf %8, %11 : vector<1x16x128xf32>
    %c16_i32_7 = arith.constant 16 : i32
    %13 = arith.addi %0, %c16_i32_7 : i32
    %c15_i32 = arith.constant 15 : i32
    %14 = arith.minsi %13, %c15_i32 : i32
    %c0_8 = arith.constant 0 : index
    %15 = arith.index_cast %14 : i32 to index
    %c0_9 = arith.constant 0 : index
    %c0_10 = arith.constant 0 : index
    %16 = vector.load %arg2[%c0_8, %15, %c0_9, %c0_10] : memref<1x16x16x128xf32, #tpu.memory_space<vmem>>, vector<1x1x16x128xf32>
    %17 = vector.shape_cast %16 : vector<1x1x16x128xf32> to vector<1x16x128xf32>
    %c16_i32_11 = arith.constant 16 : i32
    %18 = arith.cmpi slt, %13, %c16_i32_11 : i32
    %cst_12 = arith.constant 1.000000e+00 : f32
    %cst_13 = arith.constant 0.000000e+00 : f32
    %19 = arith.select %18, %cst_12, %cst_13 : f32
    %20 = vector.broadcast %19 : f32 to vector<1x16x128xf32>
    %21 = arith.mulf %17, %20 : vector<1x16x128xf32>
    %22 = tpu.concatenate %12, %3, %21 in 0 : vector<1x16x128xf32>, vector<16x16x128xf32>, vector<1x16x128xf32> -> vector<18x16x128xf32>
    %23 = arith.truncf %22 : vector<18x16x128xf32> to vector<18x16x128xbf16>
    %24 = vector.shape_cast %23 : vector<18x16x128xbf16> to vector<288x128xbf16>
    %c0_14 = arith.constant 0 : index
    %c0_15 = arith.constant 0 : index
    %25 = vector.load %arg3[%c0_14, %c0_15] : memref<128x128xbf16, #tpu.memory_space<vmem>>, vector<128x128xbf16>
    %cst_16 = arith.constant dense<0.000000e+00> : vector<288x128xf32>
    %26 = tpu.matmul %24, %25, %cst_16 {dimension_numbers = #tpu.dot_dimension_numbers<[1], [0], [0], [1], [0, 0, 1, 1], [], []>} : vector<288x128xbf16>, vector<128x128xbf16>, vector<288x128xf32> -> vector<288x128xf32>
    %c0_17 = arith.constant 0 : index
    %c0_18 = arith.constant 0 : index
    %27 = vector.load %arg4[%c0_17, %c0_18] : memref<1x128xf32, #tpu.memory_space<vmem>>, vector<1x128xf32>
    %28 = vector.shape_cast %27 : vector<1x128xf32> to vector<128xf32>
    %29 = vector.shape_cast %28 : vector<128xf32> to vector<1x128xf32>
    %30 = vector.broadcast %29 : vector<1x128xf32> to vector<288x128xf32>
    %31 = arith.addf %26, %30 : vector<288x128xf32>
    %cst_19 = arith.constant 0.000000e+00 : f32
    %cst_20 = arith.constant 6.000000e+00 : f32
    %32 = vector.broadcast %cst_19 : f32 to vector<288x128xf32>
    %33 = arith.maximumf %32, %31 : vector<288x128xf32>
    %34 = vector.broadcast %cst_20 : f32 to vector<288x128xf32>
    %35 = arith.minimumf %34, %33 : vector<288x128xf32>
    %36 = vector.shape_cast %35 : vector<288x128xf32> to vector<18x16x128xf32>
    %37 = arith.truncf %36 : vector<18x16x128xf32> to vector<18x16x128xbf16>
    %c0_21 = arith.constant 0 : index
    %c1 = arith.constant 1 : index
    %c0_22 = arith.constant 0 : index
    %38 = vector.load %arg10[%c0_21, %c1, %c0_22] : memref<18x18x128xbf16, #tpu.memory_space<vmem>>, vector<18x16x128xbf16>
    tpu.vector_store %arg10[%c0_21, %c1, %c0_22], %37 {strides = array<i32>} : memref<18x18x128xbf16, #tpu.memory_space<vmem>>, vector<18x16x128xbf16>,
    %cst_23 = arith.constant 0.000000e+00 : bf16
    %39 = vector.broadcast %cst_23 : bf16 to vector<18x1x128xbf16>
    %c0_24 = arith.constant 0 : index
    %c0_25 = arith.constant 0 : index
    %c0_26 = arith.constant 0 : index
    %40 = vector.load %arg10[%c0_24, %c0_25, %c0_26] : memref<18x18x128xbf16, #tpu.memory_space<vmem>>, vector<18x1x128xbf16>
    tpu.vector_store %arg10[%c0_24, %c0_25, %c0_26], %39 {strides = array<i32>} : memref<18x18x128xbf16, #tpu.memory_space<vmem>>, vector<18x1x128xbf16>,
    %c0_27 = arith.constant 0 : index
    %c17 = arith.constant 17 : index
    %c0_28 = arith.constant 0 : index
    %41 = vector.load %arg10[%c0_27, %c17, %c0_28] : memref<18x18x128xbf16, #tpu.memory_space<vmem>>, vector<18x1x128xbf16>
    tpu.vector_store %arg10[%c0_27, %c17, %c0_28], %39 {strides = array<i32>} : memref<18x18x128xbf16, #tpu.memory_space<vmem>>, vector<18x1x128xbf16>,
    %c0_29 = arith.constant 0 : index
    %c0_30 = arith.constant 0 : index
    %c0_31 = arith.constant 0 : index
    %42 = vector.load %arg10[%c0_29, %c0_30, %c0_31] : memref<18x18x128xbf16, #tpu.memory_space<vmem>>, vector<16x16x128xbf16>
    %43 = arith.extf %42 : vector<16x16x128xbf16> to vector<16x16x128xf32>
    %c0_32 = arith.constant 0 : index
    %c0_33 = arith.constant 0 : index
    %c0_34 = arith.constant 0 : index
    %44 = vector.load %arg5[%c0_32, %c0_33, %c0_34] : memref<3x3x128xf32, #tpu.memory_space<vmem>>, vector<1x1x128xf32>
    %45 = vector.shape_cast %44 : vector<1x1x128xf32> to vector<128xf32>
    %46 = vector.shape_cast %45 : vector<128xf32> to vector<1x1x128xf32>
    %47 = vector.broadcast %46 : vector<1x1x128xf32> to vector<16x16x128xf32>
    %48 = arith.mulf %43, %47 : vector<16x16x128xf32>
    %c0_35 = arith.constant 0 : index
    %c1_36 = arith.constant 1 : index
    %c0_37 = arith.constant 0 : index
    %49 = vector.load %arg10[%c0_35, %c1_36, %c0_37] : memref<18x18x128xbf16, #tpu.memory_space<vmem>>, vector<16x16x128xbf16>
    %50 = arith.extf %49 : vector<16x16x128xbf16> to vector<16x16x128xf32>
    %c0_38 = arith.constant 0 : index
    %c1_39 = arith.constant 1 : index
    %c0_40 = arith.constant 0 : index
    %51 = vector.load %arg5[%c0_38, %c1_39, %c0_40] : memref<3x3x128xf32, #tpu.memory_space<vmem>>, vector<1x1x128xf32>
    %52 = vector.shape_cast %51 : vector<1x1x128xf32> to vector<128xf32>
    %53 = vector.shape_cast %52 : vector<128xf32> to vector<1x1x128xf32>
    %54 = vector.broadcast %53 : vector<1x1x128xf32> to vector<16x16x128xf32>
    %55 = arith.mulf %50, %54 : vector<16x16x128xf32>
    %56 = arith.addf %48, %55 : vector<16x16x128xf32>
    %c0_41 = arith.constant 0 : index
    %c2 = arith.constant 2 : index
    %c0_42 = arith.constant 0 : index
    %57 = vector.load %arg10[%c0_41, %c2, %c0_42] : memref<18x18x128xbf16, #tpu.memory_space<vmem>>, vector<16x16x128xbf16>
    %58 = arith.extf %57 : vector<16x16x128xbf16> to vector<16x16x128xf32>
    %c0_43 = arith.constant 0 : index
    %c2_44 = arith.constant 2 : index
    %c0_45 = arith.constant 0 : index
    %59 = vector.load %arg5[%c0_43, %c2_44, %c0_45] : memref<3x3x128xf32, #tpu.memory_space<vmem>>, vector<1x1x128xf32>
    %60 = vector.shape_cast %59 : vector<1x1x128xf32> to vector<128xf32>
    %61 = vector.shape_cast %60 : vector<128xf32> to vector<1x1x128xf32>
    %62 = vector.broadcast %61 : vector<1x1x128xf32> to vector<16x16x128xf32>
    %63 = arith.mulf %58, %62 : vector<16x16x128xf32>
    %64 = arith.addf %56, %63 : vector<16x16x128xf32>
    %c1_46 = arith.constant 1 : index
    %c0_47 = arith.constant 0 : index
    %c0_48 = arith.constant 0 : index
    %65 = vector.load %arg10[%c1_46, %c0_47, %c0_48] : memref<18x18x128xbf16, #tpu.memory_space<vmem>>, vector<16x16x128xbf16>
    %66 = arith.extf %65 : vector<16x16x128xbf16> to vector<16x16x128xf32>
    %c1_49 = arith.constant 1 : index
    %c0_50 = arith.constant 0 : index
    %c0_51 = arith.constant 0 : index
    %67 = vector.load %arg5[%c1_49, %c0_50, %c0_51] : memref<3x3x128xf32, #tpu.memory_space<vmem>>, vector<1x1x128xf32>
    %68 = vector.shape_cast %67 : vector<1x1x128xf32> to vector<128xf32>
    %69 = vector.shape_cast %68 : vector<128xf32> to vector<1x1x128xf32>
    %70 = vector.broadcast %69 : vector<1x1x128xf32> to vector<16x16x128xf32>
    %71 = arith.mulf %66, %70 : vector<16x16x128xf32>
    %72 = arith.addf %64, %71 : vector<16x16x128xf32>
    %c1_52 = arith.constant 1 : index
    %c1_53 = arith.constant 1 : index
    %c0_54 = arith.constant 0 : index
    %73 = vector.load %arg10[%c1_52, %c1_53, %c0_54] : memref<18x18x128xbf16, #tpu.memory_space<vmem>>, vector<16x16x128xbf16>
    %74 = arith.extf %73 : vector<16x16x128xbf16> to vector<16x16x128xf32>
    %c1_55 = arith.constant 1 : index
    %c1_56 = arith.constant 1 : index
    %c0_57 = arith.constant 0 : index
    %75 = vector.load %arg5[%c1_55, %c1_56, %c0_57] : memref<3x3x128xf32, #tpu.memory_space<vmem>>, vector<1x1x128xf32>
    %76 = vector.shape_cast %75 : vector<1x1x128xf32> to vector<128xf32>
    %77 = vector.shape_cast %76 : vector<128xf32> to vector<1x1x128xf32>
    %78 = vector.broadcast %77 : vector<1x1x128xf32> to vector<16x16x128xf32>
    %79 = arith.mulf %74, %78 : vector<16x16x128xf32>
    %80 = arith.addf %72, %79 : vector<16x16x128xf32>
    %c1_58 = arith.constant 1 : index
    %c2_59 = arith.constant 2 : index
    %c0_60 = arith.constant 0 : index
    %81 = vector.load %arg10[%c1_58, %c2_59, %c0_60] : memref<18x18x128xbf16, #tpu.memory_space<vmem>>, vector<16x16x128xbf16>
    %82 = arith.extf %81 : vector<16x16x128xbf16> to vector<16x16x128xf32>
    %c1_61 = arith.constant 1 : index
    %c2_62 = arith.constant 2 : index
    %c0_63 = arith.constant 0 : index
    %83 = vector.load %arg5[%c1_61, %c2_62, %c0_63] : memref<3x3x128xf32, #tpu.memory_space<vmem>>, vector<1x1x128xf32>
    %84 = vector.shape_cast %83 : vector<1x1x128xf32> to vector<128xf32>
    %85 = vector.shape_cast %84 : vector<128xf32> to vector<1x1x128xf32>
    %86 = vector.broadcast %85 : vector<1x1x128xf32> to vector<16x16x128xf32>
    %87 = arith.mulf %82, %86 : vector<16x16x128xf32>
    %88 = arith.addf %80, %87 : vector<16x16x128xf32>
    %c2_64 = arith.constant 2 : index
    %c0_65 = arith.constant 0 : index
    %c0_66 = arith.constant 0 : index
    %89 = vector.load %arg10[%c2_64, %c0_65, %c0_66] : memref<18x18x128xbf16, #tpu.memory_space<vmem>>, vector<16x16x128xbf16>
    %90 = arith.extf %89 : vector<16x16x128xbf16> to vector<16x16x128xf32>
    %c2_67 = arith.constant 2 : index
    %c0_68 = arith.constant 0 : index
    %c0_69 = arith.constant 0 : index
    %91 = vector.load %arg5[%c2_67, %c0_68, %c0_69] : memref<3x3x128xf32, #tpu.memory_space<vmem>>, vector<1x1x128xf32>
    %92 = vector.shape_cast %91 : vector<1x1x128xf32> to vector<128xf32>
    %93 = vector.shape_cast %92 : vector<128xf32> to vector<1x1x128xf32>
    %94 = vector.broadcast %93 : vector<1x1x128xf32> to vector<16x16x128xf32>
    %95 = arith.mulf %90, %94 : vector<16x16x128xf32>
    %96 = arith.addf %88, %95 : vector<16x16x128xf32>
    %c2_70 = arith.constant 2 : index
    %c1_71 = arith.constant 1 : index
    %c0_72 = arith.constant 0 : index
    %97 = vector.load %arg10[%c2_70, %c1_71, %c0_72] : memref<18x18x128xbf16, #tpu.memory_space<vmem>>, vector<16x16x128xbf16>
    %98 = arith.extf %97 : vector<16x16x128xbf16> to vector<16x16x128xf32>
    %c2_73 = arith.constant 2 : index
    %c1_74 = arith.constant 1 : index
    %c0_75 = arith.constant 0 : index
    %99 = vector.load %arg5[%c2_73, %c1_74, %c0_75] : memref<3x3x128xf32, #tpu.memory_space<vmem>>, vector<1x1x128xf32>
    %100 = vector.shape_cast %99 : vector<1x1x128xf32> to vector<128xf32>
    %101 = vector.shape_cast %100 : vector<128xf32> to vector<1x1x128xf32>
    %102 = vector.broadcast %101 : vector<1x1x128xf32> to vector<16x16x128xf32>
    %103 = arith.mulf %98, %102 : vector<16x16x128xf32>
    %104 = arith.addf %96, %103 : vector<16x16x128xf32>
    %c2_76 = arith.constant 2 : index
    %c2_77 = arith.constant 2 : index
    %c0_78 = arith.constant 0 : index
    %105 = vector.load %arg10[%c2_76, %c2_77, %c0_78] : memref<18x18x128xbf16, #tpu.memory_space<vmem>>, vector<16x16x128xbf16>
    %106 = arith.extf %105 : vector<16x16x128xbf16> to vector<16x16x128xf32>
    %c2_79 = arith.constant 2 : index
    %c2_80 = arith.constant 2 : index
    %c0_81 = arith.constant 0 : index
    %107 = vector.load %arg5[%c2_79, %c2_80, %c0_81] : memref<3x3x128xf32, #tpu.memory_space<vmem>>, vector<1x1x128xf32>
    %108 = vector.shape_cast %107 : vector<1x1x128xf32> to vector<128xf32>
    %109 = vector.shape_cast %108 : vector<128xf32> to vector<1x1x128xf32>
    %110 = vector.broadcast %109 : vector<1x1x128xf32> to vector<16x16x128xf32>
    %111 = arith.mulf %106, %110 : vector<16x16x128xf32>
    %112 = arith.addf %104, %111 : vector<16x16x128xf32>
    %c0_82 = arith.constant 0 : index
    %c0_83 = arith.constant 0 : index
    %113 = vector.load %arg6[%c0_82, %c0_83] : memref<1x128xf32, #tpu.memory_space<vmem>>, vector<1x128xf32>
    %114 = vector.shape_cast %113 : vector<1x128xf32> to vector<128xf32>
    %115 = vector.shape_cast %114 : vector<128xf32> to vector<1x1x128xf32>
    %116 = vector.broadcast %115 : vector<1x1x128xf32> to vector<16x16x128xf32>
    %117 = arith.addf %112, %116 : vector<16x16x128xf32>
    %cst_84 = arith.constant 0.000000e+00 : f32
    %cst_85 = arith.constant 6.000000e+00 : f32
    %118 = vector.broadcast %cst_84 : f32 to vector<16x16x128xf32>
    %119 = arith.maximumf %118, %117 : vector<16x16x128xf32>
    %120 = vector.broadcast %cst_85 : f32 to vector<16x16x128xf32>
    %121 = arith.minimumf %120, %119 : vector<16x16x128xf32>
    %122 = arith.truncf %121 : vector<16x16x128xf32> to vector<16x16x128xbf16>
    %123 = vector.shape_cast %122 : vector<16x16x128xbf16> to vector<256x128xbf16>
    %c0_86 = arith.constant 0 : index
    %c0_87 = arith.constant 0 : index
    %124 = vector.load %arg7[%c0_86, %c0_87] : memref<128x128xbf16, #tpu.memory_space<vmem>>, vector<128x128xbf16>
    %cst_88 = arith.constant dense<0.000000e+00> : vector<256x128xf32>
    %125 = tpu.matmul %123, %124, %cst_88 {dimension_numbers = #tpu.dot_dimension_numbers<[1], [0], [0], [1], [0, 0, 1, 1], [], []>} : vector<256x128xbf16>, vector<128x128xbf16>, vector<256x128xf32> -> vector<256x128xf32>
    %c0_89 = arith.constant 0 : index
    %c0_90 = arith.constant 0 : index
    %126 = vector.load %arg8[%c0_89, %c0_90] : memref<1x128xf32, #tpu.memory_space<vmem>>, vector<1x128xf32>
    %127 = vector.shape_cast %126 : vector<1x128xf32> to vector<128xf32>
    %128 = vector.shape_cast %127 : vector<128xf32> to vector<1x128xf32>
    %129 = vector.broadcast %128 : vector<1x128xf32> to vector<256x128xf32>
    %130 = arith.addf %125, %129 : vector<256x128xf32>
    %131 = vector.shape_cast %3 : vector<16x16x128xf32> to vector<256x128xf32>
    %132 = arith.addf %130, %131 : vector<256x128xf32>
    %133 = vector.shape_cast %132 : vector<256x128xf32> to vector<16x16x128xf32>
    %c0_91 = arith.constant 0 : index
    %c0_92 = arith.constant 0 : index
    %c0_93 = arith.constant 0 : index
    %c0_94 = arith.constant 0 : index
    %134 = vector.load %arg9[%c0_91, %c0_92, %c0_93, %c0_94] : memref<1x16x16x128xf32, #tpu.memory_space<vmem>>, vector<1x16x16x128xf32>
    %135 = vector.shape_cast %134 : vector<1x16x16x128xf32> to vector<16x16x128xf32>
    %136 = vector.shape_cast %133 : vector<16x16x128xf32> to vector<1x16x16x128xf32>
    tpu.vector_store %arg9[%c0_91, %c0_92, %c0_93, %c0_94], %136 {strides = array<i32>} : memref<1x16x16x128xf32, #tpu.memory_space<vmem>>, vector<1x16x16x128xf32>,
    return
  }
  func.func @transform_0(%arg0: i32, %arg1: i32) -> (i32, i32, i32, i32) {
    %c0_i32 = arith.constant 0 : i32
    %c0_i32_0 = arith.constant 0 : i32
    %c0_i32_1 = arith.constant 0 : i32
    %c0_i32_2 = arith.constant 0 : i32
    return %arg0, %c0_i32, %c0_i32_0, %c0_i32_1 : i32, i32, i32, i32
  }
  func.func @transform_1(%arg0: i32, %arg1: i32) -> (i32, i32) {
    %c0_i32 = arith.constant 0 : i32
    %c0_i32_0 = arith.constant 0 : i32
    %c0_i32_1 = arith.constant 0 : i32
    return %c0_i32, %c0_i32_0 : i32, i32
  }
  func.func @transform_2(%arg0: i32, %arg1: i32) -> (i32, i32) {
    %c0_i32 = arith.constant 0 : i32
    %c0_i32_0 = arith.constant 0 : i32
    %c0_i32_1 = arith.constant 0 : i32
    return %c0_i32, %c0_i32_0 : i32, i32
  }
  func.func @transform_3(%arg0: i32, %arg1: i32) -> (i32, i32, i32) {
    %c0_i32 = arith.constant 0 : i32
    %c0_i32_0 = arith.constant 0 : i32
    %c0_i32_1 = arith.constant 0 : i32
    %c0_i32_2 = arith.constant 0 : i32
    return %c0_i32, %c0_i32_0, %c0_i32_1 : i32, i32, i32
  }
  func.func @transform_4(%arg0: i32, %arg1: i32) -> (i32, i32) {
    %c0_i32 = arith.constant 0 : i32
    %c0_i32_0 = arith.constant 0 : i32
    %c0_i32_1 = arith.constant 0 : i32
    return %c0_i32, %c0_i32_0 : i32, i32
  }
  func.func @transform_5(%arg0: i32, %arg1: i32) -> (i32, i32) {
    %c0_i32 = arith.constant 0 : i32
    %c0_i32_0 = arith.constant 0 : i32
    %c0_i32_1 = arith.constant 0 : i32
    return %c0_i32, %c0_i32_0 : i32, i32
  }
  func.func @transform_6(%arg0: i32, %arg1: i32) -> (i32, i32) {
    %c0_i32 = arith.constant 0 : i32
    %c0_i32_0 = arith.constant 0 : i32
    %c0_i32_1 = arith.constant 0 : i32
    return %c0_i32, %c0_i32_0 : i32, i32
  }
  func.func @transform_7(%arg0: i32, %arg1: i32) -> (i32, i32, i32, i32) {
    %c0_i32 = arith.constant 0 : i32
    %c0_i32_0 = arith.constant 0 : i32
    %c0_i32_1 = arith.constant 0 : i32
    return %arg0, %arg1, %c0_i32, %c0_i32_0 : i32, i32, i32, i32
  }
}

</mosaic_0001>

<bundles_post_ra>
// kernel: tpu_custom_call.1
= control target key start
LH: loop header
LB: loop body
LE: loop exit
PB: predicated region body
PF: predicated region fallthrough
CT: control target
= control target key end

     0   :  { %s6501_s0 = inlined_call_operand.hbm [shape: f32[2,16,16,128], index: 0, kind: input, shape index: {}]   ;;  %s6502_s1 = inlined_call_operand.hbm [shape: bf16[128,128], index: 1, kind: input, shape index: {}]   ;;  %s6503_s2 = inlined_call_operand.vmem [shape: f32[1,128], index: 2, kind: input, shape index: {}]   ;;  %s6504_s3 = inlined_call_operand.hbm [shape: f32[3,3,128], index: 3, kind: input, shape index: {}]   ;;  %s6505_s4 = inlined_call_operand.vmem [shape: f32[1,128], index: 4, kind: input, shape index: {}]   ;;  %s6506_s5 = inlined_call_operand.hbm [shape: bf16[128,128], index: 5, kind: input, shape index: {}]   ;;  %s6507_s6 = inlined_call_operand.vmem [shape: f32[1,128], index: 6, kind: input, shape index: {}]   ;;  %s6508_s7 = inlined_call_operand.hbm [shape: f32[2,16,16,128], index: 7, kind: output, shape index: {}]  }
   0x1   :  { %6516 = sst [smem:[#allocation19_spill]] %s6508_s7 }
   0x2   :  { %12 = vsyncpa [#allocation4], 0 }
   0x3   :  { %14 = vsyncpa [#allocation4 + $0x1], 0 }
   0x4   :  { %15 = vsyncpa [#allocation7], 0 }
   0x5   :  { %16 = vsyncpa [#allocation10], 0 }
   0x6   :  { %17 = vsyncpa [#allocation5], 0 }
   0x7   :  { %19 = vsyncpa [#allocation5 + $0x1], 0  ;;  %s4869_s24 = smov 0   ;;  %s4871_s25 = smov 0  }
   0x8   :  { %s4873_s26 = smov 0   ;;  %s4875_s27 = smov 0  }
   0x9   :  { %s4877_s28 = smov 0   ;;  %s4879_s29 = smov 0  }
   0xa LB: > { %6517 = sst [smem:[#allocation16_spill]] %s4796_s24  ;;  %s4051_s30 = sadd.s32 4294967295, %s4816_s29   ;;  %s4816_s29 = sphi %s4879_s29, %s25_s29   ;;  %s4812_s28 = sphi %s4877_s28, %s6551_s28   ;;  %s4808_s27 = sphi %s4875_s27, %s6550_s27   ;;  %s4804_s26 = sphi %s4873_s26, %s6549_s26   ;;  %s4800_s25 = sphi %s4871_s25, %s6548_s25   ;;  %s4796_s24 = sphi %s4869_s24, %s6547_s24  }
   0xb   : > { %6518 = sst [smem:[#allocation17_spill]] %s4808_s27  ;;  %s4052_s8 = sadd.s32 4294967294, %s4816_s29  }
   0xc   : > { %p57_p0 = scmp.ne.s32.totalorder %s4800_s25, %s4796_s24  ;;  %p4903_p1 = scmp.eq.s32.totalorder %s4051_s30, 0 }
   0xd   : > { %p4907_p2 = scmp.eq.s32.totalorder %s4051_s30, 1  ;;  %p215_p3 = scmp.eq.s32.totalorder %s4052_s8, 1 }
   0xe   : > { %s6519_s9 = scalar_select %p4903_p1, 1, 0 }
   0xf   : > { %s6520_s10 = scalar_select %p4907_p2, 1, 0 }
  0x10   : > { %p4913_p4 = por %p4903_p1, %p57_p0  ;;  %p4053_p5 = scmp.ge.s32.totalorder %s4816_s29, 1 }
  0x11   : > { %p4918_p6 = por %p215_p3, %p57_p0  ;;  %p222_p7 = scmp.lt.s32.totalorder %s4816_s29, 3 }
  0x12   : > { %s6521_s11 = scalar_select %p4913_p4, 1, 0 }
  0x13   : > { %s6522_s12 = scalar_select %p4918_p6, 1, 0 }
  0x14   : > { %p4923_p8 = pnand %p4053_p5, %p222_p7  ;;  %s4818_s14 = smov [#allocation6]  }
  0x15   : > { %6523 = sst [smem:[#allocation18_spill]] %s6522_s12  ;;  %s234_s15 = sshll.u32 %s4818_s14, 4  ;;  %s4927_s15 = int_to_ptr.vmem [resolvable:$true] %s234_s15 }
  0x16   : > { %s6524_s13 = scalar_select %p4923_p8, 1, 0 }
  0x17   : > { %p4460_p9 = pneg %p4923_p8  ;;  %s4819_s17 = smov [#allocation8]  }
  0x18   : > { %s250_s18 = sshll.u32 %s4819_s17, 4  ;;  %s4820_s19 = smov [#allocation9]   ;;  %s4938_s18 = int_to_ptr.vmem [resolvable:$true] %s250_s18 }
  0x19   : > { %p4934_p11 = pnand %p4460_p9, %p4903_p1  ;;  %s4940_s20 = sshll.u32 %s4820_s19, 4  ;;  %s267_s20 = int_to_ptr.vmem [resolvable:$true] %s4940_s20 }
  0x1a   : > { %s4612_s23 = scalar_lea.hbm %s6502_s1, 1024 }
  0x1b   : > { %p4613_p12 = scmp.ne.s32.totalorder %s6502_s1, %s4612_s23  ;;  %p4950_p13 = pneg %p4934_p11 }
  0x1c   : > { %p4619_p5 = scmp.lt.u32.totalorder %s4612_s23, %s6502_s1 }
  0x1d   : > { %p4615_p0 = pnand %p4950_p13, %p4613_p12 }
  0x1f   : > { %p4616_p3 = pneg %p4615_p0 }
  0x21   : > { %p4621_p7 = pnand %p4619_p5, %p4616_p3 }
  0x23   : > { %4624 = shalt.err (!%p4621_p7)
}
  0x24   : > { %s4625_s21 = scalar_lea.vmem %s4927_s15, 1024  ;;  %p4633_p1 = scmp.lt.s32.totalorder %s4927_s15, %s4927_s15 }
  0x25   : > { %p4626_p9 = scmp.ne.s32.totalorder %s4927_s15, %s4625_s21  ;;  %p4634_p4 = scmp.lt.s32.totalorder %s4625_s21, %s4625_s21 }
  0x27   : > { %p4628_p10 = pnand %p4626_p9, %p4950_p13  ;;  %p4635_p12 = por %p4634_p4, %p4633_p1 }
  0x29   : > { %p4629_p6 = pneg %p4628_p10 }
  0x2b   : > { %p4636_p0 = pnand %p4635_p12, %p4629_p6 }
  0x2d   : > { %4639 = shalt.err (!%p4636_p0)
}
  0x2e   : > { %s4821_s22 = smov 64   ;;  %s4822_s23 = smov 4  }
  0x2f   : > { %4463 = dma.hbm_to_vmem [thread:$0]  (!%p4934_p11), %s6502_s1, 1024, %s4927_s15, [#allocation7], %s4821_s22, %s4821_s22, %s4822_s23  }
  0x30   : > { %s4640_s21 = scalar_lea.hbm %s6504_s3, 192 }
  0x31   : > { %p4641_p1 = scmp.ne.s32.totalorder %s6504_s3, %s4640_s21  ;;  %p4647_p10 = scmp.lt.u32.totalorder %s4640_s21, %s6504_s3 }
  0x33   : > { %p4643_p4 = pnand %p4641_p1, %p4950_p13 }
  0x35   : > { %p4644_p6 = pneg %p4643_p4 }
  0x37   : > { %p4649_p3 = pnand %p4647_p10, %p4644_p6 }
  0x39   : > { %4652 = shalt.err (!%p4649_p3)
}
  0x3a   : > { %s4653_s15 = scalar_lea.vmem %s4938_s18, 192  ;;  %p4661_p12 = scmp.lt.s32.totalorder %s4938_s18, %s4938_s18 }
  0x3b   : > { %p4654_p5 = scmp.ne.s32.totalorder %s4938_s18, %s4653_s15  ;;  %p4662_p0 = scmp.lt.s32.totalorder %s4653_s15, %s4653_s15 }
  0x3d   : > { %p4656_p7 = pnand %p4654_p5, %p4950_p13  ;;  %p4663_p1 = por %p4662_p0, %p4661_p12 }
  0x3f   : > { %p4657_p9 = pneg %p4656_p7 }
  0x41   : > { %p4664_p4 = pnand %p4663_p1, %p4657_p9 }
  0x43   : > { %4667 = shalt.err (!%p4664_p4)
}
  0x44   : > { %4466 = dma.hbm_to_vmem [thread:$0]  (!%p4934_p11), %s6504_s3, 192, %s4938_s18, [#allocation7], %s4821_s22, %s4821_s22, %s4822_s23  }
  0x45   : > { %s4668_s30 = scalar_lea.hbm %s6506_s5, 1024 }
  0x46   : > { %p4669_p6 = scmp.ne.s32.totalorder %s6506_s5, %s4668_s30  ;;  %p4675_p5 = scmp.lt.u32.totalorder %s4668_s30, %s6506_s5 }
  0x48   : > { %p4671_p10 = pnand %p4669_p6, %p4950_p13 }
  0x4a   : > { %p4672_p3 = pneg %p4671_p10 }
  0x4c   : > { %p4677_p7 = pnand %p4675_p5, %p4672_p3 }
  0x4e   : > { %4680 = shalt.err (!%p4677_p7)
}
  0x4f   : > { %s4681_s15 = scalar_lea.vmem %s267_s20, 1024  ;;  %p4689_p1 = scmp.lt.s32.totalorder %s267_s20, %s267_s20 }
  0x50   : > { %p4682_p9 = scmp.ne.s32.totalorder %s267_s20, %s4681_s15  ;;  %p4690_p4 = scmp.lt.s32.totalorder %s4681_s15, %s4681_s15 }
  0x52   : > { %p4684_p12 = pnand %p4682_p9, %p4950_p13  ;;  %p4691_p8 = por %p4690_p4, %p4689_p1 }
  0x54   : > { %p4685_p0 = pneg %p4684_p12 }
  0x56   : > { %p4692_p2 = pnand %p4691_p8, %p4685_p0 }
  0x58   : > { %4695 = shalt.err (!%p4692_p2)
}
  0x59   : > { %4469 = dma.hbm_to_vmem [thread:$0]  (!%p4934_p11), %s6506_s5, 1024, %s267_s20, [#allocation10], %s4821_s22, %s4821_s22, %s4822_s23  }
  0x5a   : > { %s44_s14 = sadd.s32 1, %s4804_s26  ;;  %s37_s16 = sadd.s32 1, %s4812_s28 }
  0x5b   : > { %p51_p2 = scmp.ne.s32.totalorder %s4804_s26, %s4800_s25  ;;  %p39_p8 = scmp.ge.s32.totalorder %s37_s16, 2 }
  0x5c   : > { %p52_p13 = scmp.eq.s32.totalorder %s4816_s29, 0  ;;  %p6527_p6 = scmp.ne.s32.totalorder %s6520_s10, 0 }
  0x5d   : > { %p4481_p3 = scmp.lt.s32.totalorder %s4816_s29, 2  ;;  %s6553_s16 = smov (%p39_p8, %s37_s16), 0 }
  0x5e   : > { %p5029_p10 = por %p6527_p6, %p51_p2  ;;  %p53_p5 = por %p52_p13, %p51_p2 }
  0x5f   : > { %s283_s27 = sand.u32 1, %s4804_s26   ;;  %s41_s12 = ssub.s32 %s4812_s28, %s6553_s16 }
  0x60   : > { %p42_p7 = scmp.eq.s32.totalorder %s41_s12, 0  ;;  %s4058_s20 = sshll.u32 %s283_s27, 8 }
  0x61   : > { %s4138_s22 = sshll.u32 %s4812_s28, 12  ;;  %s287_s17 = scalar_lea.vmem [#allocation3], %s4058_s20 }
  0x62   : > { %s5041_s23 = scalar_select %p42_p7, %s4804_s26, %s44_s14  }
  0x63   : > { %s5046_s10 = scalar_lea.hbm %s6501_s0, %s4138_s22  ;;  %s294_s19 = sshll.u32 %s287_s17, 4  ;;  %s5048_s19 = int_to_ptr.vmem [resolvable:$true] %s294_s19 }
  0x64   : > { %p5052_p11 = pnand %p4481_p3, %p53_p5  ;;  %s5056_s15 = scalar_lea.sflag [#allocation4], %s283_s27 }
  0x65   : > { %s4696_s18 = scalar_lea.hbm %s5046_s10, 4096  ;;  %s4701_s12 = scalar_lea.hbm %s6501_s0, 8192 }
  0x66   : > { %p4697_p9 = scmp.ne.s32.totalorder %s5046_s10, %s4696_s18  ;;  %p4698_p12 = pneg %p5052_p11 }
  0x67   : > { %p4702_p4 = scmp.lt.u32.totalorder %s5046_s10, %s6501_s0  ;;  %p4703_p2 = scmp.lt.u32.totalorder %s4701_s12, %s4696_s18 }
  0x68   : > { %p4699_p0 = pnand %p4698_p12, %p4697_p9  ;;  %p4705_p13 = scmp.lt.u32.totalorder %s4696_s18, %s5046_s10 }
  0x69   : > { %p4704_p8 = por %p4703_p2, %p4702_p4 }
  0x6a   : > { %p4700_p1 = pneg %p4699_p0 }
  0x6b   : > { %p4706_p6 = por %p4705_p13, %p4704_p8 }
  0x6d   : > { %p4707_p3 = pnand %p4706_p6, %p4700_p1 }
  0x6f   : > { %4710 = shalt.err (!%p4707_p3)
}
  0x70   : > { %s4711_s27 = scalar_lea.vmem %s5048_s19, 4096  ;;  %s4823_s30 = smov [#allocation3]  }
  0x71   : > { %p4712_p5 = scmp.ne.s32.totalorder %s5048_s19, %s4711_s27  ;;  %s4716_s8 = sshll.u32 %s4823_s30, 4  ;;  %s4717_s8 = int_to_ptr.vmem [resolvable:$false] %s4716_s8 }
  0x72   : > { %s4718_s17 = scalar_lea.vmem %s4717_s8, 8192  ;;  %p4719_p0 = scmp.lt.s32.totalorder %s5048_s19, %s4717_s8 }
  0x73   : > { %p4714_p7 = pnand %p4712_p5, %p4698_p12  ;;  %p4720_p4 = scmp.lt.s32.totalorder %s4718_s17, %s4711_s27 }
  0x75   : > { %p4715_p9 = pneg %p4714_p7  ;;  %p4721_p2 = por %p4720_p4, %p4719_p0 }
  0x77   : > { %p4722_p8 = pnand %p4721_p2, %p4715_p9 }
  0x79   : > { %4725 = shalt.err (!%p4722_p8)
}
  0x7a   : > { %s4824_s18 = smov 128   ;;  %s4825_s7 = smov 8  }
  0x7b   : > { %4473 = dma.hbm_to_vmem [thread:$0]  (!%p5052_p11), %s5046_s10, 4096, %s5048_s19, %s5056_s15, %s4824_s18, %s4824_s18, %s4825_s7  }
  0x7c   : > { %p6530_p12 = scmp.ne.s32.totalorder %s6524_s13, 0 }
  0x7d   : > { %s5087_s14 = sand.u32 (!%p6530_p12), 1, %s4800_s25   ;;  %p6531_p1 = scmp.ne.s32.totalorder (!%p6530_p12), %s6521_s11, 0 }
  0x7e   : > { %306 = sbr.rel (%p6530_p12) target bundleno = 1088 (0x440), region = 48  ;;  %s4062_s12 = sshll.u32 (!%p6530_p12), %s5087_s14, 8 }
  0x7f   : > { %s309_s20 = scalar_lea.sflag (!%p6530_p12), [#allocation4], %s5087_s14  ;;  %s5093_s22 = scalar_lea.vmem (!%p6530_p12), [#allocation3], %s4062_s12 }
  0x85   : > { %4779 = dma.done.wait (%p6531_p1), %s309_s20, 4096  }
  0x86   : > { %4781 = vsyncadd (%p6531_p1), %s309_s20, 4294963200  ;;  %p6532_p11 = scmp.ne.s32.totalorder %s6519_s9, 0 }
  0x88   : > { %4783 = dma.done.wait (%p6532_p11), [#allocation7], 1216  }
  0x89   : > { %4785 = vsyncadd (%p6532_p11), [#allocation7], 4294966080 }
  0x8a   : > { %4787 = dma.done.wait (%p6532_p11), [#allocation10], 1024  }
  0x8b   : > { %4789 = vsyncadd (%p6532_p11), [#allocation10], 4294966272  ;;  %v4543_v0 = vld [vmem:[#allocation6] sm:$0xff]   ;;  %v4544_v1 = vld [vmem:[#allocation6 + $0x8] sm:$0xff]   ;;  %vm862_vm0 = vsmask.f32 256 }
  0x8c   : > { %4344 = vmatprep.subr.bf16.mxu0 %v4543_v0  ;;  %v4545_v2 = vld [vmem:[#allocation6 + $0x10] sm:$0xff]   ;;  %v4546_v3 = vld [vmem:[#allocation6 + $0x18] sm:$0xff]   ;;  %v397_v4 = vld [vmem:[%s5093_s22] sm:$0xff]  ;;  %vm1225_vm1 = vcmask 1043456   ;;  %vm1226_vm2 = vsmask.f32 7938 }
  0x8d   : > { %4345 = vmatpush3.bf16.msra.mxu0 %v4543_v0  ;;  %v398_v5 = vld [vmem:[%s5093_s22 + $0x8] sm:$0xff]  ;;  %v402_v6 = vmul.f32 0.0, %v397_v4  ;;  %v4547_v9 = vld [vmem:[#allocation6 + $0x20] sm:$0xff]   ;;  %v4549_v11 = vld [vmem:[#allocation6 + $0x30] sm:$0xff]   ;;  %vm1232_vm3 = vcmask 1040384   ;;  %vm1699_vm9 = vcmask 1046528  }
  0x8e   : > { %4346 = vmatprep.subr.bf16.mxu0 %v4544_v1  ;;  %v403_v7 = vmul.f32 0.0, %v398_v5  ;;  %v4548_v10 = vld [vmem:[#allocation6 + $0x28] sm:$0xff]   ;;  %v4550_v12 = vld [vmem:[#allocation6 + $0x38] sm:$0xff]   ;;  %v362_v13 = vld [vmem:[%s5093_s22 + $0x10] sm:$0xff]  ;;  %v417_v15 = vpack.c.bf16 %v398_v5, %v397_v4  ;;  %vm863_vm4 = vsmask.f32 4368 }
  0x8f   : > { %v363_v14 = vld [vmem:[%s5093_s22 + $0x18] sm:$0xff]  ;;  %v364_v17 = vld [vmem:[%s5093_s22 + $0x20] sm:$0xff]  ;;  %v365_v18 = vld [vmem:[%s5093_s22 + $0x28] sm:$0xff]  ;;  %vm1977_vm10 = vcmask 1045504   ;;  %s6344_s7 = scalar_lea.vmem [#allocation11], %s4062_s12  ;;  %s6541_s12 = sld [smem:[#allocation17_spill]] }
  0x90   : > { %v416_v8 = vpack.c.bf16 %v403_v7, %v402_v6  ;;  %v418_v16 = vpack.c.bf16 %v363_v14, %v362_v13  ;;  %v366_v19 = vld [vmem:[%s5093_s22 + $0x30] sm:$0xff]  ;;  %v367_v20 = vld [vmem:[%s5093_s22 + $0x38] sm:$0xff]  ;;  %v419_v21 = vpack.c.bf16 %v365_v18, %v364_v17  ;;  %v368_v23 = vld [vmem:[%s5093_s22 + $0x40] sm:$0xff]  ;;  %s3932_s9 = sshll.u32 %s6344_s7, 4  ;;  %s6542_s10 = sld [smem:[#allocation19_spill]]  ;;  %s6448_s9 = int_to_ptr.vmem [resolvable:$true] %s3932_s9 }
  0x91   : > { %4347 = vmatpush3.bf16.msra.mxu0 %v4544_v1  ;;  %v420_v22 = vpack.c.bf16 %v367_v20, %v366_v19  ;;  %v369_v24 = vld [vmem:[%s5093_s22 + $0x48] sm:$0xff]  ;;  %v370_v25 = vld [vmem:[%s5093_s22 + $0x50] sm:$0xff]  ;;  %v371_v26 = vld [vmem:[%s5093_s22 + $0x58] sm:$0xff]  ;;  %s3916_s21 = scalar_lea.sflag [#allocation5], %s5087_s14  ;;  %s4726_s15 = scalar_lea.vmem %s6448_s9, 4096 }
  0x92   : > { %4348 = vmatprep.subr.bf16.mxu0 %v4545_v2  ;;  %4360 = vmatprep.mubr.bf16.mxu0 %v416_v8  ;;  %v421_v27 = vpack.c.bf16 %v369_v24, %v368_v23  ;;  %v422_v28 = vpack.c.bf16 %v371_v26, %v370_v25  ;;  %v372_v29 = vld [vmem:[%s5093_s22 + $0x60] sm:$0xff]  ;;  %v373_v30 = vld [vmem:[%s5093_s22 + $0x68] sm:$0xff]  ;;  %v374_v31 = vld [vmem:[%s5093_s22 + $0x70] sm:$0xff]  ;;  %p4727_p13 = scmp.ne.s32.totalorder %s6448_s9, %s4726_s15  ;;  %s4826_s27 = smov [#allocation11]  }
  0x93   : > { %v375_v32 = vld [vmem:[%s5093_s22 + $0x78] sm:$0xff]  ;;  %v423_v33 = vpack.c.bf16 %v373_v30, %v372_v29  ;;  %v376_v35 = vld [vmem:[%s5093_s22 + $0x80] sm:$0xff]  ;;  %v377_v36 = vld [vmem:[%s5093_s22 + $0x88] sm:$0xff]  ;;  %s4730_s30 = sshll.u32 %s4826_s27, 4  ;;  %s4731_s30 = int_to_ptr.vmem [resolvable:$false] %s4730_s30 }
  0x94   : > { %v424_v34 = vpack.c.bf16 %v375_v32, %v374_v31  ;;  %v378_v37 = vld [vmem:[%s5093_s22 + $0x90] sm:$0xff]  ;;  %v379_v38 = vld [vmem:[%s5093_s22 + $0x98] sm:$0xff]  ;;  %v425_v39 = vpack.c.bf16 %v377_v36, %v376_v35  ;;  %v380_v41 = vld [vmem:[%s5093_s22 + $0xa0] sm:$0xff]  ;;  %p4728_p6 = pnand %p4727_p13, %p5029_p10  ;;  %s4732_s8 = scalar_lea.vmem %s4731_s30, 8192 }
  0x95   : > { %4349 = vmatpush3.bf16.msra.mxu0 %v4545_v2  ;;  %v426_v40 = vpack.c.bf16 %v379_v38, %v378_v37  ;;  %v381_v42 = vld [vmem:[%s5093_s22 + $0xa8] sm:$0xff]  ;;  %v382_v43 = vld [vmem:[%s5093_s22 + $0xb0] sm:$0xff]  ;;  %v383_v44 = vld [vmem:[%s5093_s22 + $0xb8] sm:$0xff]  ;;  %s4175_s20 = sshll.u32 %s6541_s12, 12  ;;  %p4733_p5 = scmp.lt.s32.totalorder %s6448_s9, %s4731_s30 }
  0x96   : > { %4350 = vmatprep.subr.bf16.mxu0 %v4546_v3  ;;  %v427_v45 = vpack.c.bf16 %v381_v42, %v380_v41  ;;  %v428_v46 = vpack.c.bf16 %v383_v44, %v382_v43  ;;  %v384_v47 = vld [vmem:[%s5093_s22 + $0xc0] sm:$0xff]  ;;  %v385_v48 = vld [vmem:[%s5093_s22 + $0xc8] sm:$0xff]  ;;  %v386_v49 = vld [vmem:[%s5093_s22 + $0xd0] sm:$0xff]  ;;  %s6446_s19 = scalar_lea.hbm %s6542_s10, %s4175_s20  ;;  %p4729_p3 = pneg %p4728_p6 }
  0x97   : > { %v387_v50 = vld [vmem:[%s5093_s22 + $0xd8] sm:$0xff]  ;;  %v429_v51 = vpack.c.bf16 %v385_v48, %v384_v47  ;;  %v388_v53 = vld [vmem:[%s5093_s22 + $0xe0] sm:$0xff]  ;;  %v389_v54 = vld [vmem:[%s5093_s22 + $0xe8] sm:$0xff]  ;;  %p4734_p7 = scmp.lt.s32.totalorder %s4732_s8, %s4726_s15 }
  0x98   : > { %v430_v52 = vpack.c.bf16 %v387_v50, %v386_v49  ;;  %v390_v55 = vld [vmem:[%s5093_s22 + $0xf0] sm:$0xff]  ;;  %v391_v56 = vld [vmem:[%s5093_s22 + $0xf8] sm:$0xff]  ;;  %v431_v57 = vpack.c.bf16 %v389_v54, %v388_v53  ;;  %v4554_v1 = vld [vmem:[#allocation9 + $0x18] sm:$0xff]  }
  0x99   : > { %4351 = vmatpush3.bf16.msra.mxu0 %v4546_v3  ;;  %v432_v58 = vpack.c.bf16 %v391_v56, %v390_v55  ;;  %v414_v59 = vmul.f32 0.0, %v390_v55  ;;  %v415_v60 = vmul.f32 0.0, %v391_v56  ;;  %v4551_v62 = vld [vmem:[#allocation9] sm:$0xff]   ;;  %v4552_v63 = vld [vmem:[#allocation9 + $0x8] sm:$0xff]   ;;  %v4553_v0 = vld [vmem:[#allocation9 + $0x10] sm:$0xff]   ;;  %p4735_p9 = por %p4734_p7, %p4733_p5 }
  0x9a   : > { %4352 = vmatprep.subr.bf16.mxu0 %v4547_v9  ;;  %4396 = vmatprep.subr.bf16.mxu1 %v4551_v62  ;;  %v4555_v2 = vld [vmem:[#allocation9 + $0x20] sm:$0xff]   ;;  %v4556_v3 = vld [vmem:[#allocation9 + $0x28] sm:$0xff]   ;;  %v4557_v4 = vld [vmem:[#allocation9 + $0x30] sm:$0xff]  }
  0x9b   : > { %v433_v61 = vpack.c.bf16 %v415_v60, %v414_v59  ;;  %4397 = vmatpush3.bf16.msra.mxu1 %v4551_v62  ;;  %v4558_v5 = vld [vmem:[#allocation9 + $0x38] sm:$0xff]   ;;  %vm5152_vm5 = vmand %vm1225_vm1, %vm1226_vm2  ;;  %v1237_v42 = vld [vmem:[#allocation2 + $0xc] sm:$0xf]  ;;  %p4736_p0 = pnand %p4735_p9, %p4729_p3 }
  0x9c   : > { %4398 = vmatprep.subr.bf16.mxu1 %v4552_v63  ;;  %v5142_v6 = vld [vmem:[%s6503_s2] ss:$0 sm:$0xff]  ;;  %vm5158_vm6 = vmand %vm1232_vm3, %vm862_vm0  ;;  %v1241_v56 = vld [vmem:[#allocation2 + $0x14] sm:$0x1] }
  0x9d   : > { %4353 = vmatpush3.bf16.msra.mxu0 %v4547_v9  ;;  %v1228_v50 = vld [vmem:[#allocation2] sm:$0xf]  ;;  %vm5164_vm7 = vmor %vm862_vm0, %vm863_vm4  ;;  %v1234_v62 = vld [vmem:[#allocation2 + $0x8] sm:$0x1] }
  0x9e   : > { %4354 = vmatprep.subr.bf16.mxu0 %v4548_v10  ;;  %vm5196_vm8 = vmand %vm1232_vm3, %vm1226_vm2 }
  0x9f   : > { %4399 = vmatpush3.bf16.msra.mxu1 %v4552_v63 }
  0xa0   : > { %4400 = vmatprep.subr.bf16.mxu1 %v4553_v0 }
  0xa1   : > { %4355 = vmatpush3.bf16.msra.mxu0 %v4548_v10 }
  0xa2   : > { %4356 = vmatprep.subr.bf16.mxu0 %v4549_v11 }
  0xa3   : > { %4401 = vmatpush3.bf16.msra.mxu1 %v4553_v0 }
  0xa4   : > { %4402 = vmatprep.subr.bf16.mxu1 %v4554_v1 }
  0xa5   : > { %4357 = vmatpush3.bf16.msra.mxu0 %v4549_v11 }
  0xa6   : > { %4358 = vmatprep.subr.bf16.mxu0 %v4550_v12 }
  0xa7   : > { %4403 = vmatpush3.bf16.msra.mxu1 %v4554_v1 }
  0xa8   : > { %4404 = vmatprep.subr.bf16.mxu1 %v4555_v2 }
  0xa9   : > { %4359 = vmatpush3.bf16.msra.mxu0 %v4550_v12 }
  0xab   : > { %4405 = vmatpush3.bf16.msra.mxu1 %v4555_v2 }
  0xac   : > { %4361 = vmatmul.mubr.bf16.vlgmr.msra.gmra.mrb[0].mxu0 %v417_v15  ;;  %4406 = vmatprep.subr.bf16.mxu1 %v4556_v3 }
  0xad   : > { %4364 = vmatprep.mubr.bf16.mxu0 %v418_v16 }
  0xaf   : > { %4407 = vmatpush3.bf16.msra.mxu1 %v4556_v3 }
  0xb0   : > { %4408 = vmatprep.subr.bf16.mxu1 %v4557_v4 }
  0xb3   : > { %4409 = vmatpush3.bf16.msra.mxu1 %v4557_v4 }
  0xb4   : > { %4365 = vmatmul.mubr.bf16.gmra.mrb[4].mxu0 %v419_v21  ;;  %4410 = vmatprep.subr.bf16.mxu1 %v4558_v5 }
  0xb5   : > { %4368 = vmatprep.mubr.bf16.mxu0 %v420_v22 }
  0xb7   : > { %4411 = vmatpush3.bf16.msra.mxu1 %v4558_v5 }
  0xbc   : > { %4369 = vmatmul.mubr.bf16.gmra.mrb[8].mxu0 %v421_v27 }
  0xbd   : > { %4372 = vmatprep.mubr.bf16.mxu0 %v422_v28 }
  0xc4   : > { %4373 = vmatmul.mubr.bf16.gmra.mrb[12].mxu0 %v423_v33 }
  0xc5   : > { %4376 = vmatprep.mubr.bf16.mxu0 %v424_v34 }
  0xcc   : > { %4377 = vmatmul.mubr.bf16.gmra.mrb[16].mxu0 %v425_v39 }
  0xcd   : > { %4380 = vmatprep.mubr.bf16.mxu0 %v426_v40 }
  0xd4   : > { %4381 = vmatmul.mubr.bf16.gmra.mrb[20].mxu0 %v427_v45 }
  0xd5   : > { %4384 = vmatprep.mubr.bf16.mxu0 %v428_v46 }
  0xdc   : > { %4385 = vmatmul.mubr.bf16.gmra.mrb[24].mxu0 %v429_v51 }
  0xdd   : > { %4388 = vmatprep.mubr.bf16.mxu0 %v430_v52 }
  0xe4   : > { %4389 = vmatmul.mubr.bf16.gmra.mrb[28].mxu0 %v431_v57 }
  0xe5   : > { %4392 = vmatprep.mubr.bf16.mxu0 %v432_v58 }
  0xec   : > { %4393 = vmatmul.mubr.bf16.gmra.mrb[32].mxu0 %v433_v61 }
 0x17f   : > { %v4362_v7 = vpop.f32.mrb[0].mxu0 }
 0x180   : > { %v548_v8 = vadd.f32 %v4362_v7, %v5142_v6  ;;  %v539_v9 = vpop.f32.mrb[1].mxu0 }
 0x181   : > { %v540_v10 = vadd.f32 %v5142_v6, %v539_v9  ;;  %v4363_v11 = vpop.f32.mrb[2].mxu0 }
 0x182   : > { %v684_v12 = vmax.f32 %v548_v8, 0.0  ;;  %v551_v13 = vadd.f32 %v4363_v11, %v5142_v6  ;;  %v542_v14 = vpop.f32.mrb[3].mxu0 }
 0x183   : > { %v682_v15 = vmax.f32 %v540_v10, 0.0  ;;  %v543_v16 = vadd.f32 %v5142_v6, %v542_v14 }
 0x184   : > { %v720_v17 = vmin.f32 %v684_v12, 6.0  ;;  %v685_v18 = vmax.f32 %v551_v13, 0.0 }
 0x185   : > { %v718_v19 = vmin.f32 %v682_v15, 6.0  ;;  %v683_v20 = vmax.f32 %v543_v16, 0.0 }
 0x186   : > { %v4141_v21 = vpack.c.bf16 %v720_v17, %v720_v17  ;;  %v721_v22 = vmin.f32 %v685_v18, 6.0 }
 0x187   : > { %v4139_v23 = vpack.c.bf16 %v718_v19, %v718_v19  ;;  %v719_v24 = vmin.f32 %v683_v20, 6.0  ;;  %v4366_v25 = vpop.f32.mrb[4].mxu0 }
 0x188   : > { %v883_v26 = vshrl.u32 %v4141_v21, 16  ;;  %v886_v27 = vshll.u32 %v4141_v21, 16  ;;  %v4142_v28 = vpack.c.bf16 %v721_v22, %v721_v22  ;;  %v564_v29 = vadd.f32 %v4366_v25, %v5142_v6  ;;  %v555_v30 = vpop.f32.mrb[5].mxu0  ;;  %v1251_v21 = vld [vmem:[#allocation2 + $0x24] sm:$0xf] }
 0x189   : > { %v866_v31 = vshrl.u32 %v4139_v23, 16  ;;  %v869_v32 = vshll.u32 %v4139_v23, 16  ;;  %v4140_v33 = vpack.c.bf16 %v719_v24, %v719_v24  ;;  %v556_v34 = vadd.f32 %v5142_v6, %v555_v30  ;;  %v4367_v35 = vpop.f32.mrb[6].mxu0 }
 0x18a   : > { %v885_v36 = vrot.slane %v883_v26, 7  ;;  %v891_v37 = vshrl.u32 %v4142_v28, 16  ;;  %v894_v38 = vshll.u32 %v4142_v28, 16  ;;  %v688_v39 = vmax.f32 %v564_v29, 0.0  ;;  %v558_v40 = vpop.f32.mrb[7].mxu0 }
 0x18b   : > { %v868_v43 = vrot.slane %v866_v31, 7  ;;  %v874_v44 = vshrl.u32 %v4140_v33, 16  ;;  %v877_v45 = vshll.u32 %v4140_v33, 16  ;;  %v686_v46 = vmax.f32 %v556_v34, 0.0  ;;  %v1244_v28 = vld [vmem:[#allocation2 + $0x18] sm:$0xf] }
 0x18c   : > { %v888_v47 = vor.u32 %v886_v27, %v885_v36  ;;  %v889_v48 = vrot.slane %v885_v36, 4  ;;  %v893_v51 = vrot.slane %v891_v37, 7  ;;  %v724_v52 = vmin.f32 %v688_v39, 6.0 }
 0x18d   : > { %v871_v53 = vor.u32 %v869_v32, %v868_v43  ;;  %v872_v54 = vrot.slane %v868_v43, 4  ;;  %v876_v57 = vrot.slane %v874_v44, 7  ;;  %v722_v58 = vmin.f32 %v686_v46, 6.0 }
 0x18e   : > { %v1238_v59 = vsel %vm5152_vm5, %v888_v47, %v1237_v42  ;;  %v896_v60 = vor.u32 %v894_v38, %v893_v51  ;;  %v898_v61 = vrot.slane %v893_v51, 4  ;;  %v4145_v63 = vpack.c.bf16 %v724_v52, %v724_v52 }
 0x18f   : > { %1239 = vst [vmem:[#allocation2 + $0xc] sm:$0xf] %v1238_v59  ;;  %v1229_v0 = vsel %vm5152_vm5, %v871_v53, %v1228_v50  ;;  %v879_v1 = vor.u32 %v877_v45, %v876_v57  ;;  %v881_v2 = vrot.slane %v876_v57, 4  ;;  %v4143_v3 = vpack.c.bf16 %v722_v58, %v722_v58  ;;  %v4370_v4 = vpop.f32.mrb[8].mxu0 }
 0x190   : > { %1230 = vst [vmem:[#allocation2] sm:$0xf] %v1229_v0  ;;  %v897_v5 = vsel %vm5164_vm7, %v889_v48, %v896_v60  ;;  %v1242_v7 = vsel %vm5158_vm6, %v898_v61, %v1241_v56  ;;  %v917_v8 = vshrl.u32 %v4145_v63, 16  ;;  %v920_v9 = vshll.u32 %v4145_v63, 16  ;;  %v571_v10 = vpop.f32.mrb[9].mxu0 }
 0x191   : > { %1240 = vst [vmem:[#allocation2 + $0x10] sm:$0xf] %v897_v5  ;;  %1243 = vst [vmem:[#allocation2 + $0x14] sm:$0x1] %v1242_v7  ;;  %v880_v11 = vsel %vm5164_vm7, %v872_v54, %v879_v1  ;;  %v1235_v12 = vsel %vm5158_vm6, %v881_v2, %v1234_v62  ;;  %v900_v13 = vshrl.u32 %v4143_v3, 16  ;;  %v903_v14 = vshll.u32 %v4143_v3, 16 }
 0x192   : > { %v4371_v15 = vpop.f32.mrb[10].mxu0  ;;  %1231 = vst [vmem:[#allocation2 + $0x4] sm:$0xf] %v880_v11  ;;  %1236 = vst [vmem:[#allocation2 + $0x8] sm:$0x1] %v1235_v12  ;;  %v5180_v16 = vrot.slane %v917_v8, 7  ;;  %v567_v17 = vadd.f32 %v4367_v35, %v5142_v6  ;;  %v559_v18 = vadd.f32 %v5142_v6, %v558_v40  ;;  %v580_v19 = vadd.f32 %v4370_v4, %v5142_v6 }
 0x193   : > { %v574_v20 = vpop.f32.mrb[11].mxu0  ;;  %v5185_v22 = vrot.slane %v900_v13, 7  ;;  %v572_v23 = vadd.f32 %v5142_v6, %v571_v10  ;;  %v583_v24 = vadd.f32 %v4371_v15, %v5142_v6  ;;  %v1255_v3 = vld [vmem:[#allocation2 + $0x2c] sm:$0x1]  ;;  %v1248_v11 = vld [vmem:[#allocation2 + $0x20] sm:$0x1] }
 0x194   : > { %v575_v25 = vadd.f32 %v5142_v6, %v574_v20  ;;  %v922_v26 = vor.u32 %v920_v9, %v5180_v16  ;;  %v923_v27 = vrot.slane %v5180_v16, 4  ;;  %v689_v29 = vmax.f32 %v567_v17, 0.0  ;;  %v1265_v15 = vld [vmem:[#allocation2 + $0x3c] sm:$0xf] }
 0x195   : > { %v687_v30 = vmax.f32 %v559_v18, 0.0  ;;  %v905_v31 = vor.u32 %v903_v14, %v5185_v22  ;;  %v906_v32 = vrot.slane %v5185_v22, 4  ;;  %v692_v33 = vmax.f32 %v580_v19, 0.0 }
 0x196   : > { %v690_v34 = vmax.f32 %v572_v23, 0.0  ;;  %v1359_v35 = vld [vmem:[#allocation2 + $0xc] sm:$0x1]  ;;  %v1252_v37 = vsel %vm5152_vm5, %v922_v26, %v1251_v21  ;;  %v725_v38 = vmin.f32 %v689_v29, 6.0  ;;  %v693_v40 = vmax.f32 %v583_v24, 0.0 }
 0x197   : > { %v723_v39 = vmin.f32 %v687_v30, 6.0  ;;  %v1360_v42 = vsel %vm5158_vm6, 0, %v1359_v35  ;;  %v1356_v43 = vld [vmem:[#allocation2] sm:$0x1]  ;;  %1253 = vst [vmem:[#allocation2 + $0x24] sm:$0xf] %v1252_v37  ;;  %v1245_v44 = vsel %vm5152_vm5, %v905_v31, %v1244_v28 }
 0x198   : > { %v728_v45 = vmin.f32 %v692_v33, 6.0  ;;  %v726_v46 = vmin.f32 %v690_v34, 6.0  ;;  %v4374_v47 = vpop.f32.mrb[12].mxu0  ;;  %1361 = vst [vmem:[#allocation2 + $0xc] sm:$0x1] %v1360_v42  ;;  %v1357_v48 = vsel %vm5158_vm6, 0, %v1356_v43  ;;  %v4146_v51 = vpack.c.bf16 %v725_v38, %v725_v38 }
 0x199   : > { %v1414_v50 = vld [vmem:[#allocation2 + $0x14] sm:$0x1]  ;;  %1246 = vst [vmem:[#allocation2 + $0x18] sm:$0xf] %v1245_v44  ;;  %v4144_v52 = vpack.c.bf16 %v723_v39, %v723_v39  ;;  %v729_v53 = vmin.f32 %v693_v40, 6.0  ;;  %v5208_v54 = vpop.f32.mrb[13].mxu0  ;;  %v596_v19 = vadd.f32 %v4374_v47, %v5142_v6 }
 0x19a   : > { %1358 = vst [vmem:[#allocation2] sm:$0x1] %v1357_v48  ;;  %v1415_v56 = vsel %vm5196_vm8, 0, %v1414_v50  ;;  %v1411_v57 = vld [vmem:[#allocation2 + $0x8] sm:$0x1]  ;;  %v4149_v58 = vpack.c.bf16 %v728_v45, %v728_v45  ;;  %v4147_v59 = vpack.c.bf16 %v726_v46, %v726_v46  ;;  %v691_v60 = vmax.f32 %v575_v25, 0.0 }
 0x19b   : > { %v4375_v61 = vpop.f32.mrb[14].mxu0  ;;  %1416 = vst [vmem:[#allocation2 + $0x14] sm:$0x1] %v1415_v56  ;;  %v1412_v62 = vsel %vm5196_vm8, 0, %v1411_v57  ;;  %v925_v63 = vshrl.u32 %v4146_v51, 16  ;;  %v928_v0 = vshll.u32 %v4146_v51, 16  ;;  %v4150_v13 = vpack.c.bf16 %v729_v53, %v729_v53 }
 0x19c   : > { %v908_v1 = vshrl.u32 %v4144_v52, 16  ;;  %v590_v2 = vpop.f32.mrb[15].mxu0  ;;  %1413 = vst [vmem:[#allocation2 + $0x8] sm:$0x1] %v1412_v62  ;;  %v911_v4 = vshll.u32 %v4144_v52, 16  ;;  %v951_v5 = vshrl.u32 %v4149_v58, 16  ;;  %v588_v48 = vadd.f32 %v5142_v6, %v5208_v54 }
 0x19d   : > { %v954_v7 = vshll.u32 %v4149_v58, 16  ;;  %v934_v8 = vshrl.u32 %v4147_v59, 16  ;;  %v927_v9 = vrot.slane %v925_v63, 7  ;;  %v937_v12 = vshll.u32 %v4147_v59, 16  ;;  %v1258_v26 = vld [vmem:[#allocation2 + $0x30] sm:$0xf] }
 0x19e   : > { %v910_v10 = vrot.slane %v908_v1, 7  ;;  %v5214_v14 = vrot.slane %v951_v5, 7  ;;  %v727_v18 = vmin.f32 %v691_v60, 6.0  ;;  %v1365_v20 = vld [vmem:[#allocation2 + $0x24] sm:$0x1]  ;;  %v962_v44 = vshll.u32 %v4150_v13, 16 }
 0x19f   : > { %v5216_v17 = vrot.slane %v934_v8, 7  ;;  %v930_v21 = vor.u32 %v928_v0, %v927_v9  ;;  %v932_v23 = vrot.slane %v927_v9, 4  ;;  %v1366_v28 = vsel %vm5158_vm6, 0, %v1365_v20  ;;  %v4378_v34 = vpop.f32.mrb[16].mxu0  ;;  %v1269_v59 = vld [vmem:[#allocation2 + $0x44] sm:$0x1] }
 0x1a0   : > { %v913_v24 = vor.u32 %v911_v4, %v910_v10  ;;  %v915_v25 = vrot.slane %v910_v10, 4  ;;  %v1362_v29 = vld [vmem:[#allocation2 + $0x18] sm:$0x1]  ;;  %v956_v30 = vor.u32 %v954_v7, %v5214_v14  ;;  %v957_v31 = vrot.slane %v5214_v14, 4  ;;  %1367 = vst [vmem:[#allocation2 + $0x24] sm:$0x1] %v1366_v28 }
 0x1a1   : > { %v939_v33 = vor.u32 %v937_v12, %v5216_v17  ;;  %v1363_v35 = vsel %vm5158_vm6, 0, %v1362_v29  ;;  %v931_v37 = vsel %vm5164_vm7, %v923_v27, %v930_v21  ;;  %v1256_v38 = vsel %vm5158_vm6, %v932_v23, %v1255_v3  ;;  %v5236_v40 = vpop.f32.mrb[17].mxu0  ;;  %v1262_v5 = vld [vmem:[#allocation2 + $0x38] sm:$0x1] }
 0x1a2   : > { %v914_v39 = vsel %vm5164_vm7, %v906_v32, %v913_v24  ;;  %1364 = vst [vmem:[#allocation2 + $0x18] sm:$0x1] %v1363_v35  ;;  %1254 = vst [vmem:[#allocation2 + $0x28] sm:$0xf] %v931_v37  ;;  %v1249_v16 = vsel %vm5158_vm6, %v915_v25, %v1248_v11  ;;  %v1266_v27 = vsel %vm5152_vm5, %v956_v30, %v1265_v15  ;;  %v940_v42 = vrot.slane %v5216_v17, 4  ;;  %v5245_v43 = vpop.f32.mrb[18].mxu0 }
 0x1a3   : > { %1257 = vst [vmem:[#allocation2 + $0x2c] sm:$0x1] %v1256_v38  ;;  %1247 = vst [vmem:[#allocation2 + $0x1c] sm:$0xf] %v914_v39  ;;  %v1259_v22 = vsel %vm5152_vm5, %v939_v33, %v1258_v26  ;;  %v959_v32 = vshrl.u32 %v4150_v13, 16  ;;  %v4148_v45 = vpack.c.bf16 %v727_v18, %v727_v18  ;;  %v696_v46 = vmax.f32 %v596_v19, 0.0 }
 0x1a4   : > { %1250 = vst [vmem:[#allocation2 + $0x20] sm:$0x1] %v1249_v16  ;;  %1267 = vst [vmem:[#allocation2 + $0x3c] sm:$0xf] %v1266_v27  ;;  %v5247_v47 = vpop.f32.mrb[19].mxu0  ;;  %v599_v50 = vadd.f32 %v4375_v61, %v5142_v6  ;;  %v591_v51 = vadd.f32 %v5142_v6, %v590_v2  ;;  %v612_v52 = vadd.f32 %v4378_v34, %v5142_v6  ;;  %v694_v60 = vmax.f32 %v588_v48, 0.0 }
 0x1a5   : > { %1260 = vst [vmem:[#allocation2 + $0x30] sm:$0xf] %v1259_v22  ;;  %v961_v53 = vrot.slane %v959_v32, 7  ;;  %v942_v56 = vshrl.u32 %v4148_v45, 16  ;;  %v945_v57 = vshll.u32 %v4148_v45, 16  ;;  %v732_v58 = vmin.f32 %v696_v46, 6.0 }
 0x1a6   : > { %v697_v62 = vmax.f32 %v599_v50, 0.0  ;;  %v695_v63 = vmax.f32 %v591_v51, 0.0  ;;  %v700_v0 = vmax.f32 %v612_v52, 0.0  ;;  %v730_v7 = vmin.f32 %v694_v60, 6.0  ;;  %v1279_v38 = vld [vmem:[#allocation2 + $0x54] sm:$0xf] }
 0x1a7   : > { %v964_v1 = vor.u32 %v962_v44, %v961_v53  ;;  %v966_v3 = vrot.slane %v961_v53, 4  ;;  %v944_v4 = vrot.slane %v942_v56, 7  ;;  %v4153_v54 = vpack.c.bf16 %v732_v58, %v732_v58  ;;  %v5254_v9 = vpop.f32.mrb[20].mxu0  ;;  %v1272_v46 = vld [vmem:[#allocation2 + $0x48] sm:$0xf] }
 0x1a8   : > { %v733_v61 = vmin.f32 %v697_v62, 6.0  ;;  %v731_v8 = vmin.f32 %v695_v63, 6.0  ;;  %v736_v2 = vmin.f32 %v700_v0, 6.0  ;;  %v5260_v15 = vpop.f32.mrb[21].mxu0  ;;  %v4151_v21 = vpack.c.bf16 %v730_v7, %v730_v7  ;;  %v1283_v58 = vld [vmem:[#allocation2 + $0x5c] sm:$0x1] }
 0x1a9   : > { %v965_v11 = vsel %vm5164_vm7, %v957_v31, %v964_v1  ;;  %v1270_v12 = vsel %vm5158_vm6, %v966_v3, %v1269_v59  ;;  %v947_v13 = vor.u32 %v945_v57, %v944_v4  ;;  %v949_v14 = vrot.slane %v944_v4, 4  ;;  %v5272_v30 = vpop.f32.mrb[22].mxu0 }
 0x1aa   : > { %v1420_v10 = vld [vmem:[#allocation2 + $0x2c] sm:$0x1]  ;;  %1268 = vst [vmem:[#allocation2 + $0x40] sm:$0xf] %v965_v11  ;;  %1271 = vst [vmem:[#allocation2 + $0x44] sm:$0x1] %v1270_v12  ;;  %v4154_v23 = vpack.c.bf16 %v733_v61, %v733_v61  ;;  %v4157_v45 = vpack.c.bf16 %v736_v2, %v736_v2  ;;  %v604_v52 = vadd.f32 %v5142_v6, %v5236_v40 }
 0x1ab   : > { %v1421_v17 = vsel %vm5196_vm8, 0, %v1420_v10  ;;  %v1417_v18 = vld [vmem:[#allocation2 + $0x20] sm:$0x1]  ;;  %v1371_v19 = vld [vmem:[#allocation2 + $0x3c] sm:$0x1]  ;;  %v985_v20 = vshrl.u32 %v4153_v54, 16  ;;  %v948_v28 = vsel %vm5164_vm7, %v940_v42, %v947_v13  ;;  %v1263_v29 = vsel %vm5158_vm6, %v949_v14, %v1262_v5 }
 0x1ac   : > { %1422 = vst [vmem:[#allocation2 + $0x2c] sm:$0x1] %v1421_v17  ;;  %v1418_v24 = vsel %vm5196_vm8, 0, %v1417_v18  ;;  %v1372_v25 = vsel %vm5158_vm6, 0, %v1371_v19  ;;  %v1368_v26 = vld [vmem:[#allocation2 + $0x30] sm:$0x1]  ;;  %v4152_v42 = vpack.c.bf16 %v731_v8, %v731_v8 }
 0x1ad   : > { %1419 = vst [vmem:[#allocation2 + $0x20] sm:$0x1] %v1418_v24  ;;  %1373 = vst [vmem:[#allocation2 + $0x3c] sm:$0x1] %v1372_v25  ;;  %v1369_v31 = vsel %vm5158_vm6, 0, %v1368_v26  ;;  %v987_v33 = vrot.slane %v985_v20, 7  ;;  %v615_v25 = vadd.f32 %v5245_v43, %v5142_v6  ;;  %v607_v26 = vadd.f32 %v5142_v6, %v5247_v47 }
 0x1ae   : > { %1261 = vst [vmem:[#allocation2 + $0x34] sm:$0xf] %v948_v28  ;;  %1264 = vst [vmem:[#allocation2 + $0x38] sm:$0x1] %v1263_v29  ;;  %v988_v34 = vshll.u32 %v4153_v54, 16  ;;  %v968_v35 = vshrl.u32 %v4151_v21, 16  ;;  %v631_v43 = vadd.f32 %v5272_v30, %v5142_v6 }
 0x1af   : > { %v5276_v37 = vpop.f32.mrb[23].mxu0  ;;  %1370 = vst [vmem:[#allocation2 + $0x30] sm:$0x1] %v1369_v31  ;;  %v971_v39 = vshll.u32 %v4151_v21, 16  ;;  %v993_v16 = vshrl.u32 %v4154_v23, 16  ;;  %v996_v27 = vshll.u32 %v4154_v23, 16  ;;  %v628_v31 = vadd.f32 %v5254_v9, %v5142_v6 }
 0x1b0   : > { %v990_v22 = vor.u32 %v988_v34, %v987_v33  ;;  %v991_v32 = vrot.slane %v987_v33, 4  ;;  %v970_v44 = vrot.slane %v968_v35, 7  ;;  %v976_v50 = vshrl.u32 %v4152_v42, 16  ;;  %v5282_v60 = vpop.f32.mrb[24].mxu0  ;;  %v1276_v54 = vld [vmem:[#allocation2 + $0x50] sm:$0x1] }
 0x1b1   : > { %v995_v48 = vrot.slane %v993_v16, 7  ;;  %v979_v51 = vshll.u32 %v4152_v42, 16  ;;  %v1019_v59 = vshrl.u32 %v4157_v45, 16  ;;  %v1426_v62 = vld [vmem:[#allocation2 + $0x44] sm:$0x1]  ;;  %v1022_v3 = vshll.u32 %v4157_v45, 16 }
 0x1b2   : > { %v1280_v53 = vsel %vm5152_vm5, %v990_v22, %v1279_v38  ;;  %v973_v56 = vor.u32 %v971_v39, %v970_v44  ;;  %v974_v57 = vrot.slane %v970_v44, 4  ;;  %v978_v1 = vrot.slane %v976_v50, 7  ;;  %v5284_v4 = vpop.f32.mrb[25].mxu0  ;;  %v1293_v14 = vld [vmem:[#allocation2 + $0x6c] sm:$0xf] }
 0x1b3   : > { %1281 = vst [vmem:[#allocation2 + $0x54] sm:$0xf] %v1280_v53  ;;  %v998_v63 = vor.u32 %v996_v27, %v995_v48  ;;  %v1000_v0 = vrot.slane %v995_v48, 4  ;;  %v1427_v40 = vsel %vm5196_vm8, 0, %v1426_v62  ;;  %v5290_v7 = vrot.slane %v1019_v59, 7  ;;  %v5292_v8 = vpop.f32.mrb[26].mxu0 }
 0x1b4   : > { %v1273_v5 = vsel %vm5152_vm5, %v973_v56, %v1272_v46  ;;  %v698_v61 = vmax.f32 %v604_v52, 0.0  ;;  %1428 = vst [vmem:[#allocation2 + $0x44] sm:$0x1] %v1427_v40  ;;  %v981_v12 = vor.u32 %v979_v51, %v978_v1  ;;  %v983_v13 = vrot.slane %v978_v1, 4  ;;  %v5298_v17 = vpop.f32.mrb[27].mxu0 }
 0x1b5   : > { %v1423_v2 = vld [vmem:[#allocation2 + $0x38] sm:$0x1]  ;;  %1274 = vst [vmem:[#allocation2 + $0x48] sm:$0xf] %v1273_v5  ;;  %v999_v10 = vsel %vm5164_vm7, %v991_v32, %v998_v63  ;;  %v1284_v11 = vsel %vm5158_vm6, %v1000_v0, %v1283_v58  ;;  %v1024_v19 = vor.u32 %v1022_v3, %v5290_v7  ;;  %v1025_v20 = vrot.slane %v5290_v7, 4 }
 0x1b6   : > { %v1424_v18 = vsel %vm5196_vm8, 0, %v1423_v2  ;;  %1282 = vst [vmem:[#allocation2 + $0x58] sm:$0xf] %v999_v10  ;;  %1285 = vst [vmem:[#allocation2 + $0x5c] sm:$0x1] %v1284_v11  ;;  %v734_v21 = vmin.f32 %v698_v61, 6.0  ;;  %v982_v23 = vsel %vm5164_vm7, %v974_v57, %v981_v12  ;;  %v1277_v24 = vsel %vm5158_vm6, %v983_v13, %v1276_v54 }
 0x1b7   : > { %1425 = vst [vmem:[#allocation2 + $0x38] sm:$0x1] %v1424_v18  ;;  %1275 = vst [vmem:[#allocation2 + $0x4c] sm:$0xf] %v982_v23  ;;  %v1294_v28 = vsel %vm5152_vm5, %v1024_v19, %v1293_v14  ;;  %v620_v33 = vadd.f32 %v5142_v6, %v5260_v15  ;;  %v701_v34 = vmax.f32 %v615_v25, 0.0  ;;  %v699_v35 = vmax.f32 %v607_v26, 0.0 }
 0x1b8   : > { %1278 = vst [vmem:[#allocation2 + $0x50] sm:$0x1] %v1277_v24  ;;  %v4155_v29 = vpack.c.bf16 %v734_v21, %v734_v21  ;;  %1295 = vst [vmem:[#allocation2 + $0x6c] sm:$0xf] %v1294_v28  ;;  %v623_v47 = vadd.f32 %v5142_v6, %v5276_v37  ;;  %v704_v27 = vmax.f32 %v628_v31, 0.0  ;;  %v705_v44 = vmax.f32 %v631_v43, 0.0 }
 0x1b9   : > { %v702_v42 = vmax.f32 %v620_v33, 0.0  ;;  %v1286_v22 = vld [vmem:[#allocation2 + $0x60] sm:$0xf]  ;;  %v737_v32 = vmin.f32 %v701_v34, 6.0  ;;  %v735_v15 = vmin.f32 %v699_v35, 6.0  ;;  %v5324_v45 = vpop.f32.mrb[28].mxu0  ;;  %v644_v31 = vadd.f32 %v5282_v60, %v5142_v6 }
 0x1ba   : > { %v1377_v38 = vld [vmem:[#allocation2 + $0x54] sm:$0x1]  ;;  %v1002_v39 = vshrl.u32 %v4155_v29, 16  ;;  %v1005_v16 = vshll.u32 %v4155_v29, 16  ;;  %v740_v48 = vmin.f32 %v704_v27, 6.0  ;;  %v703_v37 = vmax.f32 %v623_v47, 0.0 }
 0x1bb   : > { %v1378_v9 = vsel %vm5158_vm6, 0, %v1377_v38  ;;  %v738_v50 = vmin.f32 %v702_v42, 6.0  ;;  %v4158_v53 = vpack.c.bf16 %v737_v32, %v737_v32  ;;  %v4156_v56 = vpack.c.bf16 %v735_v15, %v735_v15  ;;  %v5328_v58 = vpop.f32.mrb[29].mxu0  ;;  %v1297_v21 = vld [vmem:[#allocation2 + $0x74] sm:$0x1] }
 0x1bc   : > { %1379 = vst [vmem:[#allocation2 + $0x54] sm:$0x1] %v1378_v9  ;;  %v1374_v46 = vld [vmem:[#allocation2 + $0x48] sm:$0x1]  ;;  %v1004_v30 = vrot.slane %v1002_v39, 7  ;;  %v741_v57 = vmin.f32 %v705_v44, 6.0  ;;  %v4161_v0 = vpack.c.bf16 %v740_v48, %v740_v48 }
 0x1bd   : > { %v1375_v51 = vsel %vm5158_vm6, 0, %v1374_v46  ;;  %v1432_v52 = vld [vmem:[#allocation2 + $0x5c] sm:$0x1]  ;;  %v5332_v1 = vpop.f32.mrb[30].mxu0  ;;  %v1027_v40 = vshrl.u32 %v4158_v53, 16  ;;  %v1030_v5 = vshll.u32 %v4158_v53, 16  ;;  %v4159_v24 = vpack.c.bf16 %v738_v50, %v738_v50 }
 0x1be   : > { %1376 = vst [vmem:[#allocation2 + $0x48] sm:$0x1] %v1375_v51  ;;  %v1433_v59 = vsel %vm5196_vm8, 0, %v1432_v52  ;;  %v1007_v62 = vor.u32 %v1005_v16, %v1004_v30  ;;  %v1008_v63 = vrot.slane %v1004_v30, 4  ;;  %v1010_v54 = vshrl.u32 %v4156_v56, 16  ;;  %v5338_v14 = vpop.f32.mrb[31].mxu0 }
 0x1bf   : > { %1434 = vst [vmem:[#allocation2 + $0x5c] sm:$0x1] %v1433_v59  ;;  %v1429_v3 = vld [vmem:[#allocation2 + $0x50] sm:$0x1]  ;;  %v1013_v61 = vshll.u32 %v4156_v56, 16  ;;  %v1053_v12 = vshrl.u32 %v4161_v0, 16  ;;  %v4162_v28 = vpack.c.bf16 %v741_v57, %v741_v57  ;;  %v636_v52 = vadd.f32 %v5142_v6, %v5284_v4 }
 0x1c0   : > { %v1430_v2 = vsel %vm5196_vm8, 0, %v1429_v3  ;;  %v1383_v10 = vld [vmem:[#allocation2 + $0x6c] sm:$0x1]  ;;  %v1287_v11 = vsel %vm5152_vm5, %v1007_v62, %v1286_v22  ;;  %v1056_v13 = vshll.u32 %v4161_v0, 16  ;;  %v1029_v19 = vrot.slane %v1027_v40, 7  ;;  %v5344_v33 = vpop.f32.mrb[32].mxu0 }
 0x1c1   : > { %1431 = vst [vmem:[#allocation2 + $0x50] sm:$0x1] %v1430_v2  ;;  %v1384_v18 = vsel %vm5158_vm6, 0, %v1383_v10  ;;  %1288 = vst [vmem:[#allocation2 + $0x60] sm:$0xf] %v1287_v11  ;;  %v1012_v23 = vrot.slane %v1010_v54, 7  ;;  %v647_v53 = vadd.f32 %v5292_v8, %v5142_v6 }
 0x1c2   : > { %1385 = vst [vmem:[#allocation2 + $0x6c] sm:$0x1] %v1384_v18  ;;  %v1290_v25 = vld [vmem:[#allocation2 + $0x68] sm:$0x1]  ;;  %v1055_v26 = vrot.slane %v1053_v12, 7  ;;  %v739_v29 = vmin.f32 %v703_v37, 6.0  ;;  %v1032_v34 = vor.u32 %v1030_v5, %v1029_v19 }
 0x1c3   : > { %v1034_v35 = vrot.slane %v1029_v19, 4  ;;  %v1015_v43 = vor.u32 %v1013_v61, %v1012_v23  ;;  %v1017_v47 = vrot.slane %v1012_v23, 4  ;;  %v1307_v38 = vld [vmem:[#allocation2 + $0x84] sm:$0xf]  ;;  %v5346_v39 = vpop.f32.mrb[33].mxu0  ;;  %v1036_v42 = vshrl.u32 %v4159_v24, 16 }
 0x1c4   : > { %v1058_v16 = vor.u32 %v1056_v13, %v1055_v26  ;;  %v1059_v27 = vrot.slane %v1055_v26, 4  ;;  %v1039_v9 = vshll.u32 %v4159_v24, 16  ;;  %v5348_v22 = vpop.f32.mrb[34].mxu0  ;;  %v1033_v60 = vsel %vm5164_vm7, %v1025_v20, %v1032_v34  ;;  %v1300_v50 = vld [vmem:[#allocation2 + $0x78] sm:$0xf] }
 0x1c5   : > { %v1298_v32 = vsel %vm5158_vm6, %v1034_v35, %v1297_v21  ;;  %v1016_v15 = vsel %vm5164_vm7, %v1008_v63, %v1015_v43  ;;  %v1291_v44 = vsel %vm5158_vm6, %v1017_v47, %v1290_v25  ;;  %v5360_v46 = vpop.f32.mrb[35].mxu0  ;;  %1296 = vst [vmem:[#allocation2 + $0x70] sm:$0xf] %v1033_v60  ;;  %v1038_v30 = vrot.slane %v1036_v42, 7  ;;  %v1311_v3 = vld [vmem:[#allocation2 + $0x8c] sm:$0x1] }
 0x1c6   : > { %1299 = vst [vmem:[#allocation2 + $0x74] sm:$0x1] %v1298_v32  ;;  %1289 = vst [vmem:[#allocation2 + $0x64] sm:$0xf] %v1016_v15  ;;  %v1308_v7 = vsel %vm5152_vm5, %v1058_v16, %v1307_v38  ;;  %v1061_v20 = vshrl.u32 %v4162_v28, 16  ;;  %v1064_v48 = vshll.u32 %v4162_v28, 16  ;;  %v4160_v37 = vpack.c.bf16 %v739_v29, %v739_v29 }
 0x1c7   : > { %1292 = vst [vmem:[#allocation2 + $0x68] sm:$0x1] %v1291_v44  ;;  %1309 = vst [vmem:[#allocation2 + $0x84] sm:$0xf] %v1308_v7  ;;  %v708_v51 = vmax.f32 %v644_v31, 0.0  ;;  %v1041_v57 = vor.u32 %v1039_v9, %v1038_v30  ;;  %v1042_v59 = vrot.slane %v1038_v30, 4  ;;  %v639_v63 = vadd.f32 %v5142_v6, %v5298_v17 }
 0x1c8   : > { %v1380_v56 = vld [vmem:[#allocation2 + $0x60] sm:$0x1]  ;;  %v1063_v62 = vrot.slane %v1061_v20, 7  ;;  %v1044_v40 = vshrl.u32 %v4160_v37, 16  ;;  %v1047_v5 = vshll.u32 %v4160_v37, 16  ;;  %v706_v2 = vmax.f32 %v636_v52, 0.0 }
 0x1c9   : > { %v1381_v0 = vsel %vm5158_vm6, 0, %v1380_v56  ;;  %v744_v54 = vmin.f32 %v708_v51, 6.0  ;;  %v1301_v4 = vsel %vm5152_vm5, %v1041_v57, %v1300_v50  ;;  %v709_v12 = vmax.f32 %v647_v53, 0.0  ;;  %v1304_v19 = vld [vmem:[#allocation2 + $0x80] sm:$0x1] }
 0x1ca   : > { %1382 = vst [vmem:[#allocation2 + $0x60] sm:$0x1] %v1381_v0  ;;  %v1066_v61 = vor.u32 %v1064_v48, %v1063_v62  ;;  %v1068_v8 = vrot.slane %v1063_v62, 4  ;;  %1302 = vst [vmem:[#allocation2 + $0x78] sm:$0xf] %v1301_v4  ;;  %v1046_v10 = vrot.slane %v1044_v40, 7  ;;  %v660_v23 = vadd.f32 %v5324_v45, %v5142_v6 }
 0x1cb   : > { %v4165_v11 = vpack.c.bf16 %v744_v54, %v744_v54  ;;  %v707_v13 = vmax.f32 %v639_v63, 0.0  ;;  %v742_v21 = vmin.f32 %v706_v2, 6.0  ;;  %v652_v31 = vadd.f32 %v5142_v6, %v5328_v58  ;;  %v1321_v42 = vld [vmem:[#allocation2 + $0x9c] sm:$0xf]  ;;  %v1314_v57 = vld [vmem:[#allocation2 + $0x90] sm:$0xf] }
 0x1cc   : > { %v1067_v17 = vsel %vm5164_vm7, %v1059_v27, %v1066_v61  ;;  %v1312_v18 = vsel %vm5158_vm6, %v1068_v8, %v1311_v3  ;;  %v1049_v26 = vor.u32 %v1047_v5, %v1046_v10  ;;  %v1051_v28 = vrot.slane %v1046_v10, 4  ;;  %v1325_v10 = vld [vmem:[#allocation2 + $0xa4] sm:$0x1] }
 0x1cd   : > { %v1438_v24 = vld [vmem:[#allocation2 + $0x74] sm:$0x1]  ;;  %1310 = vst [vmem:[#allocation2 + $0x88] sm:$0xf] %v1067_v17  ;;  %1313 = vst [vmem:[#allocation2 + $0x8c] sm:$0x1] %v1312_v18  ;;  %v4163_v38 = vpack.c.bf16 %v742_v21, %v742_v21  ;;  %v663_v52 = vadd.f32 %v5332_v1, %v5142_v6  ;;  %v655_v21 = vadd.f32 %v5142_v6, %v5338_v14 }
 0x1ce   : > { %v1435_v25 = vld [vmem:[#allocation2 + $0x68] sm:$0x1]  ;;  %v1087_v29 = vshrl.u32 %v4165_v11, 16  ;;  %v1439_v34 = vsel %vm5196_vm8, 0, %v1438_v24  ;;  %v1389_v43 = vld [vmem:[#allocation2 + $0x84] sm:$0x1]  ;;  %v1050_v16 = vsel %vm5164_vm7, %v1042_v59, %v1049_v26  ;;  %v1305_v58 = vsel %vm5158_vm6, %v1051_v28, %v1304_v19 }
 0x1cf   : > { %v1436_v35 = vsel %vm5196_vm8, 0, %v1435_v25  ;;  %v1090_v47 = vshll.u32 %v4165_v11, 16  ;;  %1440 = vst [vmem:[#allocation2 + $0x74] sm:$0x1] %v1439_v34  ;;  %v1390_v45 = vsel %vm5158_vm6, 0, %v1389_v43  ;;  %v1070_v9 = vshrl.u32 %v4163_v38, 16 }
 0x1d0   : > { %1437 = vst [vmem:[#allocation2 + $0x68] sm:$0x1] %v1436_v35  ;;  %v1089_v27 = vrot.slane %v1087_v29, 7  ;;  %1391 = vst [vmem:[#allocation2 + $0x84] sm:$0x1] %v1390_v45  ;;  %v1073_v60 = vshll.u32 %v4163_v38, 16 }
 0x1d1   : > { %1303 = vst [vmem:[#allocation2 + $0x7c] sm:$0xf] %v1050_v16  ;;  %1306 = vst [vmem:[#allocation2 + $0x80] sm:$0x1] %v1305_v58  ;;  %v745_v32 = vmin.f32 %v709_v12, 6.0  ;;  %v743_v15 = vmin.f32 %v707_v13, 6.0 }
 0x1d2   : > { %v1092_v44 = vor.u32 %v1090_v47, %v1089_v27  ;;  %v1093_v7 = vrot.slane %v1089_v27, 4  ;;  %v712_v30 = vmax.f32 %v660_v23, 0.0  ;;  %v710_v20 = vmax.f32 %v652_v31, 0.0  ;;  %v1386_v48 = vld [vmem:[#allocation2 + $0x78] sm:$0x1] }
 0x1d3   : > { %v1072_v50 = vrot.slane %v1070_v9, 7  ;;  %v4166_v37 = vpack.c.bf16 %v745_v32, %v745_v32  ;;  %v4164_v51 = vpack.c.bf16 %v743_v15, %v743_v15  ;;  %v1387_v53 = vsel %vm5158_vm6, 0, %v1386_v48  ;;  %v1318_v26 = vld [vmem:[#allocation2 + $0x98] sm:$0x1]  ;;  %v1335_v6 = vld [vmem:[#allocation2 + $0xb4] sm:$0xf] }
 0x1d4   : > { %v1322_v56 = vsel %vm5152_vm5, %v1092_v44, %v1321_v42  ;;  %v748_v59 = vmin.f32 %v712_v30, 6.0  ;;  %v746_v62 = vmin.f32 %v710_v20, 6.0  ;;  %1388 = vst [vmem:[#allocation2 + $0x78] sm:$0x1] %v1387_v53  ;;  %v1444_v63 = vld [vmem:[#allocation2 + $0x8c] sm:$0x1] }
 0x1d5   : > { %1323 = vst [vmem:[#allocation2 + $0x9c] sm:$0xf] %v1322_v56  ;;  %v1075_v0 = vor.u32 %v1073_v60, %v1072_v50  ;;  %v1076_v3 = vrot.slane %v1072_v50, 4  ;;  %v1095_v40 = vshrl.u32 %v4166_v37, 16  ;;  %v1098_v5 = vshll.u32 %v4166_v37, 16  ;;  %v5431_v37 = vld [vmem:[#allocation2] sm:$0xff]  }
 0x1d6   : > { %v1445_v54 = vsel %vm5196_vm8, 0, %v1444_v63  ;;  %v1078_v1 = vshrl.u32 %v4164_v51, 16  ;;  %v1081_v4 = vshll.u32 %v4164_v51, 16  ;;  %v4169_v61 = vpack.c.bf16 %v748_v59, %v748_v59  ;;  %v1328_v9 = vld [vmem:[#allocation2 + $0xa8] sm:$0xf] }
 0x1d7   : > { %1446 = vst [vmem:[#allocation2 + $0x8c] sm:$0x1] %v1445_v54  ;;  %v1315_v8 = vsel %vm5152_vm5, %v1075_v0, %v1314_v57  ;;  %v1097_v2 = vrot.slane %v1095_v40, 7  ;;  %v4167_v11 = vpack.c.bf16 %v746_v62, %v746_v62  ;;  %v713_v12 = vmax.f32 %v663_v52, 0.0  ;;  %v4559_v20 = vld [vmem:[%s6503_s2] ss:$0 sm:$0xff] }
 0x1d8   : > { %v1441_v13 = vld [vmem:[#allocation2 + $0x80] sm:$0x1]  ;;  %1316 = vst [vmem:[#allocation2 + $0x90] sm:$0xf] %v1315_v8  ;;  %v1080_v17 = vrot.slane %v1078_v1, 7  ;;  %v1121_v18 = vshrl.u32 %v4169_v61, 16  ;;  %v676_v48 = vadd.f32 %v4559_v20, %v5344_v33  ;;  %v668_v50 = vadd.f32 %v4559_v20, %v5346_v39 }
 0x1d9   : > { %v1124_v19 = vshll.u32 %v4169_v61, 16  ;;  %v1442_v23 = vsel %vm5196_vm8, 0, %v1441_v13  ;;  %v1100_v24 = vor.u32 %v1098_v5, %v1097_v2  ;;  %v1102_v25 = vrot.slane %v1097_v2, 4  ;;  %v1339_v5 = vld [vmem:[#allocation2 + $0xbc] sm:$0x1] }
 0x1da   : > { %v1104_v28 = vshrl.u32 %v4167_v11, 16  ;;  %1443 = vst [vmem:[#allocation2 + $0x80] sm:$0x1] %v1442_v23  ;;  %v1083_v29 = vor.u32 %v1081_v4, %v1080_v17  ;;  %v1085_v31 = vrot.slane %v1080_v17, 4  ;;  %v5406_v34 = vrot.slane %v1121_v18, 7 }
 0x1db   : > { %v1107_v35 = vshll.u32 %v4167_v11, 16  ;;  %v1101_v43 = vsel %vm5164_vm7, %v1093_v7, %v1100_v24  ;;  %v1326_v47 = vsel %vm5158_vm6, %v1102_v25, %v1325_v10  ;;  %v749_v38 = vmin.f32 %v713_v12, 6.0  ;;  %v1332_v24 = vld [vmem:[#allocation2 + $0xb0] sm:$0x1] }
 0x1dc   : > { %v5412_v14 = vrot.slane %v1104_v28, 7  ;;  %v1395_v45 = vld [vmem:[#allocation2 + $0x9c] sm:$0x1]  ;;  %1324 = vst [vmem:[#allocation2 + $0xa0] sm:$0xf] %v1101_v43  ;;  %v1084_v16 = vsel %vm5164_vm7, %v1076_v3, %v1083_v29  ;;  %v1319_v58 = vsel %vm5158_vm6, %v1085_v31, %v1318_v26  ;;  %v1126_v27 = vor.u32 %v1124_v19, %v5406_v34 }
 0x1dd   : > { %1327 = vst [vmem:[#allocation2 + $0xa4] sm:$0x1] %v1326_v47  ;;  %v1127_v42 = vrot.slane %v5406_v34, 4  ;;  %v1396_v60 = vsel %vm5158_vm6, 0, %v1395_v45  ;;  %1317 = vst [vmem:[#allocation2 + $0x94] sm:$0xf] %v1084_v16  ;;  %v4170_v44 = vpack.c.bf16 %v749_v38, %v749_v38  ;;  %v679_v57 = vadd.f32 %v4559_v20, %v5348_v22 }
 0x1de   : > { %1320 = vst [vmem:[#allocation2 + $0x98] sm:$0x1] %v1319_v58  ;;  %v1109_v32 = vor.u32 %v1107_v35, %v5412_v14  ;;  %v1110_v15 = vrot.slane %v5412_v14, 4  ;;  %1397 = vst [vmem:[#allocation2 + $0x9c] sm:$0x1] %v1396_v60  ;;  %v1336_v7 = vsel %vm5152_vm5, %v1126_v27, %v1335_v6  ;;  %v711_v30 = vmax.f32 %v655_v21, 0.0 }
 0x1df   : > { %v1392_v51 = vld [vmem:[#allocation2 + $0x90] sm:$0x1]  ;;  %1337 = vst [vmem:[#allocation2 + $0xb4] sm:$0xf] %v1336_v7  ;;  %v1129_v53 = vshrl.u32 %v4170_v44, 16  ;;  %v1132_v56 = vshll.u32 %v4170_v44, 16  ;;  %v671_v3 = vadd.f32 %v4559_v20, %v5360_v46  ;;  %v4178_v40 = vunpack.c.l.bf16 %v5431_v37 }
 0x1e0   : > { %v1329_v52 = vsel %vm5152_vm5, %v1109_v32, %v1328_v9  ;;  %v1393_v59 = vsel %vm5158_vm6, 0, %v1392_v51  ;;  %v747_v62 = vmin.f32 %v711_v30, 6.0  ;;  %v716_v63 = vmax.f32 %v676_v48, 0.0  ;;  %v1349_v9 = vld [vmem:[#allocation2 + $0xcc] sm:$0xf] }
 0x1e1   : > { %1330 = vst [vmem:[#allocation2 + $0xa8] sm:$0xf] %v1329_v52  ;;  %v714_v33 = vmax.f32 %v668_v50, 0.0  ;;  %1394 = vst [vmem:[#allocation2 + $0x90] sm:$0x1] %v1393_v59  ;;  %v1131_v39 = vrot.slane %v1129_v53, 7  ;;  %v5441_v22 = vunpack.c.h.bf16 %v5431_v37 }
 0x1e2   : > { %v717_v0 = vmax.f32 %v679_v57, 0.0  ;;  %v4168_v54 = vpack.c.bf16 %v747_v62, %v747_v62  ;;  %v752_v1 = vmin.f32 %v716_v63, 6.0  ;;  %v715_v11 = vmax.f32 %v671_v3, 0.0  ;;  %v1342_v51 = vld [vmem:[#allocation2 + $0xc0] sm:$0xf] }
 0x1e3   : > { %v750_v4 = vmin.f32 %v714_v33, 6.0  ;;  %v1134_v8 = vor.u32 %v1132_v56, %v1131_v39  ;;  %v1136_v2 = vrot.slane %v1131_v39, 4  ;;  %v5463_v52 = vld [vmem:[#allocation8 + $0x1] ss:$0 sm:$0xff]  ;;  %v1566_v62 = vld [vmem:[#allocation2 + $0x8] sm:$0x1] }
 0x1e4   : > { %v1450_v61 = vld [vmem:[#allocation2 + $0xa4] sm:$0x1]  ;;  %v753_v10 = vmin.f32 %v717_v0, 6.0  ;;  %v1112_v17 = vshrl.u32 %v4168_v54, 16  ;;  %v1115_v46 = vshll.u32 %v4168_v54, 16  ;;  %v4173_v18 = vpack.c.bf16 %v752_v1, %v752_v1 }
 0x1e5   : > { %v1451_v12 = vsel %vm5196_vm8, 0, %v1450_v61  ;;  %v1447_v13 = vld [vmem:[#allocation2 + $0x98] sm:$0x1]  ;;  %v1135_v21 = vsel %vm5164_vm7, %v1127_v42, %v1134_v8  ;;  %v1340_v23 = vsel %vm5158_vm6, %v1136_v2, %v1339_v5  ;;  %v4171_v25 = vpack.c.bf16 %v750_v4, %v750_v4  ;;  %v1844_v4 = vld [vmem:[#allocation2] sm:$0xe] }
 0x1e6   : > { %1452 = vst [vmem:[#allocation2 + $0xa4] sm:$0x1] %v1451_v12  ;;  %v1448_v19 = vsel %vm5196_vm8, 0, %v1447_v13  ;;  %v1401_v26 = vld [vmem:[#allocation2 + $0xb4] sm:$0x1]  ;;  %v1114_v28 = vrot.slane %v1112_v17, 7  ;;  %v4174_v34 = vpack.c.bf16 %v753_v10, %v753_v10  ;;  %v1582_v2 = vunpack.c.l.bf16 %v1566_v62 }
 0x1e7   : > { %1449 = vst [vmem:[#allocation2 + $0x98] sm:$0x1] %v1448_v19  ;;  %1338 = vst [vmem:[#allocation2 + $0xb8] sm:$0xf] %v1135_v21  ;;  %v1155_v29 = vshrl.u32 %v4173_v18, 16  ;;  %v1158_v31 = vshll.u32 %v4173_v18, 16  ;;  %v1603_v10 = vmul.f32 %v4178_v40, %v5463_v52  ;;  %v1860_v21 = vunpack.c.l.bf16 %v1844_v4 }
 0x1e8   : > { %1341 = vst [vmem:[#allocation2 + $0xbc] sm:$0x1] %v1340_v23  ;;  %v1402_v35 = vsel %vm5158_vm6, 0, %v1401_v26  ;;  %v1398_v43 = vld [vmem:[#allocation2 + $0xa8] sm:$0x1]  ;;  %v1138_v47 = vshrl.u32 %v4171_v25, 16  ;;  %v1117_v16 = vor.u32 %v1115_v46, %v1114_v28  ;;  %v1605_v37 = vmul.f32 %v5463_v52, %v1582_v2 }
 0x1e9   : > { %v1141_v6 = vshll.u32 %v4171_v25, 16  ;;  %v751_v38 = vmin.f32 %v715_v11, 6.0  ;;  %1403 = vst [vmem:[#allocation2 + $0xb4] sm:$0x1] %v1402_v35  ;;  %v1399_v45 = vsel %vm5158_vm6, 0, %v1398_v43  ;;  %v1119_v58 = vrot.slane %v1114_v28, 4 }
 0x1ea   : > { %v1157_v27 = vrot.slane %v1155_v29, 7  ;;  %v5455_v42 = vld [vmem:[#allocation8] ss:$0 sm:$0xff]  ;;  %1400 = vst [vmem:[#allocation2 + $0xa8] sm:$0x1] %v1399_v45  ;;  %v1140_v60 = vrot.slane %v1138_v47, 7  ;;  %v1118_v30 = vsel %vm5164_vm7, %v1110_v15, %v1117_v16  ;;  %v1604_v11 = vmul.f32 %v5441_v22, %v5463_v52 }
 0x1eb   : > { %v1163_v32 = vshrl.u32 %v4174_v34, 16  ;;  %v1166_v44 = vshll.u32 %v4174_v34, 16  ;;  %v4172_v7 = vpack.c.bf16 %v751_v38, %v751_v38  ;;  %v1333_v20 = vsel %vm5158_vm6, %v1119_v58, %v1332_v24  ;;  %1331 = vst [vmem:[#allocation2 + $0xac] sm:$0xf] %v1118_v30  ;;  %v1353_v15 = vld [vmem:[#allocation2 + $0xd4] sm:$0x1] }
 0x1ec   : > { %v1160_v48 = vor.u32 %v1158_v31, %v1157_v27  ;;  %v1161_v50 = vrot.slane %v1157_v27, 4  ;;  %1334 = vst [vmem:[#allocation2 + $0xb0] sm:$0x1] %v1333_v20  ;;  %v1143_v53 = vor.u32 %v1141_v6, %v1140_v60  ;;  %v1144_v56 = vrot.slane %v1140_v60, 4  ;;  %v1346_v8 = vld [vmem:[#allocation2 + $0xc8] sm:$0x1] }
 0x1ed   : > { %v1165_v57 = vrot.slane %v1163_v32, 7  ;;  %v1146_v59 = vshrl.u32 %v4172_v7, 16  ;;  %v1149_v63 = vshll.u32 %v4172_v7, 16  ;;  %v1534_v33 = vmul.f32 %v4178_v40, %v5455_v42  ;;  %v5485_v46 = vld [vmem:[#allocation8 + $0x2] ss:$0 sm:$0xff]  ;;  %v2123_v18 = vld [vmem:[#allocation2 + $0xc] sm:$0xff]  }
 0x1ee   : > { %v1350_v14 = vsel %vm5152_vm5, %v1160_v48, %v1349_v9  ;;  %v1535_v39 = vmul.f32 %v5441_v22, %v5455_v42  ;;  %v1343_v3 = vsel %vm5152_vm5, %v1143_v53, %v1342_v51  ;;  %v1700_v40 = vrot.slane %v1603_v10, 1  ;;  %v5495_v28 = vld [vmem:[#allocation8 + $0x4] ss:$0 sm:$0xff]  ;;  %v2257_v43 = vld [vmem:[#allocation2 + $0x14] sm:$0x1] }
 0x1ef   : > { %v1456_v0 = vld [vmem:[#allocation2 + $0xbc] sm:$0x1]  ;;  %1351 = vst [vmem:[#allocation2 + $0xcc] sm:$0xf] %v1350_v14  ;;  %v1168_v5 = vor.u32 %v1166_v44, %v1165_v57  ;;  %v1170_v54 = vrot.slane %v1165_v57, 4  ;;  %v1148_v1 = vrot.slane %v1146_v59, 7  ;;  %v1882_v25 = vmul.f32 %v5441_v22, %v5485_v46 }
 0x1f0   : > { %v1457_v61 = vsel %vm5196_vm8, 0, %v1456_v0  ;;  %1344 = vst [vmem:[#allocation2 + $0xc0] sm:$0xf] %v1343_v3  ;;  %v1701_v19 = vrot.slane %v1604_v11, 1  ;;  %v1883_v26 = vmul.f32 %v5485_v46, %v1582_v2  ;;  %v1703_v34 = vrot.slane %v1605_v37, 1  ;;  %v4241_v3 = vld [vmem:[#allocation2 + $0x18] sm:$0xff]  }
 0x1f1   : > { %1458 = vst [vmem:[#allocation2 + $0xbc] sm:$0x1] %v1457_v61  ;;  %v1169_v41 = vsel %vm5164_vm7, %v1161_v50, %v1168_v5  ;;  %v1354_v12 = vsel %vm5158_vm6, %v1170_v54, %v1353_v15  ;;  %v1151_v13 = vor.u32 %v1149_v63, %v1148_v1  ;;  %v1153_v17 = vrot.slane %v1148_v1, 4  ;;  %v5501_v45 = vld [vmem:[#allocation8 + $0x5] ss:$0 sm:$0xff] }
 0x1f2   : > { %1352 = vst [vmem:[#allocation2 + $0xd0] sm:$0xf] %v1169_v41  ;;  %1355 = vst [vmem:[#allocation2 + $0xd4] sm:$0x1] %v1354_v12  ;;  %v1702_v31 = vsel %vm1699_vm9, %v1700_v40, %v1701_v19  ;;  %v1881_v35 = vmul.f32 %v5485_v46, %v1860_v21  ;;  %v2155_v55 = vunpack.c.l.bf16 %v2123_v18  ;;  %v1979_v38 = vrot.slane %v1882_v25, 2 }
 0x1f3   : > { %v1152_v23 = vsel %vm5164_vm7, %v1144_v56, %v1151_v13  ;;  %v1347_v24 = vsel %vm5158_vm6, %v1153_v17, %v1346_v8  ;;  %v1453_v29 = vld [vmem:[#allocation2 + $0xb0] sm:$0x1]  ;;  %v1812_v6 = vadd.f32 %v1702_v31, %v1534_v33  ;;  %v1981_v22 = vrot.slane %v1883_v26, 2  ;;  %v2534_v48 = vld [vmem:[#allocation2 + $0xc] sm:$0xe] }
 0x1f4   : > { %1345 = vst [vmem:[#allocation2 + $0xc4] sm:$0xf] %v1152_v23  ;;  %1348 = vst [vmem:[#allocation2 + $0xc8] sm:$0x1] %v1347_v24  ;;  %v1454_v47 = vsel %vm5196_vm8, 0, %v1453_v29  ;;  %v1704_v58 = vsel %vm1699_vm9, %v1701_v19, %v1703_v34  ;;  %v1978_v27 = vrot.slane %v1881_v35, 2  ;;  %v2156_v9 = vunpack.c.h.bf16 %v2123_v18 }
 0x1f5   : > { %1455 = vst [vmem:[#allocation2 + $0xb0] sm:$0x1] %v1454_v47  ;;  %v2193_v60 = vmul.f32 %v5495_v28, %v2155_v55  ;;  %v1813_v7 = vadd.f32 %v1704_v58, %v1535_v39  ;;  %v1982_v30 = vsel %vm1977_vm10, %v1979_v38, %v1981_v22  ;;  %v2273_v20 = vunpack.c.l.bf16 %v2257_v43  ;;  %v5515_v63 = vld [vmem:[#allocation8 + $0x6] ss:$0 sm:$0xff]  ;;  %v5520_v8 = vld [vmem:[#allocation8 + $0x8] ss:$0 sm:$0xff] }
 0x1f6   : > { %v1407_v16 = vld [vmem:[#allocation2 + $0xcc] sm:$0x1]  ;;  %v1980_v51 = vsel %vm1977_vm10, %v1978_v27, %v1979_v38  ;;  %v2194_v53 = vmul.f32 %v5495_v28, %v2156_v9  ;;  %v2294_v56 = vmul.f32 %v5501_v45, %v2155_v55  ;;  %v2295_v14 = vmul.f32 %v5501_v45, %v2156_v9  ;;  %v2946_v12 = vld [vmem:[#allocation2 + $0x20] sm:$0x1]  ;;  %v5526_v13 = vld [vmem:[#allocation8 + $0x9] ss:$0 sm:$0xff] }
 0x1f7   : > { %v1408_v32 = vsel %vm5158_vm6, 0, %v1407_v16  ;;  %v1404_v44 = vld [vmem:[#allocation2 + $0xc0] sm:$0x1]  ;;  %v2090_v59 = vadd.f32 %v1980_v51, %v1812_v6  ;;  %v2091_v62 = vadd.f32 %v1982_v30, %v1813_v7  ;;  %v2296_v15 = vmul.f32 %v5501_v45, %v2273_v20  ;;  %v3223_v19 = vld [vmem:[#allocation2 + $0x18] sm:$0xe]  ;;  %v1467_v6 = vld [vmem:[#allocation2 + $0xc] sm:$0xff]  }
 0x1f8   : > { %1409 = vst [vmem:[#allocation2 + $0xcc] sm:$0x1] %v1408_v32  ;;  %v1405_v50 = vsel %vm5158_vm6, 0, %v1404_v44  ;;  %v2390_v33 = vrot.slane %v2294_v56, 1  ;;  %v2550_v39 = vunpack.c.l.bf16 %v2534_v48  ;;  %v2572_v0 = vmul.f32 %v5515_v63, %v2156_v9  ;;  %v5540_v34 = vld [vmem:[#allocation8 + $0xa] ss:$0 sm:$0xff] }
 0x1f9   : > { %1406 = vst [vmem:[#allocation2 + $0xc0] sm:$0x1] %v1405_v50  ;;  %v1462_v57 = vld [vmem:[#allocation2 + $0xd4] sm:$0x1]  ;;  %v2225_v54 = vadd.f32 %v2193_v60, %v2090_v59  ;;  %v2226_v1 = vadd.f32 %v2194_v53, %v2091_v62  ;;  %v2391_v4 = vrot.slane %v2295_v14, 1  ;;  %v2393_v61 = vrot.slane %v2296_v15, 1 }
 0x1fa   : > { %v1463_v49 = vsel %vm5196_vm8, 0, %v1462_v57  ;;  %v2571_v10 = vmul.f32 %v5515_v63, %v2550_v39  ;;  %v2573_v11 = vmul.f32 %v5515_v63, %v2273_v20  ;;  %v2668_v41 = vrot.slane %v2572_v0, 2  ;;  %v1567_v48 = vld [vmem:[#allocation2 + $0x14] sm:$0x1]  ;;  %v1845_v15 = vld [vmem:[#allocation2 + $0xc] sm:$0xe] }
 0x1fb   : > { %1464 = vst [vmem:[#allocation2 + $0xd4] sm:$0x1] %v1463_v49  ;;  %v1459_v5 = vld [vmem:[#allocation2 + $0xc8] sm:$0x1]  ;;  %v2392_v17 = vsel %vm1699_vm9, %v2390_v33, %v2391_v4  ;;  %v2394_v18 = vsel %vm1699_vm9, %v2391_v4, %v2393_v61  ;;  %v5530_v37 = vunpack.c.l.bf16 %v4241_v3  ;;  %v5532_v40 = vunpack.c.h.bf16 %v4241_v3  ;;  %v5559_v0 = vld [vmem:[%s6505_s4] ss:$0 sm:$0xff] }
 0x1fc   : > { %v1460_v2 = vsel %vm5196_vm8, 0, %v1459_v5  ;;  %v2502_v36 = vadd.f32 %v2392_v17, %v2225_v54  ;;  %v2503_v21 = vadd.f32 %v2394_v18, %v2226_v1  ;;  %v2667_v23 = vrot.slane %v2571_v10, 2 }
 0x1fd   : > { %1461 = vst [vmem:[#allocation2 + $0xc8] sm:$0x1] %v1460_v2  ;;  %v2670_v24 = vrot.slane %v2573_v11, 2  ;;  %v2882_v25 = vmul.f32 %v5530_v37, %v5520_v8  ;;  %v2883_v26 = vmul.f32 %v5532_v40, %v5520_v8  ;;  %v2962_v29 = vunpack.c.l.bf16 %v2946_v12 }
 0x1fe   : > { %v2983_v31 = vmul.f32 %v5530_v37, %v5526_v13  ;;  %v2669_v35 = vsel %vm1977_vm10, %v2667_v23, %v2668_v41  ;;  %v2984_v43 = vmul.f32 %v5532_v40, %v5526_v13  ;;  %v3239_v47 = vunpack.c.l.bf16 %v3223_v19 }
 0x1ff   : > { %v2671_v55 = vsel %vm1977_vm10, %v2668_v41, %v2670_v24  ;;  %v2779_v38 = vadd.f32 %v2669_v35, %v2502_v36  ;;  %v2985_v16 = vmul.f32 %v5526_v13, %v2962_v29  ;;  %v3261_v60 = vmul.f32 %v5532_v40, %v5540_v34 }
 0x200   : > { %v2780_v22 = vadd.f32 %v2671_v55, %v2503_v21  ;;  %v3079_v58 = vrot.slane %v2983_v31, 1  ;;  %v3080_v27 = vrot.slane %v2984_v43, 1  ;;  %v3260_v9 = vmul.f32 %v5540_v34, %v3239_v47  ;;  %v2258_v31 = vld [vmem:[#allocation2 + $0x20] sm:$0x1] }
 0x201   : > { %v3262_v32 = vmul.f32 %v5540_v34, %v2962_v29  ;;  %v2914_v44 = vadd.f32 %v2882_v25, %v2779_v38  ;;  %v3082_v30 = vrot.slane %v2985_v16, 1  ;;  %v1499_v20 = vunpack.c.l.bf16 %v1467_v6 }
 0x202   : > { %v2915_v7 = vadd.f32 %v2883_v26, %v2780_v22  ;;  %v3081_v50 = vsel %vm1699_vm9, %v3079_v58, %v3080_v27  ;;  %v3356_v51 = vrot.slane %v3260_v9, 2  ;;  %v3357_v53 = vrot.slane %v3261_v60, 2 }
 0x203   : > { %v3359_v56 = vrot.slane %v3262_v32, 2  ;;  %v3083_v57 = vsel %vm1699_vm9, %v3080_v27, %v3082_v30  ;;  %v3191_v59 = vadd.f32 %v3081_v50, %v2914_v44  ;;  %v1500_v62 = vunpack.c.h.bf16 %v1467_v6  ;;  %v2535_v6 = vld [vmem:[#allocation2 + $0x18] sm:$0xe] }
 0x204   : > { %v1536_v14 = vmul.f32 %v5455_v42, %v1499_v20  ;;  %v3192_v49 = vadd.f32 %v3083_v57, %v2915_v7  ;;  %v3358_v33 = vsel %vm1977_vm10, %v3356_v51, %v3357_v53  ;;  %v1583_v3 = vunpack.c.l.bf16 %v1567_v48  ;;  %v2814_v48 = vld [vmem:[#allocation2 + $0x24] sm:$0xff]   ;;  %v2947_v57 = vld [vmem:[#allocation2 + $0x2c] sm:$0x1] }
 0x205   : > { %v3360_v39 = vsel %vm1977_vm10, %v3357_v53, %v3359_v56  ;;  %v3468_v5 = vadd.f32 %v3358_v33, %v3191_v59  ;;  %v1537_v54 = vmul.f32 %v5455_v42, %v1500_v62  ;;  %v1606_v1 = vmul.f32 %v5463_v52, %v1499_v20 }
 0x206   : > { %v1607_v4 = vmul.f32 %v5463_v52, %v1500_v62  ;;  %v3469_v61 = vadd.f32 %v3360_v39, %v3192_v49  ;;  %v1608_v2 = vmul.f32 %v5463_v52, %v1583_v3  ;;  %v1861_v10 = vunpack.c.l.bf16 %v1845_v15 }
 0x207   : > { %v1885_v11 = vmul.f32 %v5485_v46, %v1500_v62  ;;  %v3507_v41 = vadd.f32 %v5559_v0, %v3468_v5  ;;  %v1705_v12 = vrot.slane %v1606_v1, 1  ;;  %v1886_v18 = vmul.f32 %v5485_v46, %v1583_v3 }
 0x208   : > { %v1706_v17 = vrot.slane %v1607_v4, 1  ;;  %v3508_v19 = vadd.f32 %v5559_v0, %v3469_v61  ;;  %v1708_v36 = vrot.slane %v1608_v2, 1  ;;  %v1884_v21 = vmul.f32 %v5485_v46, %v1861_v10 }
 0x209   : > { %v1984_v23 = vrot.slane %v1885_v11, 2  ;;  %v3539_v24 = vmax.f32 %v3507_v41, 0.0  ;;  %v1986_v26 = vrot.slane %v1886_v18, 2  ;;  %v2195_v29 = vmul.f32 %v5530_v37, %v5495_v28  ;;  %v3224_v41 = vld [vmem:[#allocation2 + $0x24] sm:$0xe] }
 0x20a   : > { %v1707_v25 = vsel %vm1699_vm9, %v1705_v12, %v1706_v17  ;;  %v3540_v35 = vmax.f32 %v3508_v19, 0.0  ;;  %v1709_v55 = vsel %vm1699_vm9, %v1706_v17, %v1708_v36  ;;  %v1983_v47 = vrot.slane %v1884_v21, 2 }
 0x20b   : > { %v1814_v43 = vadd.f32 %v1707_v25, %v1536_v14  ;;  %v3571_v38 = vmin.f32 %v3539_v24, 6.0  ;;  %v1815_v22 = vadd.f32 %v1709_v55, %v1537_v54  ;;  %v1987_v16 = vsel %vm1977_vm10, %v1984_v23, %v1986_v26 }
 0x20c   : > { %v2196_v58 = vmul.f32 %v5532_v40, %v5495_v28  ;;  %v3572_v27 = vmin.f32 %v3540_v35, 6.0  ;;  %v1985_v9 = vsel %vm1977_vm10, %v1983_v47, %v1984_v23  ;;  %v2274_v60 = vunpack.c.l.bf16 %v2258_v31 }
 0x20d   : > { %v2297_v32 = vmul.f32 %v5530_v37, %v5501_v45  ;;  %v2092_v44 = vadd.f32 %v1985_v9, %v1814_v43  ;;  %v2093_v7 = vadd.f32 %v1987_v16, %v1815_v22  ;;  %v2298_v30 = vmul.f32 %v5532_v40, %v5501_v45 }
 0x20e   : > { %v2551_v20 = vunpack.c.l.bf16 %v2535_v6  ;;  %v3603_v50 = vpack.c.bf16 %v3572_v27, %v3571_v38  ;;  %v2299_v51 = vmul.f32 %v5501_v45, %v2274_v60  ;;  %v2575_v56 = vmul.f32 %v5532_v40, %v5515_v63  ;;  %v1568_v6 = vld [vmem:[#allocation2 + $0x20] sm:$0x1]  ;;  %v1846_v27 = vld [vmem:[#allocation2 + $0x18] sm:$0xe] }
 0x20f   : > { %v2395_v53 = vrot.slane %v2297_v32, 1  ;;  %v2227_v59 = vadd.f32 %v2195_v29, %v2092_v44  ;;  %v2228_v62 = vadd.f32 %v2196_v58, %v2093_v7  ;;  %v2396_v14 = vrot.slane %v2298_v30, 1 }
 0x210   : > { %v2574_v15 = vmul.f32 %v5515_v63, %v2551_v20  ;;  %4412 = vmatprep.mubr.bf16.mxu1 %v3603_v50  ;;  %v2398_v49 = vrot.slane %v2299_v51, 1  ;;  %v2576_v33 = vmul.f32 %v5515_v63, %v2274_v60  ;;  %v2673_v39 = vrot.slane %v2575_v56, 2 }
 0x211   : > { %v2846_v3 = vunpack.c.l.bf16 %v2814_v48  ;;  %v2397_v5 = vsel %vm1699_vm9, %v2395_v53, %v2396_v14  ;;  %v2847_v1 = vunpack.c.h.bf16 %v2814_v48  ;;  %v2963_v4 = vunpack.c.l.bf16 %v2947_v57 }
 0x212   : > { %v2672_v54 = vrot.slane %v2574_v15, 2  ;;  %v2399_v61 = vsel %vm1699_vm9, %v2396_v14, %v2398_v49  ;;  %v2504_v2 = vadd.f32 %v2397_v5, %v2227_v59  ;;  %v2675_v10 = vrot.slane %v2576_v33, 2  ;;  %v2127_v15 = vld [vmem:[#allocation2 + $0x24] sm:$0xff]  }
 0x213   : > { %v2884_v11 = vmul.f32 %v5520_v8, %v2846_v3  ;;  %v2505_v12 = vadd.f32 %v2399_v61, %v2228_v62  ;;  %v2885_v18 = vmul.f32 %v5520_v8, %v2847_v1  ;;  %v2986_v19 = vmul.f32 %v5526_v13, %v2846_v3 }
 0x214   : > { %v2674_v17 = vsel %vm1977_vm10, %v2672_v54, %v2673_v39  ;;  %v2676_v36 = vsel %vm1977_vm10, %v2673_v39, %v2675_v10  ;;  %v2987_v23 = vmul.f32 %v5526_v13, %v2847_v1  ;;  %v2988_v24 = vmul.f32 %v5526_v13, %v2963_v4 }
 0x215   : > { %v2781_v21 = vadd.f32 %v2674_v17, %v2504_v2  ;;  %v2782_v25 = vadd.f32 %v2676_v36, %v2505_v12  ;;  %v3084_v26 = vrot.slane %v2986_v19, 1  ;;  %v3240_v29 = vunpack.c.l.bf16 %v3224_v41  ;;  %v2259_v17 = vld [vmem:[#allocation2 + $0x2c] sm:$0x1] }
 0x216   : > { %v3264_v31 = vmul.f32 %v5540_v34, %v2847_v1  ;;  %v3085_v55 = vrot.slane %v2987_v23, 1  ;;  %v3087_v43 = vrot.slane %v2988_v24, 1  ;;  %v3265_v47 = vmul.f32 %v5540_v34, %v2963_v4  ;;  %v2536_v23 = vld [vmem:[#allocation2 + $0x24] sm:$0xe] }
 0x217   : > { %v2916_v35 = vadd.f32 %v2884_v11, %v2781_v21  ;;  %v2917_v38 = vadd.f32 %v2885_v18, %v2782_v25  ;;  %v3263_v22 = vmul.f32 %v5540_v34, %v3240_v29  ;;  %v1538_v58 = vmul.f32 %v5530_v37, %v5455_v42 }
 0x218   : > { %v3362_v16 = vrot.slane %v3264_v31, 2  ;;  %v3086_v9 = vsel %vm1699_vm9, %v3084_v26, %v3085_v55  ;;  %v3088_v60 = vsel %vm1699_vm9, %v3085_v55, %v3087_v43  ;;  %v3364_v32 = vrot.slane %v3265_v47, 2 }
 0x219   : > { %v1539_v44 = vmul.f32 %v5532_v40, %v5455_v42  ;;  %v3193_v7 = vadd.f32 %v3086_v9, %v2916_v35  ;;  %v3194_v30 = vadd.f32 %v3088_v60, %v2917_v38  ;;  %v3361_v20 = vrot.slane %v3263_v22, 2 }
 0x21a   : > { %v1584_v48 = vunpack.c.l.bf16 %v1568_v6  ;;  %v3365_v50 = vsel %vm1977_vm10, %v3362_v16, %v3364_v32  ;;  %v1609_v51 = vmul.f32 %v5530_v37, %v5463_v52  ;;  %v1610_v53 = vmul.f32 %v5532_v40, %v5463_v52  ;;  %v2948_v32 = vld [vmem:[#allocation2 + $0x38] sm:$0x1] }
 0x21b   : > { %v1862_v56 = vunpack.c.l.bf16 %v1846_v27  ;;  %v3363_v57 = vsel %vm1977_vm10, %v3361_v20, %v3362_v16  ;;  %v3471_v59 = vadd.f32 %v3365_v50, %v3194_v30  ;;  %v1888_v14 = vmul.f32 %v5532_v40, %v5485_v46  ;;  %v4287_v16 = vld [vmem:[#allocation2 + $0x30] sm:$0xff]  }
 0x21c   : > { %v1611_v62 = vmul.f32 %v5463_v52, %v1584_v48  ;;  %v3470_v49 = vadd.f32 %v3363_v57, %v3193_v7  ;;  %v1710_v33 = vrot.slane %v1609_v51, 1  ;;  %v1711_v39 = vrot.slane %v1610_v53, 1 }
 0x21d   : > { %v1887_v3 = vmul.f32 %v5485_v46, %v1862_v56  ;;  %v3510_v37 = vadd.f32 %v5559_v0, %v3471_v59  ;;  %v1889_v54 = vmul.f32 %v5485_v46, %v1584_v48  ;;  %v1989_v1 = vrot.slane %v1888_v14, 2  ;;  %v3225_v14 = vld [vmem:[#allocation2 + $0x30] sm:$0xe] }
 0x21e   : > { %v1713_v5 = vrot.slane %v1611_v62, 1  ;;  %v3509_v4 = vadd.f32 %v5559_v0, %v3470_v49  ;;  %v1712_v61 = vsel %vm1699_vm9, %v1710_v33, %v1711_v39  ;;  %v2159_v10 = vunpack.c.l.bf16 %v2127_v15 }
 0x21f   : > { %v1988_v2 = vrot.slane %v1887_v3, 2  ;;  %v3542_v11 = vmax.f32 %v3510_v37, 0.0  ;;  %v1816_v41 = vadd.f32 %v1712_v61, %v1538_v58  ;;  %v1991_v12 = vrot.slane %v1889_v54, 2 }
 0x220   : > { %v1714_v40 = vsel %vm1699_vm9, %v1711_v39, %v1713_v5  ;;  %v3541_v18 = vmax.f32 %v3509_v4, 0.0  ;;  %v2160_v21 = vunpack.c.h.bf16 %v2127_v15  ;;  %v2197_v29 = vmul.f32 %v5495_v28, %v2159_v10 }
 0x221   : > { %v1817_v19 = vadd.f32 %v1714_v40, %v1539_v44  ;;  %v1990_v36 = vsel %vm1977_vm10, %v1988_v2, %v1989_v1  ;;  %v3574_v24 = vmin.f32 %v3542_v11, 6.0  ;;  %v1992_v25 = vsel %vm1977_vm10, %v1989_v1, %v1991_v12 }
 0x222   : > { %v2094_v26 = vadd.f32 %v1990_v36, %v1816_v41  ;;  %v3573_v31 = vmin.f32 %v3541_v18, 6.0  ;;  %v2198_v55 = vmul.f32 %v5495_v28, %v2160_v21  ;;  %v2275_v43 = vunpack.c.l.bf16 %v2259_v17 }
 0x223   : > { %v2095_v35 = vadd.f32 %v1992_v25, %v1817_v19  ;;  %v2300_v6 = vmul.f32 %v5501_v45, %v2159_v10  ;;  %v2301_v38 = vmul.f32 %v5501_v45, %v2160_v21  ;;  %v2552_v22 = vunpack.c.l.bf16 %v2536_v23  ;;  %v1471_v10 = vld [vmem:[#allocation2 + $0x24] sm:$0xff]  }
 0x224   : > { %v2229_v47 = vadd.f32 %v2197_v29, %v2094_v26  ;;  %v3604_v58 = vpack.c.bf16 %v3574_v24, %v3573_v31  ;;  %v2302_v9 = vmul.f32 %v5501_v45, %v2275_v43  ;;  %v2578_v60 = vmul.f32 %v5515_v63, %v2160_v21  ;;  %v1569_v26 = vld [vmem:[#allocation2 + $0x2c] sm:$0x1] }
 0x225   : > { %v2230_v27 = vadd.f32 %v2198_v55, %v2095_v35  ;;  %v2400_v44 = vrot.slane %v2300_v6, 1  ;;  %v2401_v7 = vrot.slane %v2301_v38, 1  ;;  %v2577_v30 = vmul.f32 %v5515_v63, %v2552_v22 }
 0x226   : > { %v2579_v20 = vmul.f32 %v5515_v63, %v2275_v43  ;;  %4413 = vmatmul.mubr.bf16.vlgmr.msra.gmra.mrb[0].mxu1 %v3604_v58  ;;  %v2403_v48 = vrot.slane %v2302_v9, 1  ;;  %v2678_v50 = vrot.slane %v2578_v60, 2  ;;  %v5630_v51 = vunpack.c.l.bf16 %v4287_v16  ;;  %v1847_v43 = vld [vmem:[#allocation2 + $0x24] sm:$0xe] }
 0x227   : > { %v5632_v53 = vunpack.c.h.bf16 %v4287_v16  ;;  %v2402_v56 = vsel %vm1699_vm9, %v2400_v44, %v2401_v7  ;;  %v2677_v57 = vrot.slane %v2577_v30, 2  ;;  %v2964_v62 = vunpack.c.l.bf16 %v2948_v32 }
 0x228   : > { %v2680_v59 = vrot.slane %v2579_v20, 2  ;;  %v2404_v15 = vsel %vm1699_vm9, %v2401_v7, %v2403_v48  ;;  %v2506_v49 = vadd.f32 %v2402_v56, %v2229_v47  ;;  %v2886_v33 = vmul.f32 %v5630_v51, %v5520_v8 }
 0x229   : > { %v2887_v39 = vmul.f32 %v5632_v53, %v5520_v8  ;;  %v2507_v3 = vadd.f32 %v2404_v15, %v2230_v27  ;;  %v2679_v37 = vsel %vm1977_vm10, %v2677_v57, %v2678_v50  ;;  %v2989_v54 = vmul.f32 %v5630_v51, %v5526_v13 }
 0x22a   : > { %v2681_v5 = vsel %vm1977_vm10, %v2678_v50, %v2680_v59  ;;  %v2783_v1 = vadd.f32 %v2679_v37, %v2506_v49  ;;  %v2990_v4 = vmul.f32 %v5632_v53, %v5526_v13  ;;  %v2991_v61 = vmul.f32 %v5526_v13, %v2964_v62 }
 0x22b   : > { %v3241_v2 = vunpack.c.l.bf16 %v3225_v14  ;;  %v2784_v11 = vadd.f32 %v2681_v5, %v2507_v3  ;;  %v3089_v40 = vrot.slane %v2989_v54, 1  ;;  %v3267_v41 = vmul.f32 %v5632_v53, %v5540_v34  ;;  %v2260_v54 = vld [vmem:[#allocation2 + $0x38] sm:$0x1] }
 0x22c   : > { %v3268_v12 = vmul.f32 %v5540_v34, %v2964_v62  ;;  %v2918_v17 = vadd.f32 %v2886_v33, %v2783_v1  ;;  %v3090_v18 = vrot.slane %v2990_v4, 1  ;;  %v3092_v19 = vrot.slane %v2991_v61, 1 }
 0x22d   : > { %v3266_v36 = vmul.f32 %v5540_v34, %v3241_v2  ;;  %v2919_v21 = vadd.f32 %v2887_v39, %v2784_v11  ;;  %v3367_v23 = vrot.slane %v3267_v41, 2  ;;  %v1503_v25 = vunpack.c.l.bf16 %v1471_v10 }
 0x22e   : > { %v3369_v24 = vrot.slane %v3268_v12, 2  ;;  %v3091_v29 = vsel %vm1699_vm9, %v3089_v40, %v3090_v18  ;;  %v3093_v31 = vsel %vm1699_vm9, %v3090_v18, %v3092_v19  ;;  %v1504_v55 = vunpack.c.h.bf16 %v1471_v10  ;;  %v2537_v10 = vld [vmem:[#allocation2 + $0x30] sm:$0xe] }
 0x22f   : > { %v3366_v35 = vrot.slane %v3266_v36, 2  ;;  %v3195_v47 = vadd.f32 %v3091_v29, %v2918_v17  ;;  %v3196_v6 = vadd.f32 %v3093_v31, %v2919_v21  ;;  %v1540_v22 = vmul.f32 %v5455_v42, %v1503_v25 }
 0x230   : > { %v3370_v38 = vsel %vm1977_vm10, %v3367_v23, %v3369_v24  ;;  %v1541_v58 = vmul.f32 %v5455_v42, %v1504_v55  ;;  %v1585_v27 = vunpack.c.l.bf16 %v1569_v26  ;;  %v1612_v9 = vmul.f32 %v5463_v52, %v1503_v25  ;;  %v2818_v26 = vld [vmem:[#allocation2 + $0x3c] sm:$0xff]  }
 0x231   : > { %v3368_v16 = vsel %vm1977_vm10, %v3366_v35, %v3367_v23  ;;  %v3473_v32 = vadd.f32 %v3370_v38, %v3196_v6  ;;  %v1613_v44 = vmul.f32 %v5463_v52, %v1504_v55  ;;  %v1863_v7 = vunpack.c.l.bf16 %v1847_v43  ;;  %v2949_v43 = vld [vmem:[#allocation2 + $0x44] sm:$0x1] }
 0x232   : > { %v3472_v60 = vadd.f32 %v3368_v16, %v3195_v47  ;;  %v1614_v30 = vmul.f32 %v5463_v52, %v1585_v27  ;;  %v1715_v20 = vrot.slane %v1612_v9, 1  ;;  %v1891_v48 = vmul.f32 %v5485_v46, %v1504_v55 }
 0x233   : > { %v1892_v50 = vmul.f32 %v5485_v46, %v1585_v27  ;;  %v3512_v57 = vadd.f32 %v5559_v0, %v3473_v32  ;;  %v1716_v59 = vrot.slane %v1613_v44, 1  ;;  %v1890_v62 = vmul.f32 %v5485_v46, %v1863_v7 }
 0x234   : > { %v3511_v56 = vadd.f32 %v5559_v0, %v3472_v60  ;;  %v1718_v14 = vrot.slane %v1614_v30, 1  ;;  %v1994_v15 = vrot.slane %v1891_v48, 2  ;;  %v2199_v33 = vmul.f32 %v5630_v51, %v5495_v28  ;;  %v3226_v30 = vld [vmem:[#allocation2 + $0x3c] sm:$0xe] }
 0x235   : > { %v1996_v49 = vrot.slane %v1892_v50, 2  ;;  %v3544_v3 = vmax.f32 %v3512_v57, 0.0  ;;  %v1717_v37 = vsel %vm1699_vm9, %v1715_v20, %v1716_v59  ;;  %v1993_v5 = vrot.slane %v1890_v62, 2 }
 0x236   : > { %v3543_v39 = vmax.f32 %v3511_v56, 0.0  ;;  %v1719_v1 = vsel %vm1699_vm9, %v1716_v59, %v1718_v14  ;;  %v1818_v4 = vadd.f32 %v1717_v37, %v1540_v22  ;;  %v2200_v2 = vmul.f32 %v5632_v53, %v5495_v28 }
 0x237   : > { %v1997_v61 = vsel %vm1977_vm10, %v1994_v15, %v1996_v49  ;;  %v3576_v40 = vmin.f32 %v3544_v3, 6.0  ;;  %v1819_v41 = vadd.f32 %v1719_v1, %v1541_v58  ;;  %v1995_v12 = vsel %vm1977_vm10, %v1993_v5, %v1994_v15 }
 0x238   : > { %v3575_v11 = vmin.f32 %v3543_v39, 6.0  ;;  %v2096_v17 = vadd.f32 %v1995_v12, %v1818_v4  ;;  %v2276_v18 = vunpack.c.l.bf16 %v2260_v54  ;;  %v2303_v19 = vmul.f32 %v5630_v51, %v5501_v45 }
 0x239   : > { %v2304_v36 = vmul.f32 %v5632_v53, %v5501_v45  ;;  %v2097_v23 = vadd.f32 %v1997_v61, %v1819_v41  ;;  %v2553_v24 = vunpack.c.l.bf16 %v2537_v10  ;;  %v2581_v25 = vmul.f32 %v5632_v53, %v5515_v63  ;;  %v1570_v10 = vld [vmem:[#allocation2 + $0x38] sm:$0x1] }
 0x23a   : > { %v3605_v21 = vpack.c.bf16 %v3576_v40, %v3575_v11  ;;  %v2231_v29 = vadd.f32 %v2199_v33, %v2096_v17  ;;  %v2305_v31 = vmul.f32 %v5501_v45, %v2276_v18  ;;  %v2405_v35 = vrot.slane %v2303_v19, 1  ;;  %v1848_v17 = vld [vmem:[#allocation2 + $0x30] sm:$0xe] }
 0x23b   : > { %v2406_v55 = vrot.slane %v2304_v36, 1  ;;  %v2232_v47 = vadd.f32 %v2200_v2, %v2097_v23  ;;  %v2580_v6 = vmul.f32 %v5515_v63, %v2553_v24  ;;  %v2582_v38 = vmul.f32 %v5515_v63, %v2276_v18 }
 0x23c   : > { %4416 = vmatprep.mubr.bf16.mxu1 %v3605_v21  ;;  %v2683_v22 = vrot.slane %v2581_v25, 2  ;;  %v2408_v58 = vrot.slane %v2305_v31, 1  ;;  %v2850_v27 = vunpack.c.l.bf16 %v2818_v26  ;;  %v2851_v9 = vunpack.c.h.bf16 %v2818_v26 }
 0x23d   : > { %v2407_v16 = vsel %vm1699_vm9, %v2405_v35, %v2406_v55  ;;  %v2682_v32 = vrot.slane %v2580_v6, 2  ;;  %v2685_v44 = vrot.slane %v2582_v38, 2  ;;  %v2965_v7 = vunpack.c.l.bf16 %v2949_v43  ;;  %v2131_v43 = vld [vmem:[#allocation2 + $0x3c] sm:$0xff]  }
 0x23e   : > { %v2508_v60 = vadd.f32 %v2407_v16, %v2231_v29  ;;  %v2409_v20 = vsel %vm1699_vm9, %v2406_v55, %v2408_v58  ;;  %v2888_v48 = vmul.f32 %v5520_v8, %v2850_v27  ;;  %v2889_v50 = vmul.f32 %v5520_v8, %v2851_v9 }
 0x23f   : > { %v2992_v56 = vmul.f32 %v5526_v13, %v2850_v27  ;;  %v2509_v57 = vadd.f32 %v2409_v20, %v2232_v47  ;;  %v2684_v59 = vsel %vm1977_vm10, %v2682_v32, %v2683_v22  ;;  %v2686_v62 = vsel %vm1977_vm10, %v2683_v22, %v2685_v44 }
 0x240   : > { %v2993_v14 = vmul.f32 %v5526_v13, %v2851_v9  ;;  %v2785_v15 = vadd.f32 %v2684_v59, %v2508_v60  ;;  %v2994_v49 = vmul.f32 %v5526_v13, %v2965_v7  ;;  %v3242_v39 = vunpack.c.l.bf16 %v3226_v30 }
 0x241   : > { %v3094_v33 = vrot.slane %v2992_v56, 1  ;;  %v2786_v3 = vadd.f32 %v2686_v62, %v2509_v57  ;;  %v3270_v5 = vmul.f32 %v5540_v34, %v2851_v9  ;;  %v3271_v54 = vmul.f32 %v5540_v34, %v2965_v7  ;;  %v2261_v56 = vld [vmem:[#allocation2 + $0x44] sm:$0x1] }
 0x242   : > { %v3095_v37 = vrot.slane %v2993_v14, 1  ;;  %v2920_v1 = vadd.f32 %v2888_v48, %v2785_v15  ;;  %v3097_v4 = vrot.slane %v2994_v49, 1  ;;  %v3269_v61 = vmul.f32 %v5540_v34, %v3242_v39  ;;  %v2538_v15 = vld [vmem:[#allocation2 + $0x3c] sm:$0xe] }
 0x243   : > { %v1542_v2 = vmul.f32 %v5630_v51, %v5455_v42  ;;  %v2921_v11 = vadd.f32 %v2889_v50, %v2786_v3  ;;  %v3372_v41 = vrot.slane %v3270_v5, 2  ;;  %v3374_v12 = vrot.slane %v3271_v54, 2 }
 0x244   : > { %v3096_v40 = vsel %vm1699_vm9, %v3094_v33, %v3095_v37  ;;  %v3098_v18 = vsel %vm1699_vm9, %v3095_v37, %v3097_v4  ;;  %v3371_v36 = vrot.slane %v3269_v61, 2  ;;  %v1543_v21 = vmul.f32 %v5632_v53, %v5455_v42  ;;  %v4288_v4 = vld [vmem:[#allocation2 + $0x48] sm:$0xff]  }
 0x245   : > { %v3197_v19 = vadd.f32 %v3096_v40, %v2920_v1  ;;  %v3198_v23 = vadd.f32 %v3098_v18, %v2921_v11  ;;  %v3375_v24 = vsel %vm1977_vm10, %v3372_v41, %v3374_v12  ;;  %v1586_v25 = vunpack.c.l.bf16 %v1570_v10  ;;  %v2950_v40 = vld [vmem:[#allocation2 + $0x50] sm:$0x1] }
 0x246   : > { %v1615_v26 = vmul.f32 %v5630_v51, %v5463_v52  ;;  %v3373_v29 = vsel %vm1977_vm10, %v3371_v36, %v3372_v41  ;;  %v1616_v31 = vmul.f32 %v5632_v53, %v5463_v52  ;;  %v1864_v35 = vunpack.c.l.bf16 %v1848_v17 }
 0x247   : > { %v1894_v55 = vmul.f32 %v5632_v53, %v5485_v46  ;;  %v3474_v47 = vadd.f32 %v3373_v29, %v3197_v19  ;;  %v3475_v6 = vadd.f32 %v3375_v24, %v3198_v23  ;;  %v1617_v42 = vmul.f32 %v5463_v52, %v1586_v25 }
 0x248   : > { %v1720_v38 = vrot.slane %v1615_v26, 1  ;;  %v1721_v22 = vrot.slane %v1616_v31, 1  ;;  %v1893_v16 = vmul.f32 %v5485_v46, %v1864_v35  ;;  %v1895_v51 = vmul.f32 %v5485_v46, %v1586_v25 }
 0x249   : > { %v1999_v58 = vrot.slane %v1894_v55, 2  ;;  %v3513_v27 = vadd.f32 %v5559_v0, %v3474_v47  ;;  %v3514_v9 = vadd.f32 %v5559_v0, %v3475_v6  ;;  %v1723_v60 = vrot.slane %v1617_v42, 1  ;;  %v3227_v47 = vld [vmem:[#allocation2 + $0x48] sm:$0xe] }
 0x24a   : > { %v2163_v32 = vunpack.c.l.bf16 %v2131_v43  ;;  %v1722_v53 = vsel %vm1699_vm9, %v1720_v38, %v1721_v22  ;;  %v1998_v44 = vrot.slane %v1893_v16, 2  ;;  %v2001_v7 = vrot.slane %v1895_v51, 2 }
 0x24b   : > { %v2164_v30 = vunpack.c.h.bf16 %v2131_v43  ;;  %v3545_v20 = vmax.f32 %v3513_v27, 0.0  ;;  %v3546_v52 = vmax.f32 %v3514_v9, 0.0  ;;  %v1724_v48 = vsel %vm1699_vm9, %v1721_v22, %v1723_v60  ;;  %v1475_v9 = vld [vmem:[#allocation2 + $0x3c] sm:$0xff]  }
 0x24c   : > { %v1820_v50 = vadd.f32 %v1722_v53, %v1542_v2  ;;  %v1821_v57 = vadd.f32 %v1724_v48, %v1543_v21  ;;  %v2000_v59 = vsel %vm1977_vm10, %v1998_v44, %v1999_v58  ;;  %v2002_v62 = vsel %vm1977_vm10, %v1999_v58, %v2001_v7 }
 0x24d   : > { %v2201_v14 = vmul.f32 %v5495_v28, %v2163_v32  ;;  %v3577_v49 = vmin.f32 %v3545_v20, 6.0  ;;  %v3578_v33 = vmin.f32 %v3546_v52, 6.0  ;;  %v2202_v3 = vmul.f32 %v5495_v28, %v2164_v30 }
 0x24e   : > { %v2098_v39 = vadd.f32 %v2000_v59, %v1820_v50  ;;  %v2099_v37 = vadd.f32 %v2002_v62, %v1821_v57  ;;  %v2277_v5 = vunpack.c.l.bf16 %v2261_v56  ;;  %v2306_v54 = vmul.f32 %v5501_v45, %v2163_v32  ;;  %v1571_v59 = vld [vmem:[#allocation2 + $0x44] sm:$0x1] }
 0x24f   : > { %v2307_v1 = vmul.f32 %v5501_v45, %v2164_v30  ;;  %v3606_v61 = vpack.c.bf16 %v3578_v33, %v3577_v49  ;;  %v2554_v10 = vunpack.c.l.bf16 %v2538_v15  ;;  %v2584_v11 = vmul.f32 %v5515_v63, %v2164_v30  ;;  %v1849_v33 = vld [vmem:[#allocation2 + $0x3c] sm:$0xe] }
 0x250   : > { %v2233_v2 = vadd.f32 %v2201_v14, %v2098_v39  ;;  %v2234_v41 = vadd.f32 %v2202_v3, %v2099_v37  ;;  %v2308_v12 = vmul.f32 %v5501_v45, %v2277_v5  ;;  %v2410_v17 = vrot.slane %v2306_v54, 1 }
 0x251   : > { %v2411_v18 = vrot.slane %v2307_v1, 1  ;;  %4417 = vmatmul.mubr.bf16.gmra.mrb[4].mxu1 %v3606_v61  ;;  %v2583_v19 = vmul.f32 %v5515_v63, %v2554_v10  ;;  %v2585_v36 = vmul.f32 %v5515_v63, %v2277_v5  ;;  %v2688_v21 = vrot.slane %v2584_v11, 2  ;;  %v5748_v5 = vld [vmem:[#allocation8] ss:$0 sm:$0xff] }
 0x252   : > { %v5725_v23 = vunpack.c.l.bf16 %v4288_v4  ;;  %v2413_v25 = vrot.slane %v2308_v12, 1  ;;  %v5728_v26 = vunpack.c.h.bf16 %v4288_v4  ;;  %v2966_v29 = vunpack.c.l.bf16 %v2950_v40 }
 0x253   : > { %v2412_v24 = vsel %vm1699_vm9, %v2410_v17, %v2411_v18  ;;  %v2687_v35 = vrot.slane %v2583_v19, 2  ;;  %v2690_v55 = vrot.slane %v2585_v36, 2  ;;  %v3243_v44 = vunpack.c.l.bf16 %v3227_v47 }
 0x254   : > { %v2510_v31 = vadd.f32 %v2412_v24, %v2233_v2  ;;  %v2890_v43 = vmul.f32 %v5725_v23, %v5520_v8  ;;  %v2414_v6 = vsel %vm1699_vm9, %v2411_v18, %v2413_v25  ;;  %v2891_v42 = vmul.f32 %v5728_v26, %v5520_v8  ;;  %v5752_v2 = vld [vmem:[#allocation8 + $0x1] ss:$0 sm:$0xff] }
 0x255   : > { %v2995_v38 = vmul.f32 %v5725_v23, %v5526_v13  ;;  %v2996_v22 = vmul.f32 %v5728_v26, %v5526_v13  ;;  %v2511_v16 = vadd.f32 %v2414_v6, %v2234_v41  ;;  %v2689_v51 = vsel %vm1977_vm10, %v2687_v35, %v2688_v21 }
 0x256   : > { %v2691_v58 = vsel %vm1977_vm10, %v2688_v21, %v2690_v55  ;;  %v2997_v27 = vmul.f32 %v5526_v13, %v2966_v29  ;;  %v2787_v60 = vadd.f32 %v2689_v51, %v2510_v31  ;;  %v3273_v20 = vmul.f32 %v5728_v26, %v5540_v34 }
 0x257   : > { %v3099_v32 = vrot.slane %v2995_v38, 1  ;;  %v3100_v53 = vrot.slane %v2996_v22, 1  ;;  %v2788_v7 = vadd.f32 %v2691_v58, %v2511_v16  ;;  %v3274_v52 = vmul.f32 %v5540_v34, %v2966_v29  ;;  %v2262_v22 = vld [vmem:[#allocation2 + $0x50] sm:$0x1] }
 0x258   : > { %v3102_v30 = vrot.slane %v2997_v27, 1  ;;  %v2922_v48 = vadd.f32 %v2890_v43, %v2787_v60  ;;  %v3272_v56 = vmul.f32 %v5540_v34, %v3243_v44  ;;  %v1507_v57 = vunpack.c.l.bf16 %v1475_v9 }
 0x259   : > { %v3101_v50 = vsel %vm1699_vm9, %v3099_v32, %v3100_v53  ;;  %v2923_v62 = vadd.f32 %v2891_v42, %v2788_v7  ;;  %v3377_v15 = vrot.slane %v3273_v20, 2  ;;  %v3379_v49 = vrot.slane %v3274_v52, 2 }
 0x25a   : > { %v3103_v14 = vsel %vm1699_vm9, %v3100_v53, %v3102_v30  ;;  %v3199_v39 = vadd.f32 %v3101_v50, %v2922_v48  ;;  %v3376_v3 = vrot.slane %v3272_v56, 2  ;;  %v1508_v37 = vunpack.c.h.bf16 %v1475_v9  ;;  %v5770_v53 = vld [vmem:[#allocation8 + $0x4] ss:$0 sm:$0xff] }
 0x25b   : > { %v1544_v54 = vmul.f32 %v5748_v5, %v1507_v57  ;;  %v3200_v1 = vadd.f32 %v3103_v14, %v2923_v62  ;;  %v3380_v4 = vsel %vm1977_vm10, %v3377_v15, %v3379_v49  ;;  %v1587_v61 = vunpack.c.l.bf16 %v1571_v59  ;;  %v5778_v14 = vld [vmem:[#allocation8 + $0x5] ss:$0 sm:$0xff] }
 0x25c   : > { %v1618_v10 = vmul.f32 %v5752_v2, %v1507_v57  ;;  %v3378_v11 = vsel %vm1977_vm10, %v3376_v3, %v3377_v15  ;;  %v1545_v40 = vmul.f32 %v5748_v5, %v1508_v37  ;;  %v1619_v41 = vmul.f32 %v5752_v2, %v1508_v37  ;;  %v2822_v57 = vld [vmem:[#allocation2 + $0x54] sm:$0xff]  }
 0x25d   : > { %v1865_v12 = vunpack.c.l.bf16 %v1849_v33  ;;  %v3476_v17 = vadd.f32 %v3378_v11, %v3199_v39  ;;  %v3477_v18 = vadd.f32 %v3380_v4, %v3200_v1  ;;  %v1620_v19 = vmul.f32 %v5752_v2, %v1587_v61  ;;  %v2951_v33 = vld [vmem:[#allocation2 + $0x5c] sm:$0x1] }
 0x25e   : > { %v1725_v36 = vrot.slane %v1618_v10, 1  ;;  %v1726_v21 = vrot.slane %v1619_v41, 1  ;;  %v1897_v25 = vmul.f32 %v5485_v46, %v1508_v37  ;;  %v1898_v29 = vmul.f32 %v5485_v46, %v1587_v61 }
 0x25f   : > { %v1896_v24 = vmul.f32 %v5485_v46, %v1865_v12  ;;  %v3515_v31 = vadd.f32 %v5559_v0, %v3476_v17  ;;  %v3516_v35 = vadd.f32 %v5559_v0, %v3477_v18  ;;  %v1728_v55 = vrot.slane %v1620_v19, 1  ;;  %v2539_v46 = vld [vmem:[#allocation2 + $0x48] sm:$0xe] }
 0x260   : > { %v2203_v43 = vmul.f32 %v5725_v23, %v5495_v28  ;;  %v1727_v47 = vsel %vm1699_vm9, %v1725_v36, %v1726_v21  ;;  %v2004_v42 = vrot.slane %v1897_v25, 2  ;;  %v2006_v38 = vrot.slane %v1898_v29, 2  ;;  %v3228_v36 = vld [vmem:[#allocation2 + $0x54] sm:$0xe] }
 0x261   : > { %v2003_v6 = vrot.slane %v1896_v24, 2  ;;  %v3547_v16 = vmax.f32 %v3515_v31, 0.0  ;;  %v3548_v51 = vmax.f32 %v3516_v35, 0.0  ;;  %v1729_v58 = vsel %vm1699_vm9, %v1726_v21, %v1728_v55 }
 0x262   : > { %v1822_v27 = vadd.f32 %v1727_v47, %v1544_v54  ;;  %v1823_v9 = vadd.f32 %v1729_v58, %v1545_v40  ;;  %v2007_v32 = vsel %vm1977_vm10, %v2004_v42, %v2006_v38  ;;  %v2204_v28 = vmul.f32 %v5770_v53, %v5728_v26 }
 0x263   : > { %v2005_v60 = vsel %vm1977_vm10, %v2003_v6, %v2004_v42  ;;  %v3579_v44 = vmin.f32 %v3547_v16, 6.0  ;;  %v3580_v7 = vmin.f32 %v3548_v51, 6.0  ;;  %v2278_v20 = vunpack.c.l.bf16 %v2262_v22 }
 0x264   : > { %v2100_v30 = vadd.f32 %v2005_v60, %v1822_v27  ;;  %v2101_v52 = vadd.f32 %v2007_v32, %v1823_v9  ;;  %v2309_v48 = vmul.f32 %v5725_v23, %v5501_v45  ;;  %v2310_v50 = vmul.f32 %v5728_v26, %v5501_v45  ;;  %v1850_v60 = vld [vmem:[#allocation2 + $0x48] sm:$0xe] }
 0x265   : > { %v2555_v56 = vunpack.c.l.bf16 %v2539_v46  ;;  %v3607_v59 = vpack.c.bf16 %v3580_v7, %v3579_v44  ;;  %v2311_v15 = vmul.f32 %v5778_v14, %v2278_v20  ;;  %v2587_v49 = vmul.f32 %v5728_v26, %v5515_v63 }
 0x266   : > { %v2235_v62 = vadd.f32 %v2203_v43, %v2100_v30  ;;  %v2236_v39 = vadd.f32 %v2204_v28, %v2101_v52  ;;  %v2415_v3 = vrot.slane %v2309_v48, 1  ;;  %v2416_v37 = vrot.slane %v2310_v50, 1 }
 0x267   : > { %v2586_v54 = vmul.f32 %v5515_v63, %v2555_v56  ;;  %4420 = vmatprep.mubr.bf16.mxu1 %v3607_v59  ;;  %v2418_v1 = vrot.slane %v2311_v15, 1  ;;  %v2588_v45 = vmul.f32 %v5515_v63, %v2278_v20  ;;  %v2693_v4 = vrot.slane %v2587_v49, 2  ;;  %v5810_v15 = vld [vmem:[#allocation8 + $0x2] ss:$0 sm:$0xff] }
 0x268   : > { %v2854_v61 = vunpack.c.l.bf16 %v2822_v57  ;;  %v2417_v10 = vsel %vm1699_vm9, %v2415_v3, %v2416_v37  ;;  %v2855_v40 = vunpack.c.h.bf16 %v2822_v57  ;;  %v2967_v41 = vunpack.c.l.bf16 %v2951_v33  ;;  %v2135_v33 = vld [vmem:[#allocation2 + $0x54] sm:$0xff]  }
 0x269   : > { %v2692_v11 = vrot.slane %v2586_v54, 2  ;;  %v2419_v12 = vsel %vm1699_vm9, %v2416_v37, %v2418_v1  ;;  %v2512_v17 = vadd.f32 %v2417_v10, %v2235_v62  ;;  %v2695_v18 = vrot.slane %v2588_v45, 2 }
 0x26a   : > { %v2892_v19 = vmul.f32 %v5520_v8, %v2854_v61  ;;  %v2513_v21 = vadd.f32 %v2419_v12, %v2236_v39  ;;  %v2893_v25 = vmul.f32 %v5520_v8, %v2855_v40  ;;  %v2998_v63 = vmul.f32 %v5526_v13, %v2854_v61  ;;  %v1572_v8 = vld [vmem:[#allocation2 + $0x50] sm:$0x1] }
 0x26b   : > { %v2694_v24 = vsel %vm1977_vm10, %v2692_v11, %v2693_v4  ;;  %v2696_v29 = vsel %vm1977_vm10, %v2693_v4, %v2695_v18  ;;  %v2999_v35 = vmul.f32 %v5526_v13, %v2855_v40  ;;  %v3000_v55 = vmul.f32 %v5526_v13, %v2967_v41  ;;  %v2263_v18 = vld [vmem:[#allocation2 + $0x5c] sm:$0x1] }
 0x26c   : > { %v2789_v31 = vadd.f32 %v2694_v24, %v2512_v17  ;;  %v2790_v43 = vadd.f32 %v2696_v29, %v2513_v21  ;;  %v3104_v47 = vrot.slane %v2998_v63, 1  ;;  %v3244_v6 = vunpack.c.l.bf16 %v3228_v36 }
 0x26d   : > { %v3276_v42 = vmul.f32 %v5540_v34, %v2855_v40  ;;  %v3105_v22 = vrot.slane %v2999_v35, 1  ;;  %v3107_v16 = vrot.slane %v3000_v55, 1  ;;  %v3277_v51 = vmul.f32 %v5540_v34, %v2967_v41 }
 0x26e   : > { %v2924_v38 = vadd.f32 %v2892_v19, %v2789_v31  ;;  %v2925_v58 = vadd.f32 %v2893_v25, %v2790_v43  ;;  %v3275_v27 = vmul.f32 %v5540_v34, %v3244_v6  ;;  %v1546_v9 = vmul.f32 %v5748_v5, %v5725_v23  ;;  %v2540_v25 = vld [vmem:[#allocation2 + $0x54] sm:$0xe] }
 0x26f   : > { %v3382_v46 = vrot.slane %v3276_v42, 2  ;;  %v3106_v13 = vsel %vm1699_vm9, %v3104_v47, %v3105_v22  ;;  %v3108_v32 = vsel %vm1699_vm9, %v3105_v22, %v3107_v16  ;;  %v3384_v28 = vrot.slane %v3277_v51, 2  ;;  %v4289_v16 = vld [vmem:[#allocation2 + $0x60] sm:$0xff]  }
 0x270   : > { %v1547_v44 = vmul.f32 %v5748_v5, %v5728_v26  ;;  %v3201_v7 = vadd.f32 %v3106_v13, %v2924_v38  ;;  %v3202_v30 = vadd.f32 %v3108_v32, %v2925_v58  ;;  %v3381_v20 = vrot.slane %v3275_v27, 2  ;;  %v5827_v27 = vld [vmem:[#allocation8 + $0x6] ss:$0 sm:$0xff] }
 0x271   : > { %v1588_v52 = vunpack.c.l.bf16 %v1572_v8  ;;  %v3385_v48 = vsel %vm1977_vm10, %v3382_v46, %v3384_v28  ;;  %v1621_v34 = vmul.f32 %v5752_v2, %v5725_v23  ;;  %v1622_v50 = vmul.f32 %v5752_v2, %v5728_v26 }
 0x272   : > { %v1866_v56 = vunpack.c.l.bf16 %v1850_v60  ;;  %v3383_v57 = vsel %vm1977_vm10, %v3381_v20, %v3382_v46  ;;  %v3479_v59 = vadd.f32 %v3385_v48, %v3202_v30  ;;  %v1900_v49 = vmul.f32 %v5810_v15, %v5728_v26 }
 0x273   : > { %v1623_v62 = vmul.f32 %v5752_v2, %v1588_v52  ;;  %v3478_v39 = vadd.f32 %v3383_v57, %v3201_v7  ;;  %v1730_v3 = vrot.slane %v1621_v34, 1  ;;  %v1731_v37 = vrot.slane %v1622_v50, 1 }
 0x274   : > { %v1899_v23 = vmul.f32 %v5810_v15, %v1866_v56  ;;  %v3518_v54 = vadd.f32 %v5559_v0, %v3479_v59  ;;  %v1901_v45 = vmul.f32 %v5810_v15, %v1588_v52  ;;  %v2009_v4 = vrot.slane %v1900_v49, 2  ;;  %v3229_v56 = vld [vmem:[#allocation2 + $0x60] sm:$0xe] }
 0x275   : > { %v1733_v1 = vrot.slane %v1623_v62, 1  ;;  %v3517_v61 = vadd.f32 %v5559_v0, %v3478_v39  ;;  %v1732_v10 = vsel %vm1699_vm9, %v1730_v3, %v1731_v37  ;;  %v2167_v40 = vunpack.c.l.bf16 %v2135_v33  ;;  %v5838_v62 = vld [vmem:[#allocation8 + $0x8] ss:$0 sm:$0xff] }
 0x276   : > { %v2008_v11 = vrot.slane %v1899_v23, 2  ;;  %v3550_v41 = vmax.f32 %v3518_v54, 0.0  ;;  %v1824_v12 = vadd.f32 %v1732_v10, %v1546_v9  ;;  %v2011_v17 = vrot.slane %v1901_v45, 2  ;;  %v2952_v9 = vld [vmem:[#allocation2 + $0x68] sm:$0x1]  ;;  %v1479_v10 = vld [vmem:[#allocation2 + $0x54] sm:$0xff]  }
 0x277   : > { %v1734_v26 = vsel %vm1699_vm9, %v1731_v37, %v1733_v1  ;;  %v3549_v19 = vmax.f32 %v3517_v61, 0.0  ;;  %v2168_v24 = vunpack.c.h.bf16 %v2135_v33  ;;  %v2205_v31 = vmul.f32 %v5770_v53, %v2167_v40  ;;  %v5846_v23 = vld [vmem:[#allocation8 + $0x9] ss:$0 sm:$0xff] }
 0x278   : > { %v1825_v36 = vadd.f32 %v1734_v26, %v1547_v44  ;;  %v2010_v21 = vsel %vm1977_vm10, %v2008_v11, %v2009_v4  ;;  %v3582_v63 = vmin.f32 %v3550_v41, 6.0  ;;  %v2012_v29 = vsel %vm1977_vm10, %v2009_v4, %v2011_v17  ;;  %v5853_v41 = vld [vmem:[#allocation8 + $0xa] ss:$0 sm:$0xff] }
 0x279   : > { %v2102_v0 = vadd.f32 %v2010_v21, %v1824_v12  ;;  %v3581_v35 = vmin.f32 %v3549_v19, 6.0  ;;  %v2206_v43 = vmul.f32 %v5770_v53, %v2168_v24  ;;  %v2279_v47 = vunpack.c.l.bf16 %v2263_v18 }
 0x27a   : > { %v2103_v55 = vadd.f32 %v2012_v29, %v1825_v36  ;;  %v2312_v42 = vmul.f32 %v5778_v14, %v2167_v40  ;;  %v2313_v38 = vmul.f32 %v5778_v14, %v2168_v24  ;;  %v2556_v22 = vunpack.c.l.bf16 %v2540_v25  ;;  %v1573_v29 = vld [vmem:[#allocation2 + $0x5c] sm:$0x1] }
 0x27b   : > { %v2237_v6 = vadd.f32 %v2205_v31, %v2102_v0  ;;  %v3608_v51 = vpack.c.bf16 %v3582_v63, %v3581_v35  ;;  %v2314_v58 = vmul.f32 %v5778_v14, %v2279_v47  ;;  %v2590_v46 = vmul.f32 %v5827_v27, %v2168_v24 }
 0x27c   : > { %v2238_v8 = vadd.f32 %v2206_v43, %v2103_v55  ;;  %v2420_v60 = vrot.slane %v2312_v42, 1  ;;  %v2421_v13 = vrot.slane %v2313_v38, 1  ;;  %v2589_v32 = vmul.f32 %v5827_v27, %v2556_v22  ;;  %v1851_v43 = vld [vmem:[#allocation2 + $0x54] sm:$0xe] }
 0x27d   : > { %v2591_v28 = vmul.f32 %v5827_v27, %v2279_v47  ;;  %4421 = vmatmul.mubr.bf16.gmra.mrb[8].mxu1 %v3608_v51  ;;  %v2423_v44 = vrot.slane %v2314_v58, 1  ;;  %v2698_v7 = vrot.slane %v2590_v46, 2  ;;  %v5832_v30 = vunpack.c.l.bf16 %v4289_v16 }
 0x27e   : > { %v5834_v20 = vunpack.c.h.bf16 %v4289_v16  ;;  %v2422_v52 = vsel %vm1699_vm9, %v2420_v60, %v2421_v13  ;;  %v2697_v48 = vrot.slane %v2589_v32, 2  ;;  %v2968_v50 = vunpack.c.l.bf16 %v2952_v9 }
 0x27f   : > { %v2700_v34 = vrot.slane %v2591_v28, 2  ;;  %v2424_v57 = vsel %vm1699_vm9, %v2421_v13, %v2423_v44  ;;  %v2514_v59 = vadd.f32 %v2422_v52, %v2237_v6  ;;  %v2894_v49 = vmul.f32 %v5838_v62, %v5832_v30 }
 0x280   : > { %v2895_v33 = vmul.f32 %v5838_v62, %v5834_v20  ;;  %v2515_v39 = vadd.f32 %v2424_v57, %v2238_v8  ;;  %v2699_v3 = vsel %vm1977_vm10, %v2697_v48, %v2698_v7  ;;  %v3001_v54 = vmul.f32 %v5846_v23, %v5832_v30 }
 0x281   : > { %v2701_v37 = vsel %vm1977_vm10, %v2698_v7, %v2700_v34  ;;  %v2791_v1 = vadd.f32 %v2699_v3, %v2514_v59  ;;  %v3002_v45 = vmul.f32 %v5846_v23, %v5834_v20  ;;  %v3003_v4 = vmul.f32 %v5846_v23, %v2968_v50  ;;  %v5873_v7 = vld [vmem:[%s6505_s4] ss:$0 sm:$0xff] }
 0x282   : > { %v3245_v61 = vunpack.c.l.bf16 %v3229_v56  ;;  %v2792_v11 = vadd.f32 %v2701_v37, %v2515_v39  ;;  %v3109_v40 = vrot.slane %v3001_v54, 1  ;;  %v3279_v26 = vmul.f32 %v5853_v41, %v5834_v20  ;;  %v2264_v54 = vld [vmem:[#allocation2 + $0x68] sm:$0x1] }
 0x283   : > { %v3280_v12 = vmul.f32 %v5853_v41, %v2968_v50  ;;  %v2926_v17 = vadd.f32 %v2894_v49, %v2791_v1  ;;  %v3110_v18 = vrot.slane %v3002_v45, 1  ;;  %v3112_v19 = vrot.slane %v3003_v4, 1 }
 0x284   : > { %v3278_v36 = vmul.f32 %v5853_v41, %v3245_v61  ;;  %v2927_v21 = vadd.f32 %v2895_v33, %v2792_v11  ;;  %v3387_v24 = vrot.slane %v3279_v26, 2  ;;  %v1511_v63 = vunpack.c.l.bf16 %v1479_v10 }
 0x285   : > { %v3389_v25 = vrot.slane %v3280_v12, 2  ;;  %v3111_v0 = vsel %vm1699_vm9, %v3109_v40, %v3110_v18  ;;  %v3113_v31 = vsel %vm1699_vm9, %v3110_v18, %v3112_v19  ;;  %v1512_v55 = vunpack.c.h.bf16 %v1479_v10  ;;  %v2541_v10 = vld [vmem:[#allocation2 + $0x60] sm:$0xe] }
 0x286   : > { %v3386_v35 = vrot.slane %v3278_v36, 2  ;;  %v3203_v47 = vadd.f32 %v3111_v0, %v2926_v17  ;;  %v3204_v6 = vadd.f32 %v3113_v31, %v2927_v21  ;;  %v1548_v38 = vmul.f32 %v5748_v5, %v1511_v63 }
 0x287   : > { %v3390_v42 = vsel %vm1977_vm10, %v3387_v24, %v3389_v25  ;;  %v1549_v16 = vmul.f32 %v5748_v5, %v1512_v55  ;;  %v1589_v51 = vunpack.c.l.bf16 %v1573_v29  ;;  %v1624_v8 = vmul.f32 %v5752_v2, %v1511_v63  ;;  %v2826_v29 = vld [vmem:[#allocation2 + $0x6c] sm:$0xff]  }
 0x288   : > { %v3388_v22 = vsel %vm1977_vm10, %v3386_v35, %v3387_v24  ;;  %v3481_v46 = vadd.f32 %v3390_v42, %v3204_v6  ;;  %v1625_v9 = vmul.f32 %v5752_v2, %v1512_v55  ;;  %v1867_v60 = vunpack.c.l.bf16 %v1851_v43  ;;  %v2953_v43 = vld [vmem:[#allocation2 + $0x74] sm:$0x1] }
 0x289   : > { %v3480_v58 = vadd.f32 %v3388_v22, %v3203_v47  ;;  %v1626_v13 = vmul.f32 %v5752_v2, %v1589_v51  ;;  %v1735_v32 = vrot.slane %v1624_v8, 1  ;;  %v1903_v28 = vmul.f32 %v5810_v15, %v1512_v55 }
 0x28a   : > { %v1904_v44 = vmul.f32 %v5810_v15, %v1589_v51  ;;  %v3520_v48 = vadd.f32 %v5873_v7, %v3481_v46  ;;  %v1736_v34 = vrot.slane %v1625_v9, 1  ;;  %v1902_v50 = vmul.f32 %v5810_v15, %v1867_v60 }
 0x28b   : > { %v3519_v52 = vadd.f32 %v5873_v7, %v3480_v58  ;;  %v1738_v56 = vrot.slane %v1626_v13, 1  ;;  %v2014_v57 = vrot.slane %v1903_v28, 2  ;;  %v2207_v49 = vmul.f32 %v5770_v53, %v5832_v30  ;;  %v3230_v13 = vld [vmem:[#allocation2 + $0x6c] sm:$0xe] }
 0x28c   : > { %v2016_v59 = vrot.slane %v1904_v44, 2  ;;  %v3552_v39 = vmax.f32 %v3520_v48, 0.0  ;;  %v1737_v3 = vsel %vm1699_vm9, %v1735_v32, %v1736_v34  ;;  %v2013_v37 = vrot.slane %v1902_v50, 2 }
 0x28d   : > { %v3551_v33 = vmax.f32 %v3519_v52, 0.0  ;;  %v1739_v1 = vsel %vm1699_vm9, %v1736_v34, %v1738_v56  ;;  %v1826_v45 = vadd.f32 %v1737_v3, %v1548_v38  ;;  %v2208_v61 = vmul.f32 %v5770_v53, %v5834_v20 }
 0x28e   : > { %v2017_v4 = vsel %vm1977_vm10, %v2014_v57, %v2016_v59  ;;  %v3584_v40 = vmin.f32 %v3552_v39, 6.0  ;;  %v1827_v26 = vadd.f32 %v1739_v1, %v1549_v16  ;;  %v2015_v12 = vsel %vm1977_vm10, %v2013_v37, %v2014_v57 }
 0x28f   : > { %v3583_v11 = vmin.f32 %v3551_v33, 6.0  ;;  %v2104_v17 = vadd.f32 %v2015_v12, %v1826_v45  ;;  %v2280_v18 = vunpack.c.l.bf16 %v2264_v54  ;;  %v2315_v19 = vmul.f32 %v5778_v14, %v5832_v30 }
 0x290   : > { %v2316_v36 = vmul.f32 %v5778_v14, %v5834_v20  ;;  %v2105_v24 = vadd.f32 %v2017_v4, %v1827_v26  ;;  %v2557_v25 = vunpack.c.l.bf16 %v2541_v10  ;;  %v2593_v63 = vmul.f32 %v5827_v27, %v5834_v20  ;;  %v1574_v10 = vld [vmem:[#allocation2 + $0x68] sm:$0x1] }
 0x291   : > { %v3609_v21 = vpack.c.bf16 %v3584_v40, %v3583_v11  ;;  %v2239_v0 = vadd.f32 %v2207_v49, %v2104_v17  ;;  %v2317_v31 = vmul.f32 %v5778_v14, %v2280_v18  ;;  %v2425_v35 = vrot.slane %v2315_v19, 1  ;;  %v1852_v17 = vld [vmem:[#allocation2 + $0x60] sm:$0xe] }
 0x292   : > { %v2426_v55 = vrot.slane %v2316_v36, 1  ;;  %v2240_v47 = vadd.f32 %v2208_v61, %v2105_v24  ;;  %v2592_v6 = vmul.f32 %v5827_v27, %v2557_v25  ;;  %v2594_v42 = vmul.f32 %v5827_v27, %v2280_v18 }
 0x293   : > { %4424 = vmatprep.mubr.bf16.mxu1 %v3609_v21  ;;  %v2703_v38 = vrot.slane %v2593_v63, 2  ;;  %v2428_v16 = vrot.slane %v2317_v31, 1  ;;  %v2858_v51 = vunpack.c.l.bf16 %v2826_v29  ;;  %v2859_v8 = vunpack.c.h.bf16 %v2826_v29 }
 0x294   : > { %v2427_v22 = vsel %vm1699_vm9, %v2425_v35, %v2426_v55  ;;  %v2702_v46 = vrot.slane %v2592_v6, 2  ;;  %v2705_v9 = vrot.slane %v2594_v42, 2  ;;  %v2969_v60 = vunpack.c.l.bf16 %v2953_v43  ;;  %v2139_v43 = vld [vmem:[#allocation2 + $0x6c] sm:$0xff]  }
 0x295   : > { %v2516_v58 = vadd.f32 %v2427_v22, %v2239_v0  ;;  %v2429_v32 = vsel %vm1699_vm9, %v2426_v55, %v2428_v16  ;;  %v2896_v28 = vmul.f32 %v5838_v62, %v2858_v51  ;;  %v2897_v44 = vmul.f32 %v5838_v62, %v2859_v8 }
 0x296   : > { %v3004_v52 = vmul.f32 %v5846_v23, %v2858_v51  ;;  %v2517_v48 = vadd.f32 %v2429_v32, %v2240_v47  ;;  %v2704_v34 = vsel %vm1977_vm10, %v2702_v46, %v2703_v38  ;;  %v2706_v50 = vsel %vm1977_vm10, %v2703_v38, %v2705_v9 }
 0x297   : > { %v3005_v56 = vmul.f32 %v5846_v23, %v2859_v8  ;;  %v2793_v57 = vadd.f32 %v2704_v34, %v2516_v58  ;;  %v3006_v59 = vmul.f32 %v5846_v23, %v2969_v60  ;;  %v3246_v33 = vunpack.c.l.bf16 %v3230_v13  ;;  %v2265_v34 = vld [vmem:[#allocation2 + $0x74] sm:$0x1] }
 0x298   : > { %v3114_v49 = vrot.slane %v3004_v52, 1  ;;  %v2794_v39 = vadd.f32 %v2706_v50, %v2517_v48  ;;  %v3282_v37 = vmul.f32 %v5853_v41, %v2859_v8  ;;  %v3283_v54 = vmul.f32 %v5853_v41, %v2969_v60 }
 0x299   : > { %v3115_v3 = vrot.slane %v3005_v56, 1  ;;  %v2928_v1 = vadd.f32 %v2896_v28, %v2793_v57  ;;  %v3117_v45 = vrot.slane %v3006_v59, 1  ;;  %v3281_v4 = vmul.f32 %v5853_v41, %v3246_v33 }
 0x29a   : > { %v1550_v61 = vmul.f32 %v5748_v5, %v5832_v30  ;;  %v2929_v11 = vadd.f32 %v2897_v44, %v2794_v39  ;;  %v3392_v26 = vrot.slane %v3282_v37, 2  ;;  %v3394_v12 = vrot.slane %v3283_v54, 2 }
 0x29b   : > { %v3116_v40 = vsel %vm1699_vm9, %v3114_v49, %v3115_v3  ;;  %v3118_v18 = vsel %vm1699_vm9, %v3115_v3, %v3117_v45  ;;  %v3391_v36 = vrot.slane %v3281_v4, 2  ;;  %v1551_v21 = vmul.f32 %v5748_v5, %v5834_v20  ;;  %v2542_v49 = vld [vmem:[#allocation2 + $0x6c] sm:$0xe] }
 0x29c   : > { %v3205_v19 = vadd.f32 %v3116_v40, %v2928_v1  ;;  %v3206_v24 = vadd.f32 %v3118_v18, %v2929_v11  ;;  %v3395_v25 = vsel %vm1977_vm10, %v3392_v26, %v3394_v12  ;;  %v1590_v63 = vunpack.c.l.bf16 %v1574_v10  ;;  %v2954_v12 = vld [vmem:[#allocation2 + $0x80] sm:$0x1] }
 0x29d   : > { %v1627_v29 = vmul.f32 %v5752_v2, %v5832_v30  ;;  %v3393_v0 = vsel %vm1977_vm10, %v3391_v36, %v3392_v26  ;;  %v1628_v31 = vmul.f32 %v5752_v2, %v5834_v20  ;;  %v1868_v35 = vunpack.c.l.bf16 %v1852_v17 }
 0x29e   : > { %v1906_v55 = vmul.f32 %v5810_v15, %v5834_v20  ;;  %v3482_v47 = vadd.f32 %v3393_v0, %v3205_v19  ;;  %v3483_v6 = vadd.f32 %v3395_v25, %v3206_v24  ;;  %v1629_v42 = vmul.f32 %v5752_v2, %v1590_v63 }
 0x29f   : > { %v1740_v38 = vrot.slane %v1627_v29, 1  ;;  %v1741_v22 = vrot.slane %v1628_v31, 1  ;;  %v1905_v16 = vmul.f32 %v5810_v15, %v1868_v35  ;;  %v1907_v30 = vmul.f32 %v5810_v15, %v1590_v63 }
 0x2a0   : > { %v2019_v51 = vrot.slane %v1906_v55, 2  ;;  %v3521_v8 = vadd.f32 %v5873_v7, %v3482_v47  ;;  %v3522_v58 = vadd.f32 %v5873_v7, %v3483_v6  ;;  %v1743_v46 = vrot.slane %v1629_v42, 1  ;;  %v3231_v42 = vld [vmem:[#allocation2 + $0x78] sm:$0xe] }
 0x2a1   : > { %v2171_v9 = vunpack.c.l.bf16 %v2139_v43  ;;  %v1742_v20 = vsel %vm1699_vm9, %v1740_v38, %v1741_v22  ;;  %v2018_v60 = vrot.slane %v1905_v16, 2  ;;  %v2021_v13 = vrot.slane %v1907_v30, 2 }
 0x2a2   : > { %v2172_v32 = vunpack.c.h.bf16 %v2139_v43  ;;  %v3553_v28 = vmax.f32 %v3521_v8, 0.0  ;;  %v3554_v44 = vmax.f32 %v3522_v58, 0.0  ;;  %v1744_v52 = vsel %vm1699_vm9, %v1741_v22, %v1743_v46 }
 0x2a3   : > { %v1828_v48 = vadd.f32 %v1742_v20, %v1550_v61  ;;  %v1829_v50 = vadd.f32 %v1744_v52, %v1551_v21  ;;  %v2020_v56 = vsel %vm1977_vm10, %v2018_v60, %v2019_v51  ;;  %v2022_v57 = vsel %vm1977_vm10, %v2019_v51, %v2021_v13  ;;  %v4290_v61 = vld [vmem:[#allocation2 + $0x78] sm:$0xff]  }
 0x2a4   : > { %v2209_v59 = vmul.f32 %v5770_v53, %v2171_v9  ;;  %v3585_v33 = vmin.f32 %v3553_v28, 6.0  ;;  %v3586_v39 = vmin.f32 %v3554_v44, 6.0  ;;  %v2210_v37 = vmul.f32 %v5770_v53, %v2172_v32 }
 0x2a5   : > { %v2106_v3 = vadd.f32 %v2020_v56, %v1828_v48  ;;  %v2107_v54 = vadd.f32 %v2022_v57, %v1829_v50  ;;  %v2281_v1 = vunpack.c.l.bf16 %v2265_v34  ;;  %v2318_v45 = vmul.f32 %v5778_v14, %v2171_v9  ;;  %v1483_v9 = vld [vmem:[#allocation2 + $0x6c] sm:$0xff]  }
 0x2a6   : > { %v2319_v4 = vmul.f32 %v5778_v14, %v2172_v32  ;;  %v3610_v10 = vpack.c.bf16 %v3586_v39, %v3585_v33  ;;  %v2558_v40 = vunpack.c.l.bf16 %v2542_v49  ;;  %v2596_v26 = vmul.f32 %v5827_v27, %v2172_v32 }
 0x2a7   : > { %v2241_v11 = vadd.f32 %v2209_v59, %v2106_v3  ;;  %v2242_v17 = vadd.f32 %v2210_v37, %v2107_v54  ;;  %v2320_v18 = vmul.f32 %v5778_v14, %v2281_v1  ;;  %v2430_v19 = vrot.slane %v2318_v45, 1  ;;  %v1575_v59 = vld [vmem:[#allocation2 + $0x74] sm:$0x1]  ;;  %v1853_v37 = vld [vmem:[#allocation2 + $0x6c] sm:$0xe] }
 0x2a8   : > { %v2431_v36 = vrot.slane %v2319_v4, 1  ;;  %4425 = vmatmul.mubr.bf16.gmra.mrb[12].mxu1 %v3610_v10  ;;  %v2595_v21 = vmul.f32 %v5827_v27, %v2558_v40  ;;  %v2597_v24 = vmul.f32 %v5827_v27, %v2281_v1  ;;  %v2708_v25 = vrot.slane %v2596_v26, 2 }
 0x2a9   : > { %v5938_v63 = vunpack.c.l.bf16 %v4290_v61  ;;  %v2433_v0 = vrot.slane %v2320_v18, 1  ;;  %v5941_v31 = vunpack.c.h.bf16 %v4290_v61  ;;  %v2970_v35 = vunpack.c.l.bf16 %v2954_v12 }
 0x2aa   : > { %v2432_v29 = vsel %vm1699_vm9, %v2430_v19, %v2431_v36  ;;  %v2707_v43 = vrot.slane %v2595_v21, 2  ;;  %v2710_v47 = vrot.slane %v2597_v24, 2  ;;  %v3247_v32 = vunpack.c.l.bf16 %v3231_v42 }
 0x2ab   : > { %v2518_v55 = vadd.f32 %v2432_v29, %v2241_v11  ;;  %v2898_v6 = vmul.f32 %v5838_v62, %v5938_v63  ;;  %v2434_v38 = vsel %vm1699_vm9, %v2431_v36, %v2433_v0  ;;  %v2899_v22 = vmul.f32 %v5838_v62, %v5941_v31 }
 0x2ac   : > { %v3007_v16 = vmul.f32 %v5846_v23, %v5938_v63  ;;  %v3008_v30 = vmul.f32 %v5846_v23, %v5941_v31  ;;  %v2519_v51 = vadd.f32 %v2434_v38, %v2242_v17  ;;  %v2709_v8 = vsel %vm1977_vm10, %v2707_v43, %v2708_v25 }
 0x2ad   : > { %v2711_v58 = vsel %vm1977_vm10, %v2708_v25, %v2710_v47  ;;  %v3009_v46 = vmul.f32 %v5846_v23, %v2970_v35  ;;  %v2795_v20 = vadd.f32 %v2709_v8, %v2518_v55  ;;  %v3285_v52 = vmul.f32 %v5853_v41, %v5941_v31 }
 0x2ae   : > { %v3119_v60 = vrot.slane %v3007_v16, 1  ;;  %v3120_v13 = vrot.slane %v3008_v30, 1  ;;  %v2796_v28 = vadd.f32 %v2711_v58, %v2519_v51  ;;  %v3286_v48 = vmul.f32 %v5853_v41, %v2970_v35  ;;  %v2266_v30 = vld [vmem:[#allocation2 + $0x80] sm:$0x1] }
 0x2af   : > { %v3122_v44 = vrot.slane %v3009_v46, 1  ;;  %v2930_v34 = vadd.f32 %v2898_v6, %v2795_v20  ;;  %v3284_v56 = vmul.f32 %v5853_v41, %v3247_v32  ;;  %v1515_v57 = vunpack.c.l.bf16 %v1483_v9 }
 0x2b0   : > { %v3121_v50 = vsel %vm1699_vm9, %v3119_v60, %v3120_v13  ;;  %v2931_v49 = vadd.f32 %v2899_v22, %v2796_v28  ;;  %v3397_v39 = vrot.slane %v3285_v52, 2  ;;  %v3399_v3 = vrot.slane %v3286_v48, 2 }
 0x2b1   : > { %v3123_v33 = vsel %vm1699_vm9, %v3120_v13, %v3122_v44  ;;  %v3207_v54 = vadd.f32 %v3121_v50, %v2930_v34  ;;  %v3396_v1 = vrot.slane %v3284_v56, 2  ;;  %v1516_v45 = vunpack.c.h.bf16 %v1483_v9  ;;  %v2543_v9 = vld [vmem:[#allocation2 + $0x78] sm:$0xe] }
 0x2b2   : > { %v1552_v4 = vmul.f32 %v5748_v5, %v1515_v57  ;;  %v3208_v61 = vadd.f32 %v3123_v33, %v2931_v49  ;;  %v3400_v10 = vsel %vm1977_vm10, %v3397_v39, %v3399_v3  ;;  %v1591_v11 = vunpack.c.l.bf16 %v1575_v59  ;;  %v2830_v59 = vld [vmem:[#allocation2 + $0x84] sm:$0xff]  }
 0x2b3   : > { %v1630_v40 = vmul.f32 %v5752_v2, %v1515_v57  ;;  %v3398_v26 = vsel %vm1977_vm10, %v3396_v1, %v3397_v39  ;;  %v1553_v12 = vmul.f32 %v5748_v5, %v1516_v45  ;;  %v1631_v17 = vmul.f32 %v5752_v2, %v1516_v45 }
 0x2b4   : > { %v1869_v18 = vunpack.c.l.bf16 %v1853_v37  ;;  %v3484_v19 = vadd.f32 %v3398_v26, %v3207_v54  ;;  %v3485_v36 = vadd.f32 %v3400_v10, %v3208_v61  ;;  %v1632_v21 = vmul.f32 %v5752_v2, %v1591_v11  ;;  %v2955_v37 = vld [vmem:[#allocation2 + $0x8c] sm:$0x1] }
 0x2b5   : > { %v1745_v24 = vrot.slane %v1630_v40, 1  ;;  %v1746_v25 = vrot.slane %v1631_v17, 1  ;;  %v1909_v0 = vmul.f32 %v5810_v15, %v1516_v45  ;;  %v1910_v35 = vmul.f32 %v5810_v15, %v1591_v11 }
 0x2b6   : > { %v1908_v29 = vmul.f32 %v5810_v15, %v1869_v18  ;;  %v3523_v55 = vadd.f32 %v5873_v7, %v3484_v19  ;;  %v3524_v43 = vadd.f32 %v5873_v7, %v3485_v36  ;;  %v1748_v47 = vrot.slane %v1632_v21, 1 }
 0x2b7   : > { %v2211_v6 = vmul.f32 %v5770_v53, %v5938_v63  ;;  %v1747_v42 = vsel %vm1699_vm9, %v1745_v24, %v1746_v25  ;;  %v2024_v22 = vrot.slane %v1909_v0, 2  ;;  %v2026_v16 = vrot.slane %v1910_v35, 2 }
 0x2b8   : > { %v2023_v38 = vrot.slane %v1908_v29, 2  ;;  %v3555_v51 = vmax.f32 %v3523_v55, 0.0  ;;  %v3556_v8 = vmax.f32 %v3524_v43, 0.0  ;;  %v1749_v58 = vsel %vm1699_vm9, %v1746_v25, %v1748_v47  ;;  %v3232_v25 = vld [vmem:[#allocation2 + $0x84] sm:$0xe] }
 0x2b9   : > { %v1830_v46 = vadd.f32 %v1747_v42, %v1552_v4  ;;  %v1831_v20 = vadd.f32 %v1749_v58, %v1553_v12  ;;  %v2027_v13 = vsel %vm1977_vm10, %v2024_v22, %v2026_v16  ;;  %v2212_v32 = vmul.f32 %v5770_v53, %v5941_v31 }
 0x2ba   : > { %v2025_v60 = vsel %vm1977_vm10, %v2023_v38, %v2024_v22  ;;  %v3587_v28 = vmin.f32 %v3555_v51, 6.0  ;;  %v3588_v44 = vmin.f32 %v3556_v8, 6.0  ;;  %v2282_v48 = vunpack.c.l.bf16 %v2266_v30 }
 0x2bb   : > { %v2108_v52 = vadd.f32 %v2025_v60, %v1830_v46  ;;  %v2109_v34 = vadd.f32 %v2027_v13, %v1831_v20  ;;  %v2321_v50 = vmul.f32 %v5778_v14, %v5938_v63  ;;  %v2322_v56 = vmul.f32 %v5778_v14, %v5941_v31 }
 0x2bc   : > { %v2559_v57 = vunpack.c.l.bf16 %v2543_v9  ;;  %v3611_v49 = vpack.c.bf16 %v3588_v44, %v3587_v28  ;;  %v2323_v39 = vmul.f32 %v5778_v14, %v2282_v48  ;;  %v2599_v3 = vmul.f32 %v5827_v27, %v5941_v31  ;;  %v1576_v9 = vld [vmem:[#allocation2 + $0x80] sm:$0x1]  ;;  %v1854_v28 = vld [vmem:[#allocation2 + $0x78] sm:$0xe] }
 0x2bd   : > { %v2243_v33 = vadd.f32 %v2211_v6, %v2108_v52  ;;  %v2244_v54 = vadd.f32 %v2212_v32, %v2109_v34  ;;  %v2435_v1 = vrot.slane %v2321_v50, 1  ;;  %v2436_v45 = vrot.slane %v2322_v56, 1 }
 0x2be   : > { %v2598_v4 = vmul.f32 %v5827_v27, %v2559_v57  ;;  %4428 = vmatprep.mubr.bf16.mxu1 %v3611_v49  ;;  %v2438_v61 = vrot.slane %v2323_v39, 1  ;;  %v2600_v10 = vmul.f32 %v5827_v27, %v2282_v48  ;;  %v2713_v11 = vrot.slane %v2599_v3, 2 }
 0x2bf   : > { %v2862_v40 = vunpack.c.l.bf16 %v2830_v59  ;;  %v2437_v26 = vsel %vm1699_vm9, %v2435_v1, %v2436_v45  ;;  %v2863_v17 = vunpack.c.h.bf16 %v2830_v59  ;;  %v2971_v18 = vunpack.c.l.bf16 %v2955_v37 }
 0x2c0   : > { %v2712_v12 = vrot.slane %v2598_v4, 2  ;;  %v2439_v19 = vsel %vm1699_vm9, %v2436_v45, %v2438_v61  ;;  %v2520_v36 = vadd.f32 %v2437_v26, %v2243_v33  ;;  %v2715_v21 = vrot.slane %v2600_v10, 2  ;;  %v2143_v45 = vld [vmem:[#allocation2 + $0x84] sm:$0xff]  }
 0x2c1   : > { %v2900_v24 = vmul.f32 %v5838_v62, %v2862_v40  ;;  %v2521_v29 = vadd.f32 %v2439_v19, %v2244_v54  ;;  %v2901_v35 = vmul.f32 %v5838_v62, %v2863_v17  ;;  %v3010_v55 = vmul.f32 %v5846_v23, %v2862_v40 }
 0x2c2   : > { %v2714_v0 = vsel %vm1977_vm10, %v2712_v12, %v2713_v11  ;;  %v2716_v43 = vsel %vm1977_vm10, %v2713_v11, %v2715_v21  ;;  %v3011_v6 = vmul.f32 %v5846_v23, %v2863_v17  ;;  %v3012_v42 = vmul.f32 %v5846_v23, %v2971_v18 }
 0x2c3   : > { %v2797_v47 = vadd.f32 %v2714_v0, %v2520_v36  ;;  %v2798_v38 = vadd.f32 %v2716_v43, %v2521_v29  ;;  %v3124_v22 = vrot.slane %v3010_v55, 1  ;;  %v3248_v16 = vunpack.c.l.bf16 %v3232_v25  ;;  %v2267_v25 = vld [vmem:[#allocation2 + $0x8c] sm:$0x1]  ;;  %v2544_v43 = vld [vmem:[#allocation2 + $0x84] sm:$0xe] }
 0x2c4   : > { %v3288_v30 = vmul.f32 %v5853_v41, %v2863_v17  ;;  %v3125_v8 = vrot.slane %v3011_v6, 1  ;;  %v3127_v58 = vrot.slane %v3012_v42, 1  ;;  %v3289_v46 = vmul.f32 %v5853_v41, %v2971_v18 }
 0x2c5   : > { %v2932_v51 = vadd.f32 %v2900_v24, %v2797_v47  ;;  %v2933_v20 = vadd.f32 %v2901_v35, %v2798_v38  ;;  %v3287_v60 = vmul.f32 %v5853_v41, %v3248_v16  ;;  %v1554_v32 = vmul.f32 %v5748_v5, %v5938_v63 }
 0x2c6   : > { %v3402_v13 = vrot.slane %v3288_v30, 2  ;;  %v3126_v44 = vsel %vm1699_vm9, %v3124_v22, %v3125_v8  ;;  %v3128_v52 = vsel %vm1699_vm9, %v3125_v8, %v3127_v58  ;;  %v3404_v48 = vrot.slane %v3289_v46, 2 }
 0x2c7   : > { %v1555_v34 = vmul.f32 %v5748_v5, %v5941_v31  ;;  %v3209_v50 = vadd.f32 %v3126_v44, %v2932_v51  ;;  %v3210_v56 = vadd.f32 %v3128_v52, %v2933_v20  ;;  %v3401_v57 = vrot.slane %v3287_v60, 2  ;;  %v4291_v20 = vld [vmem:[#allocation2 + $0x90] sm:$0xff]   ;;  %v2956_v44 = vld [vmem:[#allocation2 + $0x98] sm:$0x1] }
 0x2c8   : > { %v1592_v59 = vunpack.c.l.bf16 %v1576_v9  ;;  %v3405_v49 = vsel %vm1977_vm10, %v3402_v13, %v3404_v48  ;;  %v1633_v33 = vmul.f32 %v5752_v2, %v5938_v63  ;;  %v1634_v39 = vmul.f32 %v5752_v2, %v5941_v31 }
 0x2c9   : > { %v1870_v3 = vunpack.c.l.bf16 %v1854_v28  ;;  %v3403_v37 = vsel %vm1977_vm10, %v3401_v57, %v3402_v13  ;;  %v3487_v54 = vadd.f32 %v3405_v49, %v3210_v56  ;;  %v1912_v5 = vmul.f32 %v5810_v15, %v5941_v31 }
 0x2ca   : > { %v1635_v1 = vmul.f32 %v5752_v2, %v1592_v59  ;;  %v3486_v4 = vadd.f32 %v3403_v37, %v3209_v50  ;;  %v1750_v61 = vrot.slane %v1633_v33, 1  ;;  %v1751_v10 = vrot.slane %v1634_v39, 1 }
 0x2cb   : > { %v1911_v11 = vmul.f32 %v5810_v15, %v1870_v3  ;;  %v3526_v63 = vadd.f32 %v5873_v7, %v3487_v54  ;;  %v1913_v26 = vmul.f32 %v5810_v15, %v1592_v59  ;;  %v2029_v12 = vrot.slane %v1912_v5, 2  ;;  %v3233_v3 = vld [vmem:[#allocation2 + $0x90] sm:$0xe] }
 0x2cc   : > { %v1753_v40 = vrot.slane %v1635_v1, 1  ;;  %v3525_v17 = vadd.f32 %v5873_v7, %v3486_v4  ;;  %v1752_v18 = vsel %vm1699_vm9, %v1750_v61, %v1751_v10  ;;  %v2175_v19 = vunpack.c.l.bf16 %v2143_v45 }
 0x2cd   : > { %v2028_v2 = vrot.slane %v1911_v11, 2  ;;  %v3558_v36 = vmax.f32 %v3526_v63, 0.0  ;;  %v1832_v21 = vadd.f32 %v1752_v18, %v1554_v32  ;;  %v2031_v24 = vrot.slane %v1913_v26, 2 }
 0x2ce   : > { %v1754_v31 = vsel %vm1699_vm9, %v1751_v10, %v1753_v40  ;;  %v3557_v29 = vmax.f32 %v3525_v17, 0.0  ;;  %v2176_v55 = vunpack.c.h.bf16 %v2143_v45  ;;  %v2213_v38 = vmul.f32 %v5770_v53, %v2175_v19 }
 0x2cf   : > { %v1833_v0 = vadd.f32 %v1754_v31, %v1555_v34  ;;  %v2030_v35 = vsel %vm1977_vm10, %v2028_v2, %v2029_v12  ;;  %v3590_v47 = vmin.f32 %v3558_v36, 6.0  ;;  %v2032_v6 = vsel %vm1977_vm10, %v2029_v12, %v2031_v24  ;;  %v1487_v12 = vld [vmem:[#allocation2 + $0x84] sm:$0xff]  }
 0x2d0   : > { %v2110_v42 = vadd.f32 %v2030_v35, %v1832_v21  ;;  %v3589_v22 = vmin.f32 %v3557_v29, 6.0  ;;  %v2214_v30 = vmul.f32 %v5770_v53, %v2176_v55  ;;  %v2283_v51 = vunpack.c.l.bf16 %v2267_v25 }
 0x2d1   : > { %v2111_v16 = vadd.f32 %v2032_v6, %v1833_v0  ;;  %v2324_v58 = vmul.f32 %v5778_v14, %v2175_v19  ;;  %v2325_v46 = vmul.f32 %v5778_v14, %v2176_v55  ;;  %v2560_v9 = vunpack.c.l.bf16 %v2544_v43 }
 0x2d2   : > { %v2245_v8 = vadd.f32 %v2213_v38, %v2110_v42  ;;  %v3612_v60 = vpack.c.bf16 %v3590_v47, %v3589_v22  ;;  %v2326_v32 = vmul.f32 %v5778_v14, %v2283_v51  ;;  %v2602_v28 = vmul.f32 %v5827_v27, %v2176_v55  ;;  %v1577_v55 = vld [vmem:[#allocation2 + $0x8c] sm:$0x1]  ;;  %v1855_v38 = vld [vmem:[#allocation2 + $0x84] sm:$0xe] }
 0x2d3   : > { %v2246_v13 = vadd.f32 %v2214_v30, %v2111_v16  ;;  %v2440_v52 = vrot.slane %v2324_v58, 1  ;;  %v2441_v48 = vrot.slane %v2325_v46, 1  ;;  %v2601_v34 = vmul.f32 %v5827_v27, %v2560_v9 }
 0x2d4   : > { %v2603_v53 = vmul.f32 %v5827_v27, %v2283_v51  ;;  %4429 = vmatmul.mubr.bf16.gmra.mrb[16].mxu1 %v3612_v60  ;;  %v2443_v50 = vrot.slane %v2326_v32, 1  ;;  %v2718_v56 = vrot.slane %v2602_v28, 2  ;;  %v6033_v57 = vunpack.c.l.bf16 %v4291_v20  ;;  %v6057_v51 = vld [vmem:[#allocation8] ss:$0 sm:$0xff] }
 0x2d5   : > { %v6035_v59 = vunpack.c.h.bf16 %v4291_v20  ;;  %v2442_v49 = vsel %vm1699_vm9, %v2440_v52, %v2441_v48  ;;  %v2717_v33 = vrot.slane %v2601_v34, 2  ;;  %v2972_v39 = vunpack.c.l.bf16 %v2956_v44  ;;  %v6062_v20 = vld [vmem:[#allocation8 + $0x1] ss:$0 sm:$0xff] }
 0x2d6   : > { %v2720_v14 = vrot.slane %v2603_v53, 2  ;;  %v2444_v37 = vsel %vm1699_vm9, %v2441_v48, %v2443_v50  ;;  %v2522_v54 = vadd.f32 %v2442_v49, %v2245_v8  ;;  %v2902_v1 = vmul.f32 %v5838_v62, %v6033_v57 }
 0x2d7   : > { %v2903_v5 = vmul.f32 %v5838_v62, %v6035_v59  ;;  %v2523_v45 = vadd.f32 %v2444_v37, %v2246_v13  ;;  %v2719_v4 = vsel %vm1977_vm10, %v2717_v33, %v2718_v56  ;;  %v3013_v10 = vmul.f32 %v5846_v23, %v6033_v57  ;;  %v6072_v37 = vld [vmem:[#allocation8 + $0x4] ss:$0 sm:$0xff] }
 0x2d8   : > { %v2721_v61 = vsel %vm1977_vm10, %v2718_v56, %v2720_v14  ;;  %v2799_v11 = vadd.f32 %v2719_v4, %v2522_v54  ;;  %v3014_v63 = vmul.f32 %v5846_v23, %v6035_v59  ;;  %v3015_v40 = vmul.f32 %v5846_v23, %v2972_v39 }
 0x2d9   : > { %v3249_v26 = vunpack.c.l.bf16 %v3233_v3  ;;  %v2800_v17 = vadd.f32 %v2721_v61, %v2523_v45  ;;  %v3129_v18 = vrot.slane %v3013_v10, 1  ;;  %v3291_v2 = vmul.f32 %v5853_v41, %v6035_v59  ;;  %v2268_v61 = vld [vmem:[#allocation2 + $0x98] sm:$0x1] }
 0x2da   : > { %v3292_v19 = vmul.f32 %v5853_v41, %v2972_v39  ;;  %v2934_v36 = vadd.f32 %v2902_v1, %v2799_v11  ;;  %v3130_v31 = vrot.slane %v3014_v63, 1  ;;  %v3132_v21 = vrot.slane %v3015_v40, 1  ;;  %v2545_v40 = vld [vmem:[#allocation2 + $0x90] sm:$0xe] }
 0x2db   : > { %v3290_v24 = vmul.f32 %v5853_v41, %v3249_v26  ;;  %v2935_v25 = vadd.f32 %v2903_v5, %v2800_v17  ;;  %v3407_v29 = vrot.slane %v3291_v2, 2  ;;  %v1519_v35 = vunpack.c.l.bf16 %v1487_v12 }
 0x2dc   : > { %v3409_v0 = vrot.slane %v3292_v19, 2  ;;  %v3131_v43 = vsel %vm1699_vm9, %v3129_v18, %v3130_v31  ;;  %v3133_v47 = vsel %vm1699_vm9, %v3130_v31, %v3132_v21  ;;  %v1520_v42 = vunpack.c.h.bf16 %v1487_v12 }
 0x2dd   : > { %v3406_v6 = vrot.slane %v3290_v24, 2  ;;  %v3211_v22 = vadd.f32 %v3131_v43, %v2934_v36  ;;  %v3212_v16 = vadd.f32 %v3133_v47, %v2935_v25  ;;  %v1556_v8 = vmul.f32 %v6057_v51, %v1519_v35  ;;  %v6082_v36 = vld [vmem:[#allocation8 + $0x5] ss:$0 sm:$0xff] }
 0x2de   : > { %v3410_v30 = vsel %vm1977_vm10, %v3407_v29, %v3409_v0  ;;  %v1557_v46 = vmul.f32 %v6057_v51, %v1520_v42  ;;  %v1593_v9 = vunpack.c.l.bf16 %v1577_v55  ;;  %v1636_v60 = vmul.f32 %v6062_v20, %v1519_v35  ;;  %v2834_v35 = vld [vmem:[#allocation2 + $0x9c] sm:$0xff]  }
 0x2df   : > { %v3408_v58 = vsel %vm1977_vm10, %v3406_v6, %v3407_v29  ;;  %v3489_v32 = vadd.f32 %v3410_v30, %v3212_v16  ;;  %v1637_v28 = vmul.f32 %v6062_v20, %v1520_v42  ;;  %v1871_v44 = vunpack.c.l.bf16 %v1855_v38 }
 0x2e0   : > { %v3488_v13 = vadd.f32 %v3408_v58, %v3211_v22  ;;  %v1638_v52 = vmul.f32 %v6062_v20, %v1593_v9  ;;  %v1755_v48 = vrot.slane %v1636_v60, 1  ;;  %v1915_v34 = vmul.f32 %v5810_v15, %v1520_v42  ;;  %v2957_v42 = vld [vmem:[#allocation2 + $0xa4] sm:$0x1] }
 0x2e1   : > { %v1916_v53 = vmul.f32 %v5810_v15, %v1593_v9  ;;  %v3528_v56 = vadd.f32 %v5873_v7, %v3489_v32  ;;  %v1756_v49 = vrot.slane %v1637_v28, 1  ;;  %v1914_v33 = vmul.f32 %v5810_v15, %v1871_v44  ;;  %v3234_v44 = vld [vmem:[#allocation2 + $0x9c] sm:$0xe] }
 0x2e2   : > { %v3527_v50 = vadd.f32 %v5873_v7, %v3488_v13  ;;  %v1758_v14 = vrot.slane %v1638_v52, 1  ;;  %v2034_v39 = vrot.slane %v1915_v34, 2  ;;  %v2215_v54 = vmul.f32 %v6072_v37, %v6033_v57 }
 0x2e3   : > { %v2036_v3 = vrot.slane %v1916_v53, 2  ;;  %v3560_v5 = vmax.f32 %v3528_v56, 0.0  ;;  %v1757_v45 = vsel %vm1699_vm9, %v1755_v48, %v1756_v49  ;;  %v2033_v4 = vrot.slane %v1914_v33, 2 }
 0x2e4   : > { %v3559_v1 = vmax.f32 %v3527_v50, 0.0  ;;  %v1759_v10 = vsel %vm1699_vm9, %v1756_v49, %v1758_v14  ;;  %v1834_v11 = vadd.f32 %v1757_v45, %v1556_v8  ;;  %v2216_v15 = vmul.f32 %v6072_v37, %v6035_v59 }
 0x2e5   : > { %v2037_v63 = vsel %vm1977_vm10, %v2034_v39, %v2036_v3  ;;  %v3592_v12 = vmin.f32 %v3560_v5, 6.0  ;;  %v1835_v17 = vadd.f32 %v1759_v10, %v1557_v46  ;;  %v2035_v18 = vsel %vm1977_vm10, %v2033_v4, %v2034_v39 }
 0x2e6   : > { %v3591_v26 = vmin.f32 %v3559_v1, 6.0  ;;  %v2112_v2 = vadd.f32 %v2035_v18, %v1834_v11  ;;  %v2284_v19 = vunpack.c.l.bf16 %v2268_v61  ;;  %v2327_v31 = vmul.f32 %v6082_v36, %v6033_v57  ;;  %v1578_v11 = vld [vmem:[#allocation2 + $0x98] sm:$0x1] }
 0x2e7   : > { %v2328_v21 = vmul.f32 %v6082_v36, %v6035_v59  ;;  %v2113_v25 = vadd.f32 %v2037_v63, %v1835_v17  ;;  %v2561_v29 = vunpack.c.l.bf16 %v2545_v40  ;;  %v2605_v0 = vmul.f32 %v5827_v27, %v6035_v59 }
 0x2e8   : > { %v3613_v24 = vpack.c.bf16 %v3592_v12, %v3591_v26  ;;  %v2247_v55 = vadd.f32 %v2215_v54, %v2112_v2  ;;  %v2329_v43 = vmul.f32 %v6082_v36, %v2284_v19  ;;  %v2445_v47 = vrot.slane %v2327_v31, 1  ;;  %v1856_v26 = vld [vmem:[#allocation2 + $0x90] sm:$0xe] }
 0x2e9   : > { %v2446_v6 = vrot.slane %v2328_v21, 1  ;;  %v2248_v38 = vadd.f32 %v2216_v15, %v2113_v25  ;;  %v2604_v22 = vmul.f32 %v5827_v27, %v2561_v29  ;;  %v2606_v16 = vmul.f32 %v5827_v27, %v2284_v19 }
 0x2ea   : > { %4432 = vmatprep.mubr.bf16.mxu1 %v3613_v24  ;;  %v2723_v30 = vrot.slane %v2605_v0, 2  ;;  %v2448_v58 = vrot.slane %v2329_v43, 1  ;;  %v2866_v46 = vunpack.c.l.bf16 %v2834_v35  ;;  %v2867_v9 = vunpack.c.h.bf16 %v2834_v35  ;;  %v6117_v0 = vld [vmem:[#allocation8 + $0x2] ss:$0 sm:$0xff] }
 0x2eb   : > { %v2447_v8 = vsel %vm1699_vm9, %v2445_v47, %v2446_v6  ;;  %v2722_v13 = vrot.slane %v2604_v22, 2  ;;  %v2725_v32 = vrot.slane %v2606_v16, 2  ;;  %v2973_v28 = vunpack.c.l.bf16 %v2957_v42 }
 0x2ec   : > { %v2524_v60 = vadd.f32 %v2447_v8, %v2247_v55  ;;  %v2449_v52 = vsel %vm1699_vm9, %v2446_v6, %v2448_v58  ;;  %v2904_v48 = vmul.f32 %v5838_v62, %v2866_v46  ;;  %v2905_v34 = vmul.f32 %v5838_v62, %v2867_v9  ;;  %v2147_v55 = vld [vmem:[#allocation2 + $0x9c] sm:$0xff]  }
 0x2ed   : > { %v3016_v53 = vmul.f32 %v5846_v23, %v2866_v46  ;;  %v2525_v27 = vadd.f32 %v2449_v52, %v2248_v38  ;;  %v2724_v50 = vsel %vm1977_vm10, %v2722_v13, %v2723_v30  ;;  %v2726_v56 = vsel %vm1977_vm10, %v2723_v30, %v2725_v32 }
 0x2ee   : > { %v3017_v49 = vmul.f32 %v5846_v23, %v2867_v9  ;;  %v2801_v33 = vadd.f32 %v2724_v50, %v2524_v60  ;;  %v3018_v14 = vmul.f32 %v5846_v23, %v2973_v28  ;;  %v3250_v3 = vunpack.c.l.bf16 %v3234_v44 }
 0x2ef   : > { %v3134_v39 = vrot.slane %v3016_v53, 1  ;;  %v2802_v54 = vadd.f32 %v2726_v56, %v2525_v27  ;;  %v3294_v5 = vmul.f32 %v5853_v41, %v2867_v9  ;;  %v3295_v62 = vmul.f32 %v5853_v41, %v2973_v28  ;;  %v2546_v56 = vld [vmem:[#allocation2 + $0x9c] sm:$0xe] }
 0x2f0   : > { %v3135_v1 = vrot.slane %v3017_v49, 1  ;;  %v2936_v45 = vadd.f32 %v2904_v48, %v2801_v33  ;;  %v3137_v4 = vrot.slane %v3018_v14, 1  ;;  %v3293_v61 = vmul.f32 %v5853_v41, %v3250_v3  ;;  %v2269_v48 = vld [vmem:[#allocation2 + $0xa4] sm:$0x1] }
 0x2f1   : > { %v1558_v10 = vmul.f32 %v6057_v51, %v6033_v57  ;;  %v2937_v63 = vadd.f32 %v2905_v34, %v2802_v54  ;;  %v3412_v23 = vrot.slane %v3294_v5, 2  ;;  %v3414_v40 = vrot.slane %v3295_v62, 2 }
 0x2f2   : > { %v3136_v15 = vsel %vm1699_vm9, %v3134_v39, %v3135_v1  ;;  %v3138_v12 = vsel %vm1699_vm9, %v3135_v1, %v3137_v4  ;;  %v3411_v18 = vrot.slane %v3293_v61, 2  ;;  %v1559_v2 = vmul.f32 %v6057_v51, %v6035_v59  ;;  %v4292_v4 = vld [vmem:[#allocation2 + $0xa8] sm:$0xff]  }
 0x2f3   : > { %v3213_v17 = vadd.f32 %v3136_v15, %v2936_v45  ;;  %v3214_v19 = vadd.f32 %v3138_v12, %v2937_v63  ;;  %v3415_v41 = vsel %vm1977_vm10, %v3412_v23, %v3414_v40  ;;  %v1594_v31 = vunpack.c.l.bf16 %v1578_v11  ;;  %v6142_v15 = vld [vmem:[#allocation8 + $0x6] ss:$0 sm:$0xff]  ;;  %v2958_v40 = vld [vmem:[#allocation2 + $0xb0] sm:$0x1] }
 0x2f4   : > { %v1639_v21 = vmul.f32 %v6062_v20, %v6033_v57  ;;  %v3413_v24 = vsel %vm1977_vm10, %v3411_v18, %v3412_v23  ;;  %v1640_v25 = vmul.f32 %v6062_v20, %v6035_v59  ;;  %v1872_v29 = vunpack.c.l.bf16 %v1856_v26 }
 0x2f5   : > { %v1918_v35 = vmul.f32 %v6117_v0, %v6035_v59  ;;  %v3490_v43 = vadd.f32 %v3413_v24, %v3213_v17  ;;  %v3491_v47 = vadd.f32 %v3415_v41, %v3214_v19  ;;  %v1641_v6 = vmul.f32 %v6062_v20, %v1594_v31 }
 0x2f6   : > { %v1760_v42 = vrot.slane %v1639_v21, 1  ;;  %v1761_v38 = vrot.slane %v1640_v25, 1  ;;  %v1917_v57 = vmul.f32 %v6117_v0, %v1872_v29  ;;  %v1919_v22 = vmul.f32 %v6117_v0, %v1594_v31 }
 0x2f7   : > { %v2039_v16 = vrot.slane %v1918_v35, 2  ;;  %v3529_v30 = vadd.f32 %v5873_v7, %v3490_v43  ;;  %v3530_v8 = vadd.f32 %v5873_v7, %v3491_v47  ;;  %v1763_v58 = vrot.slane %v1641_v6, 1  ;;  %v6153_v47 = vld [vmem:[#allocation8 + $0x8] ss:$0 sm:$0xff] }
 0x2f8   : > { %v2179_v46 = vunpack.c.l.bf16 %v2147_v55  ;;  %v1762_v59 = vsel %vm1699_vm9, %v1760_v42, %v1761_v38  ;;  %v2038_v9 = vrot.slane %v1917_v57, 2  ;;  %v2041_v60 = vrot.slane %v1919_v22, 2  ;;  %v3235_v42 = vld [vmem:[#allocation2 + $0xa8] sm:$0xe]  ;;  %v6160_v22 = vld [vmem:[#allocation8 + $0x9] ss:$0 sm:$0xff] }
 0x2f9   : > { %v2180_v13 = vunpack.c.h.bf16 %v2147_v55  ;;  %v3561_v32 = vmax.f32 %v3529_v30, 0.0  ;;  %v3562_v28 = vmax.f32 %v3530_v8, 0.0  ;;  %v1764_v44 = vsel %vm1699_vm9, %v1761_v38, %v1763_v58  ;;  %v6128_v34 = vpop.f32.mrb[0].mxu1 }
 0x2fa   : > { %v1836_v52 = vadd.f32 %v1762_v59, %v1558_v10  ;;  %v1837_v53 = vadd.f32 %v1764_v44, %v1559_v2  ;;  %v2040_v27 = vsel %vm1977_vm10, %v2038_v9, %v2039_v16  ;;  %v2042_v7 = vsel %vm1977_vm10, %v2039_v16, %v2041_v60  ;;  %v6133_v49 = vpop.f32.mrb[1].mxu1  ;;  %v1491_v9 = vld [vmem:[#allocation2 + $0x9c] sm:$0xff]  }
 0x2fb   : > { %v2217_v50 = vmul.f32 %v6072_v37, %v2179_v46  ;;  %v3593_v33 = vmin.f32 %v3561_v32, 6.0  ;;  %v3594_v14 = vmin.f32 %v3562_v28, 6.0  ;;  %v2218_v3 = vmul.f32 %v6072_v37, %v2180_v13  ;;  %v6136_v54 = vpop.f32.mrb[2].mxu1 }
 0x2fc   : > { %v2114_v39 = vadd.f32 %v2040_v27, %v1836_v52  ;;  %v2115_v1 = vadd.f32 %v2042_v7, %v1837_v53  ;;  %v2285_v5 = vunpack.c.l.bf16 %v2269_v48  ;;  %v2330_v62 = vmul.f32 %v6082_v36, %v2179_v46  ;;  %v6140_v61 = vpop.f32.mrb[3].mxu1  ;;  %v6169_v48 = vld [vmem:[#allocation8 + $0xa] ss:$0 sm:$0xff] }
 0x2fd   : > { %v2331_v45 = vmul.f32 %v6082_v36, %v2180_v13  ;;  %v3614_v10 = vpack.c.bf16 %v3594_v14, %v3593_v33  ;;  %v2562_v63 = vunpack.c.l.bf16 %v2546_v56  ;;  %v2608_v23 = vmul.f32 %v6142_v15, %v2180_v13  ;;  %v1579_v14 = vld [vmem:[#allocation2 + $0xa4] sm:$0x1] }
 0x2fe   : > { %v2249_v11 = vadd.f32 %v2217_v50, %v2114_v39  ;;  %v2250_v26 = vadd.f32 %v2218_v3, %v2115_v1  ;;  %v2332_v12 = vmul.f32 %v6082_v36, %v2285_v5  ;;  %v2450_v17 = vrot.slane %v2330_v62, 1  ;;  %v1857_v62 = vld [vmem:[#allocation2 + $0x9c] sm:$0xe] }
 0x2ff   : > { %v2451_v18 = vrot.slane %v2331_v45, 1  ;;  %4433 = vmatmul.mubr.bf16.gmra.mrb[20].mxu1 %v3614_v10  ;;  %v2607_v2 = vmul.f32 %v6142_v15, %v2562_v63  ;;  %v2609_v19 = vmul.f32 %v6142_v15, %v2285_v5  ;;  %v2728_v41 = vrot.slane %v2608_v23, 2 }
 0x300   : > { %v6148_v31 = vunpack.c.l.bf16 %v4292_v4  ;;  %v2453_v24 = vrot.slane %v2332_v12, 1  ;;  %v6151_v25 = vunpack.c.h.bf16 %v4292_v4  ;;  %v2974_v29 = vunpack.c.l.bf16 %v2958_v40 }
 0x301   : > { %v2452_v21 = vsel %vm1699_vm9, %v2450_v17, %v2451_v18  ;;  %v2727_v55 = vrot.slane %v2607_v2, 2  ;;  %v2730_v43 = vrot.slane %v2609_v19, 2  ;;  %v3251_v28 = vunpack.c.l.bf16 %v3235_v42 }
 0x302   : > { %v2526_v35 = vadd.f32 %v2452_v21, %v2249_v11  ;;  %v2906_v6 = vmul.f32 %v6153_v47, %v6148_v31  ;;  %v2454_v38 = vsel %vm1699_vm9, %v2451_v18, %v2453_v24  ;;  %v2907_v57 = vmul.f32 %v6153_v47, %v6151_v25 }
 0x303   : > { %v3019_v16 = vmul.f32 %v6160_v22, %v6148_v31  ;;  %v3020_v30 = vmul.f32 %v6160_v22, %v6151_v25  ;;  %v2527_v8 = vadd.f32 %v2454_v38, %v2250_v26  ;;  %v2729_v58 = vsel %vm1977_vm10, %v2727_v55, %v2728_v41 }
 0x304   : > { %v2731_v46 = vsel %vm1977_vm10, %v2728_v41, %v2730_v43  ;;  %v3021_v59 = vmul.f32 %v6160_v22, %v2974_v29  ;;  %v2803_v60 = vadd.f32 %v2729_v58, %v2526_v35  ;;  %v3297_v53 = vmul.f32 %v6169_v48, %v6151_v25 }
 0x305   : > { %v3139_v13 = vrot.slane %v3019_v16, 1  ;;  %v3140_v32 = vrot.slane %v3020_v30, 1  ;;  %v2804_v44 = vadd.f32 %v2731_v46, %v2527_v8  ;;  %v3298_v27 = vmul.f32 %v6169_v48, %v2974_v29 }
 0x306   : > { %v3142_v52 = vrot.slane %v3021_v59, 1  ;;  %v2938_v7 = vadd.f32 %v2906_v6, %v2803_v60  ;;  %v3296_v56 = vmul.f32 %v6169_v48, %v3251_v28  ;;  %v1523_v33 = vunpack.c.l.bf16 %v1491_v9  ;;  %v6190_v6 = vld [vmem:[%s6505_s4] ss:$0 sm:$0xff]  ;;  %v2270_v59 = vld [vmem:[#allocation2 + $0xb0] sm:$0x1] }
 0x307   : > { %v3141_v50 = vsel %vm1699_vm9, %v3139_v13, %v3140_v32  ;;  %v2939_v39 = vadd.f32 %v2907_v57, %v2804_v44  ;;  %v3417_v1 = vrot.slane %v3297_v53, 2  ;;  %v3419_v5 = vrot.slane %v3298_v27, 2  ;;  %v2547_v28 = vld [vmem:[#allocation2 + $0xa8] sm:$0xe] }
 0x308   : > { %v3143_v3 = vsel %vm1699_vm9, %v3140_v32, %v3142_v52  ;;  %v3215_v45 = vadd.f32 %v3141_v50, %v2938_v7  ;;  %v3416_v4 = vrot.slane %v3296_v56, 2  ;;  %v1524_v10 = vunpack.c.h.bf16 %v1491_v9 }
 0x309   : > { %v1560_v11 = vmul.f32 %v6057_v51, %v1523_v33  ;;  %v3216_v63 = vadd.f32 %v3143_v3, %v2939_v39  ;;  %v3420_v23 = vsel %vm1977_vm10, %v3417_v1, %v3419_v5  ;;  %v1595_v40 = vunpack.c.l.bf16 %v1579_v14  ;;  %v2838_v5 = vld [vmem:[#allocation2 + $0xb4] sm:$0xff]  }
 0x30a   : > { %v1642_v26 = vmul.f32 %v6062_v20, %v1523_v33  ;;  %v3418_v12 = vsel %vm1977_vm10, %v3416_v4, %v3417_v1  ;;  %v1561_v17 = vmul.f32 %v6057_v51, %v1524_v10  ;;  %v1643_v18 = vmul.f32 %v6062_v20, %v1524_v10 }
 0x30b   : > { %v1873_v2 = vunpack.c.l.bf16 %v1857_v62  ;;  %v3492_v19 = vadd.f32 %v3418_v12, %v3215_v45  ;;  %v3493_v41 = vadd.f32 %v3420_v23, %v3216_v63  ;;  %v1644_v21 = vmul.f32 %v6062_v20, %v1595_v40 }
 0x30c   : > { %v1765_v24 = vrot.slane %v1642_v26, 1  ;;  %v1766_v29 = vrot.slane %v1643_v18, 1  ;;  %v1921_v55 = vmul.f32 %v6117_v0, %v1524_v10  ;;  %v1922_v43 = vmul.f32 %v6117_v0, %v1595_v40 }
 0x30d   : > { %v1920_v35 = vmul.f32 %v6117_v0, %v1873_v2  ;;  %v3531_v42 = vadd.f32 %v6190_v6, %v3492_v19  ;;  %v3532_v38 = vadd.f32 %v6190_v6, %v3493_v41  ;;  %v1768_v57 = vrot.slane %v1644_v21, 1 }
 0x30e   : > { %v2219_v16 = vmul.f32 %v6072_v37, %v6148_v31  ;;  %v1767_v30 = vsel %vm1699_vm9, %v1765_v24, %v1766_v29  ;;  %v2044_v58 = vrot.slane %v1921_v55, 2  ;;  %v2046_v46 = vrot.slane %v1922_v43, 2 }
 0x30f   : > { %v2043_v8 = vrot.slane %v1920_v35, 2  ;;  %v3563_v9 = vmax.f32 %v3531_v42, 0.0  ;;  %v3564_v60 = vmax.f32 %v3532_v38, 0.0  ;;  %v1769_v13 = vsel %vm1699_vm9, %v1766_v29, %v1768_v57  ;;  %v3236_v42 = vld [vmem:[#allocation2 + $0xb4] sm:$0xe] }
 0x310   : > { %v1838_v32 = vadd.f32 %v1767_v30, %v1560_v11  ;;  %v1839_v44 = vadd.f32 %v1769_v13, %v1561_v17  ;;  %v2047_v53 = vsel %vm1977_vm10, %v2044_v58, %v2046_v46  ;;  %v2220_v27 = vmul.f32 %v6072_v37, %v6151_v25  ;;  %v2959_v11 = vld [vmem:[#allocation2 + $0xbc] sm:$0x1] }
 0x311   : > { %v2045_v52 = vsel %vm1977_vm10, %v2043_v8, %v2044_v58  ;;  %v3595_v7 = vmin.f32 %v3563_v9, 6.0  ;;  %v3596_v50 = vmin.f32 %v3564_v60, 6.0  ;;  %v2286_v33 = vunpack.c.l.bf16 %v2270_v59 }
 0x312   : > { %v2116_v56 = vadd.f32 %v2045_v52, %v1838_v32  ;;  %v2117_v14 = vadd.f32 %v2047_v53, %v1839_v44  ;;  %v2333_v39 = vmul.f32 %v6082_v36, %v6148_v31  ;;  %v2334_v3 = vmul.f32 %v6082_v36, %v6151_v25 }
 0x313   : > { %v2563_v1 = vunpack.c.l.bf16 %v2547_v28  ;;  %v3615_v62 = vpack.c.bf16 %v3596_v50, %v3595_v7  ;;  %v2335_v4 = vmul.f32 %v6082_v36, %v2286_v33  ;;  %v2611_v10 = vmul.f32 %v6142_v15, %v6151_v25 }
 0x314   : > { %v2251_v45 = vadd.f32 %v2219_v16, %v2116_v56  ;;  %v2252_v63 = vadd.f32 %v2220_v27, %v2117_v14  ;;  %v2455_v23 = vrot.slane %v2333_v39, 1  ;;  %v2456_v40 = vrot.slane %v2334_v3, 1  ;;  %v1580_v27 = vld [vmem:[#allocation2 + $0xb0] sm:$0x1]  ;;  %v1858_v14 = vld [vmem:[#allocation2 + $0xa8] sm:$0xe] }
 0x315   : > { %v2610_v26 = vmul.f32 %v6142_v15, %v2563_v1  ;;  %4436 = vmatprep.mubr.bf16.mxu1 %v3615_v62  ;;  %v2458_v12 = vrot.slane %v2335_v4, 1  ;;  %v2612_v17 = vmul.f32 %v6142_v15, %v2286_v33  ;;  %v2733_v18 = vrot.slane %v2611_v10, 2 }
 0x316   : > { %v2870_v2 = vunpack.c.l.bf16 %v2838_v5  ;;  %v2457_v19 = vsel %vm1699_vm9, %v2455_v23, %v2456_v40  ;;  %v2871_v21 = vunpack.c.h.bf16 %v2838_v5  ;;  %v2975_v24 = vunpack.c.l.bf16 %v2959_v11 }
 0x317   : > { %v2732_v41 = vrot.slane %v2610_v26, 2  ;;  %v2459_v29 = vsel %vm1699_vm9, %v2456_v40, %v2458_v12  ;;  %v2528_v35 = vadd.f32 %v2457_v19, %v2251_v45  ;;  %v2735_v55 = vrot.slane %v2612_v17, 2 }
 0x318   : > { %v2908_v43 = vmul.f32 %v6153_v47, %v2870_v2  ;;  %v2529_v38 = vadd.f32 %v2459_v29, %v2252_v63  ;;  %v2909_v16 = vmul.f32 %v6153_v47, %v2871_v21  ;;  %v3022_v30 = vmul.f32 %v6160_v22, %v2870_v2  ;;  %v2151_v2 = vld [vmem:[#allocation2 + $0xb4] sm:$0xff]  }
 0x319   : > { %v2734_v57 = vsel %vm1977_vm10, %v2732_v41, %v2733_v18  ;;  %v2736_v8 = vsel %vm1977_vm10, %v2733_v18, %v2735_v55  ;;  %v3023_v46 = vmul.f32 %v6160_v22, %v2871_v21  ;;  %v3024_v59 = vmul.f32 %v6160_v22, %v2975_v24 }
 0x31a   : > { %v2805_v58 = vadd.f32 %v2734_v57, %v2528_v35  ;;  %v2806_v9 = vadd.f32 %v2736_v8, %v2529_v38  ;;  %v3144_v60 = vrot.slane %v3022_v30, 1  ;;  %v3252_v13 = vunpack.c.l.bf16 %v3236_v42 }
 0x31b   : > { %v3300_v32 = vmul.f32 %v6169_v48, %v2871_v21  ;;  %v3145_v44 = vrot.slane %v3023_v46, 1  ;;  %v3147_v52 = vrot.slane %v3024_v59, 1  ;;  %v3301_v53 = vmul.f32 %v6169_v48, %v2975_v24 }
 0x31c   : > { %v2940_v28 = vadd.f32 %v2908_v43, %v2805_v58  ;;  %v2941_v7 = vadd.f32 %v2909_v16, %v2806_v9  ;;  %v3299_v50 = vmul.f32 %v6169_v48, %v3252_v13  ;;  %v1562_v33 = vmul.f32 %v6057_v51, %v6148_v31  ;;  %v2271_v58 = vld [vmem:[#allocation2 + $0xbc] sm:$0x1] }
 0x31d   : > { %v3422_v56 = vrot.slane %v3300_v32, 2  ;;  %v3146_v39 = vsel %vm1699_vm9, %v3144_v60, %v3145_v44  ;;  %v3148_v3 = vsel %vm1699_vm9, %v3145_v44, %v3147_v52  ;;  %v3424_v1 = vrot.slane %v3301_v53, 2  ;;  %v2548_v32 = vld [vmem:[#allocation2 + $0xb4] sm:$0xe] }
 0x31e   : > { %v1563_v5 = vmul.f32 %v6057_v51, %v6151_v25  ;;  %v3217_v62 = vadd.f32 %v3146_v39, %v2940_v28  ;;  %v3218_v45 = vadd.f32 %v3148_v3, %v2941_v7  ;;  %v3421_v4 = vrot.slane %v3299_v50, 2 }
 0x31f   : > { %v1596_v10 = vunpack.c.l.bf16 %v1580_v27  ;;  %v3425_v11 = vsel %vm1977_vm10, %v3422_v56, %v3424_v1  ;;  %v1645_v63 = vmul.f32 %v6062_v20, %v6148_v31  ;;  %v1646_v23 = vmul.f32 %v6062_v20, %v6151_v25 }
 0x320   : > { %v1874_v40 = vunpack.c.l.bf16 %v1858_v14  ;;  %v3423_v26 = vsel %vm1977_vm10, %v3421_v4, %v3422_v56  ;;  %v3495_v12 = vadd.f32 %v3425_v11, %v3218_v45  ;;  %v1924_v18 = vmul.f32 %v6117_v0, %v6151_v25  ;;  %v4293_v45 = vld [vmem:[#allocation2 + $0xc0] sm:$0xff]  }
 0x321   : > { %v1647_v17 = vmul.f32 %v6062_v20, %v1596_v10  ;;  %v3494_v19 = vadd.f32 %v3423_v26, %v3217_v62  ;;  %v1770_v41 = vrot.slane %v1645_v63, 1  ;;  %v1771_v21 = vrot.slane %v1646_v23, 1  ;;  %v2960_v23 = vld [vmem:[#allocation2 + $0xc8] sm:$0x1] }
 0x322   : > { %v1923_v24 = vmul.f32 %v6117_v0, %v1874_v40  ;;  %v3534_v31 = vadd.f32 %v6190_v6, %v3495_v12  ;;  %v1925_v35 = vmul.f32 %v6117_v0, %v1596_v10  ;;  %v2049_v55 = vrot.slane %v1924_v18, 2 }
 0x323   : > { %v1773_v29 = vrot.slane %v1647_v17, 1  ;;  %v3533_v43 = vadd.f32 %v6190_v6, %v3494_v19  ;;  %v1772_v42 = vsel %vm1699_vm9, %v1770_v41, %v1771_v21  ;;  %v2183_v57 = vunpack.c.l.bf16 %v2151_v2 }
 0x324   : > { %v2048_v38 = vrot.slane %v1923_v24, 2  ;;  %v3566_v16 = vmax.f32 %v3534_v31, 0.0  ;;  %v1840_v30 = vadd.f32 %v1772_v42, %v1562_v33  ;;  %v2051_v8 = vrot.slane %v1925_v35, 2  ;;  %v6244_v46 = vpop.f32.mrb[4].mxu1  ;;  %v3237_v35 = vld [vmem:[#allocation2 + $0xc0] sm:$0xe] }
 0x325   : > { %v1774_v25 = vsel %vm1699_vm9, %v1771_v21, %v1773_v29  ;;  %v3565_v59 = vmax.f32 %v3533_v43, 0.0  ;;  %v2184_v13 = vunpack.c.h.bf16 %v2151_v2  ;;  %v6247_v28 = vpop.f32.mrb[5].mxu1  ;;  %v2221_v27 = vmul.f32 %v6072_v37, %v2183_v57 }
 0x326   : > { %v1841_v9 = vadd.f32 %v1774_v25, %v1563_v5  ;;  %v2050_v60 = vsel %vm1977_vm10, %v2048_v38, %v2049_v55  ;;  %v3598_v44 = vmin.f32 %v3566_v16, 6.0  ;;  %v2052_v52 = vsel %vm1977_vm10, %v2049_v55, %v2051_v8  ;;  %v6251_v7 = vpop.f32.mrb[6].mxu1 }
 0x327   : > { %v2118_v53 = vadd.f32 %v2050_v60, %v1840_v30  ;;  %v3597_v50 = vmin.f32 %v3565_v59, 6.0  ;;  %v2222_v33 = vmul.f32 %v6072_v37, %v2184_v13  ;;  %v2287_v14 = vunpack.c.l.bf16 %v2271_v58  ;;  %v6254_v39 = vpop.f32.mrb[7].mxu1  ;;  %v1495_v60 = vld [vmem:[#allocation2 + $0xb4] sm:$0xff]  }
 0x328   : > { %v2119_v56 = vadd.f32 %v2052_v52, %v1841_v9  ;;  %v2336_v1 = vmul.f32 %v6082_v36, %v2183_v57  ;;  %v2337_v5 = vmul.f32 %v6082_v36, %v2184_v13  ;;  %v2564_v62 = vunpack.c.l.bf16 %v2548_v32 }
 0x329   : > { %v2253_v3 = vadd.f32 %v2221_v27, %v2118_v53  ;;  %v3616_v4 = vpack.c.bf16 %v3598_v44, %v3597_v50  ;;  %v2338_v11 = vmul.f32 %v6082_v36, %v2287_v14  ;;  %v2614_v63 = vmul.f32 %v6142_v15, %v2184_v13 }
 0x32a   : > { %v2254_v10 = vadd.f32 %v2222_v33, %v2119_v56  ;;  %v2460_v40 = vrot.slane %v2336_v1, 1  ;;  %v2461_v26 = vrot.slane %v2337_v5, 1  ;;  %v2613_v12 = vmul.f32 %v6142_v15, %v2564_v62  ;;  %v1581_v5 = vld [vmem:[#allocation2 + $0xbc] sm:$0x1] }
 0x32b   : > { %v2615_v17 = vmul.f32 %v6142_v15, %v2287_v14  ;;  %4437 = vmatmul.mubr.bf16.gmra.mrb[24].mxu1 %v3616_v4  ;;  %v2463_v18 = vrot.slane %v2338_v11, 1  ;;  %v2738_v2 = vrot.slane %v2614_v63, 2  ;;  %v6262_v19 = vunpack.c.l.bf16 %v4293_v45  ;;  %v1859_v11 = vld [vmem:[#allocation2 + $0xb4] sm:$0xe] }
 0x32c   : > { %v6264_v41 = vunpack.c.h.bf16 %v4293_v45  ;;  %v2462_v21 = vsel %vm1699_vm9, %v2460_v40, %v2461_v26  ;;  %v2737_v24 = vrot.slane %v2613_v12, 2  ;;  %v2976_v29 = vunpack.c.l.bf16 %v2960_v23 }
 0x32d   : > { %v2740_v31 = vrot.slane %v2615_v17, 2  ;;  %v2464_v55 = vsel %vm1699_vm9, %v2461_v26, %v2463_v18  ;;  %v2530_v43 = vadd.f32 %v2462_v21, %v2253_v3  ;;  %v2910_v42 = vmul.f32 %v6153_v47, %v6262_v19 }
 0x32e   : > { %v2911_v38 = vmul.f32 %v6153_v47, %v6264_v41  ;;  %v2531_v57 = vadd.f32 %v2464_v55, %v2254_v10  ;;  %v2739_v16 = vsel %vm1977_vm10, %v2737_v24, %v2738_v2  ;;  %v3025_v30 = vmul.f32 %v6160_v22, %v6262_v19 }
 0x32f   : > { %v2741_v25 = vsel %vm1977_vm10, %v2738_v2, %v2740_v31  ;;  %v2807_v8 = vadd.f32 %v2739_v16, %v2530_v43  ;;  %v3026_v58 = vmul.f32 %v6160_v22, %v6264_v41  ;;  %v3027_v59 = vmul.f32 %v6160_v22, %v2976_v29 }
 0x330   : > { %v3253_v9 = vunpack.c.l.bf16 %v3237_v35  ;;  %v2808_v13 = vadd.f32 %v2741_v25, %v2531_v57  ;;  %v3149_v32 = vrot.slane %v3025_v30, 1  ;;  %v3303_v44 = vmul.f32 %v6169_v48, %v6264_v41 }
 0x331   : > { %v3304_v52 = vmul.f32 %v6169_v48, %v2976_v29  ;;  %v2942_v53 = vadd.f32 %v2910_v42, %v2807_v8  ;;  %v3150_v27 = vrot.slane %v3026_v58, 1  ;;  %v3152_v50 = vrot.slane %v3027_v59, 1 }
 0x332   : > { %v3302_v56 = vmul.f32 %v6169_v48, %v3253_v9  ;;  %v2943_v33 = vadd.f32 %v2911_v38, %v2808_v13  ;;  %v3427_v14 = vrot.slane %v3303_v44, 2  ;;  %v1527_v1 = vunpack.c.l.bf16 %v1495_v60  ;;  %v2272_v13 = vld [vmem:[#allocation2 + $0xc8] sm:$0x1] }
 0x333   : > { %v3429_v3 = vrot.slane %v3304_v52, 2  ;;  %v3151_v62 = vsel %vm1699_vm9, %v3149_v32, %v3150_v27  ;;  %v3153_v45 = vsel %vm1699_vm9, %v3150_v27, %v3152_v50  ;;  %v1528_v10 = vunpack.c.h.bf16 %v1495_v60 }
 0x334   : > { %v3426_v4 = vrot.slane %v3302_v56, 2  ;;  %v3219_v63 = vadd.f32 %v3151_v62, %v2942_v53  ;;  %v3220_v23 = vadd.f32 %v3153_v45, %v2943_v33  ;;  %v1564_v26 = vmul.f32 %v6057_v51, %v1527_v1  ;;  %v2549_v53 = vld [vmem:[#allocation2 + $0xc0] sm:$0xe] }
 0x335   : > { %v3430_v40 = vsel %vm1977_vm10, %v3427_v14, %v3429_v3  ;;  %v1565_v17 = vmul.f32 %v6057_v51, %v1528_v10  ;;  %v1597_v18 = vunpack.c.l.bf16 %v1581_v5  ;;  %v1648_v2 = vmul.f32 %v6062_v20, %v1527_v1 }
 0x336   : > { %v3428_v12 = vsel %vm1977_vm10, %v3426_v4, %v3427_v14  ;;  %v3497_v24 = vadd.f32 %v3430_v40, %v3220_v23  ;;  %v1649_v31 = vmul.f32 %v6062_v20, %v1528_v10  ;;  %v1875_v29 = vunpack.c.l.bf16 %v1859_v11 }
 0x337   : > { %v3496_v21 = vadd.f32 %v3428_v12, %v3219_v63  ;;  %v1650_v35 = vmul.f32 %v6062_v20, %v1597_v18  ;;  %v1775_v55 = vrot.slane %v1648_v2, 1  ;;  %v1927_v43 = vmul.f32 %v6117_v0, %v1528_v10  ;;  %v2842_v10 = vld [vmem:[#allocation2 + $0xcc] sm:$0xff]  }
 0x338   : > { %v1928_v42 = vmul.f32 %v6117_v0, %v1597_v18  ;;  %v3536_v57 = vadd.f32 %v6190_v6, %v3497_v24  ;;  %v1776_v51 = vrot.slane %v1649_v31, 1  ;;  %v1926_v16 = vmul.f32 %v6117_v0, %v1875_v29 }
 0x339   : > { %v3535_v38 = vadd.f32 %v6190_v6, %v3496_v21  ;;  %v1778_v25 = vrot.slane %v1650_v35, 1  ;;  %v2054_v30 = vrot.slane %v1927_v43, 2  ;;  %v2223_v58 = vmul.f32 %v6072_v37, %v6262_v19 }
 0x33a   : > { %v2056_v8 = vrot.slane %v1928_v42, 2  ;;  %v3568_v20 = vmax.f32 %v3536_v57, 0.0  ;;  %v1777_v9 = vsel %vm1699_vm9, %v1775_v55, %v1776_v51  ;;  %v2053_v60 = vrot.slane %v1926_v16, 2 }
 0x33b   : > { %v3567_v59 = vmax.f32 %v3535_v38, 0.0  ;;  %v1779_v32 = vsel %vm1699_vm9, %v1776_v51, %v1778_v25  ;;  %v1842_v44 = vadd.f32 %v1777_v9, %v1564_v26  ;;  %v2224_v0 = vmul.f32 %v6072_v37, %v6264_v41  ;;  %v2961_v26 = vld [vmem:[#allocation2 + $0xd4] sm:$0x1] }
 0x33c   : > { %v2057_v52 = vsel %vm1977_vm10, %v2054_v30, %v2056_v8  ;;  %v3600_v50 = vmin.f32 %v3568_v20, 6.0  ;;  %v1843_v56 = vadd.f32 %v1779_v32, %v1565_v17  ;;  %v2055_v33 = vsel %vm1977_vm10, %v2053_v60, %v2054_v30  ;;  %v6325_v30 = vld [vmem:[%s6507_s6] ss:$0 sm:$0xff] }
 0x33d   : > { %v3599_v27 = vmin.f32 %v3567_v59, 6.0  ;;  %v2120_v14 = vadd.f32 %v2055_v33, %v1842_v44  ;;  %v2288_v3 = vunpack.c.l.bf16 %v2272_v13  ;;  %v2339_v1 = vmul.f32 %v6082_v36, %v6262_v19 }
 0x33e   : > { %v2340_v5 = vmul.f32 %v6082_v36, %v6264_v41  ;;  %v2121_v45 = vadd.f32 %v2057_v52, %v1843_v56  ;;  %v2565_v4 = vunpack.c.l.bf16 %v2549_v53  ;;  %v2617_v37 = vmul.f32 %v6142_v15, %v6264_v41 }
 0x33f   : > { %v3617_v62 = vpack.c.bf16 %v3600_v50, %v3599_v27  ;;  %v2255_v11 = vadd.f32 %v2223_v58, %v2120_v14  ;;  %v2341_v63 = vmul.f32 %v6082_v36, %v2288_v3  ;;  %v2465_v23 = vrot.slane %v2339_v1, 1  ;;  %v3238_v36 = vld [vmem:[#allocation2 + $0xcc] sm:$0xe] }
 0x340   : > { %v2466_v40 = vrot.slane %v2340_v5, 1  ;;  %v2256_v12 = vadd.f32 %v2224_v0, %v2121_v45  ;;  %v2616_v19 = vmul.f32 %v6142_v15, %v2565_v4  ;;  %v2618_v17 = vmul.f32 %v6142_v15, %v2288_v3  ;;  %v4580_v3 = vld [vmem:[%s5093_s22 + $0x10] sm:$0xff] }
 0x341   : > { %4440 = vmatprep.mubr.bf16.mxu1 %v3617_v62  ;;  %v2743_v18 = vrot.slane %v2617_v37, 2  ;;  %v2468_v21 = vrot.slane %v2341_v63, 1  ;;  %v2874_v24 = vunpack.c.l.bf16 %v2842_v10  ;;  %v2875_v31 = vunpack.c.h.bf16 %v2842_v10 }
 0x342   : > { %v2467_v2 = vsel %vm1699_vm9, %v2465_v23, %v2466_v40  ;;  %v2742_v29 = vrot.slane %v2616_v19, 2  ;;  %v2745_v35 = vrot.slane %v2618_v17, 2  ;;  %v2977_v55 = vunpack.c.l.bf16 %v2961_v26  ;;  %v4582_v23 = vld [vmem:[%s5093_s22 + $0x18] sm:$0xff]  ;;  %v4583_v26 = vld [vmem:[%s5093_s22 + $0x8] sm:$0xff] }
 0x343   : > { %v2532_v41 = vadd.f32 %v2467_v2, %v2255_v11  ;;  %v2469_v43 = vsel %vm1699_vm9, %v2466_v40, %v2468_v21  ;;  %v2912_v42 = vmul.f32 %v6153_v47, %v2874_v24  ;;  %v2913_v38 = vmul.f32 %v6153_v47, %v2875_v31  ;;  %v4581_v11 = vld [vmem:[%s5093_s22] sm:$0xff] }
 0x344   : > { %v3028_v57 = vmul.f32 %v6160_v22, %v2874_v24  ;;  %v2533_v15 = vadd.f32 %v2469_v43, %v2256_v12  ;;  %v2744_v51 = vsel %vm1977_vm10, %v2742_v29, %v2743_v18  ;;  %v2746_v16 = vsel %vm1977_vm10, %v2743_v18, %v2745_v35  ;;  %v4584_v12 = vld [vmem:[%s5093_s22 + $0x30] sm:$0xff]  ;;  %v4586_v24 = vld [vmem:[%s5093_s22 + $0x38] sm:$0xff] }
 0x345   : > { %v3029_v25 = vmul.f32 %v6160_v22, %v2875_v31  ;;  %v2809_v8 = vadd.f32 %v2744_v51, %v2532_v41  ;;  %v3030_v58 = vmul.f32 %v6160_v22, %v2977_v55  ;;  %v3254_v20 = vunpack.c.l.bf16 %v3238_v36 }
 0x346   : > { %v3154_v59 = vrot.slane %v3028_v57, 1  ;;  %v2810_v47 = vadd.f32 %v2746_v16, %v2533_v15  ;;  %v3306_v60 = vmul.f32 %v6169_v48, %v2875_v31  ;;  %v3307_v13 = vmul.f32 %v6169_v48, %v2977_v55  ;;  %v4588_v57 = vld [vmem:[%s5093_s22 + $0x50] sm:$0xff] }
 0x347   : > { %v3155_v9 = vrot.slane %v3029_v25, 1  ;;  %v2944_v32 = vadd.f32 %v2912_v42, %v2809_v8  ;;  %v3157_v44 = vrot.slane %v3030_v58, 1  ;;  %v3305_v52 = vmul.f32 %v6169_v48, %v3254_v20  ;;  %v4589_v8 = vld [vmem:[%s5093_s22 + $0x40] sm:$0xff]  ;;  %v4590_v20 = vld [vmem:[%s5093_s22 + $0x58] sm:$0xff] }
 0x348   : > { %v3733_v0 = vadd.f32 %v6128_v34, %v6325_v30  ;;  %v2945_v53 = vadd.f32 %v2913_v38, %v2810_v47  ;;  %v3432_v27 = vrot.slane %v3306_v60, 2  ;;  %v3434_v50 = vrot.slane %v3307_v13, 2 }
 0x349   : > { %v3156_v22 = vsel %vm1699_vm9, %v3154_v59, %v3155_v9  ;;  %v3158_v56 = vsel %vm1699_vm9, %v3155_v9, %v3157_v44  ;;  %v3431_v14 = vrot.slane %v3305_v52, 2  ;;  %v3725_v34 = vadd.f32 %v6325_v30, %v6133_v49  ;;  %v4591_v9 = vld [vmem:[%s5093_s22 + $0x48] sm:$0xff] }
 0x34a   : > { %v3221_v33 = vadd.f32 %v3156_v22, %v2944_v32  ;;  %v3853_v1 = vadd.f32 %v4580_v3, %v3733_v0  ;;  %v3222_v5 = vadd.f32 %v3158_v56, %v2945_v53  ;;  %v3435_v48 = vsel %vm1977_vm10, %v3432_v27, %v3434_v50  ;;  %v4592_v53 = vld [vmem:[%s5093_s22 + $0x70] sm:$0xff]  ;;  %v4593_v56 = vld [vmem:[%s5093_s22 + $0x60] sm:$0xff]  ;;  %v4594_v3 = vld [vmem:[%s5093_s22 + $0x78] sm:$0xff] }
 0x34b   : > { %v3736_v62 = vadd.f32 %v6136_v54, %v6325_v30  ;;  %v3433_v45 = vsel %vm1977_vm10, %v3431_v14, %v3432_v27  ;;  %v3728_v4 = vadd.f32 %v6325_v30, %v6140_v61  ;;  %v3749_v37 = vadd.f32 %v6244_v46, %v6325_v30  ;;  %v4585_v46 = vld [vmem:[%s5093_s22 + $0x20] sm:$0xff] }
 0x34c   : > { %3885 = vst [vmem:[%s6344_s7 + $0x10] sm:$0xff] %v3853_v1  ;;  %v3741_v49 = vadd.f32 %v6325_v30, %v6247_v28  ;;  %v3498_v10 = vadd.f32 %v3433_v45, %v3221_v33  ;;  %v3499_v54 = vadd.f32 %v3435_v48, %v3222_v5  ;;  %v3851_v63 = vadd.f32 %v4581_v11, %v3725_v34  ;;  %v4595_v5 = vld [vmem:[%s5093_s22 + $0x68] sm:$0xff] }
 0x34d   : > { %v3854_v40 = vadd.f32 %v4582_v23, %v3736_v62  ;;  %v3852_v61 = vadd.f32 %v4583_v26, %v3728_v4  ;;  %v3857_v19 = vadd.f32 %v4584_v12, %v3749_v37  ;;  %v3752_v28 = vadd.f32 %v6251_v7, %v6325_v30  ;;  %v4587_v7 = vld [vmem:[%s5093_s22 + $0x28] sm:$0xff]  ;;  %v4598_v26 = vld [vmem:[%s5093_s22 + $0x98] sm:$0xff] }
 0x34e   : > { %v3855_v17 = vadd.f32 %v4585_v46, %v3741_v49  ;;  %v3537_v18 = vadd.f32 %v6190_v6, %v3498_v10  ;;  %v3538_v2 = vadd.f32 %v6190_v6, %v3499_v54  ;;  %3883 = vst [vmem:[%s6344_s7] sm:$0xff] %v3851_v63  ;;  %v3744_v21 = vadd.f32 %v6325_v30, %v6254_v39  ;;  %v4596_v49 = vld [vmem:[%s5093_s22 + $0x90] sm:$0xff]  ;;  %v4597_v63 = vld [vmem:[%s5093_s22 + $0x80] sm:$0xff]  ;;  %v4599_v12 = vld [vmem:[%s5093_s22 + $0x88] sm:$0xff] }
 0x34f   : > { %3886 = vst [vmem:[%s6344_s7 + $0x18] sm:$0xff] %v3854_v40  ;;  %3884 = vst [vmem:[%s6344_s7 + $0x8] sm:$0xff] %v3852_v61  ;;  %v3858_v31 = vadd.f32 %v4586_v24, %v3752_v28 }
 0x350   : > { %3889 = vst [vmem:[%s6344_s7 + $0x30] sm:$0xff] %v3857_v19  ;;  %3887 = vst [vmem:[%s6344_s7 + $0x20] sm:$0xff] %v3855_v17  ;;  %v3569_v41 = vmax.f32 %v3537_v18, 0.0  ;;  %v3570_v29 = vmax.f32 %v3538_v2, 0.0  ;;  %v3856_v35 = vadd.f32 %v4587_v7, %v3744_v21  ;;  %v4422_v55 = vpop.f32.mrb[8].mxu1  ;;  %v4600_v21 = vld [vmem:[%s5093_s22 + $0xb0] sm:$0xff] }
 0x351   : > { %3890 = vst [vmem:[%s6344_s7 + $0x38] sm:$0xff] %v3858_v31  ;;  %v3765_v6 = vadd.f32 %v4422_v55, %v6325_v30  ;;  %v3756_v36 = vpop.f32.mrb[9].mxu1  ;;  %v4602_v55 = vld [vmem:[%s5093_s22 + $0xb8] sm:$0xff] }
 0x352   : > { %v3601_v39 = vmin.f32 %v3569_v41, 6.0  ;;  %v3602_v43 = vmin.f32 %v3570_v29, 6.0  ;;  %3888 = vst [vmem:[%s6344_s7 + $0x28] sm:$0xff] %v3856_v35  ;;  %v3757_v42 = vadd.f32 %v6325_v30, %v3756_v36  ;;  %v4423_v38 = vpop.f32.mrb[10].mxu1  ;;  %v4601_v29 = vld [vmem:[%s5093_s22 + $0xa0] sm:$0xff]  ;;  %v4603_v36 = vld [vmem:[%s5093_s22 + $0xa8] sm:$0xff] }
 0x353   : > { %v3861_v15 = vadd.f32 %v4588_v57, %v3765_v6  ;;  %v3768_v51 = vadd.f32 %v4423_v38, %v6325_v30  ;;  %v3759_v16 = vpop.f32.mrb[11].mxu1 }
 0x354   : > { %v3618_v25 = vpack.c.bf16 %v3602_v43, %v3601_v39  ;;  %v3859_v58 = vadd.f32 %v4589_v8, %v3757_v42  ;;  %v3760_v59 = vadd.f32 %v6325_v30, %v3759_v16 }
 0x355   : > { %3893 = vst [vmem:[%s6344_s7 + $0x50] sm:$0xff] %v3861_v15  ;;  %v3862_v47 = vadd.f32 %v4590_v20, %v3768_v51  ;;  %v4604_v51 = vld [vmem:[%s5093_s22 + $0xd0] sm:$0xff] }
 0x356   : > { %4441 = vmatmul.mubr.bf16.gmra.mrb[28].mxu1 %v3618_v25  ;;  %3891 = vst [vmem:[%s6344_s7 + $0x40] sm:$0xff] %v3859_v58  ;;  %v3860_v60 = vadd.f32 %v4591_v9, %v3760_v59  ;;  %v4605_v58 = vld [vmem:[%s5093_s22 + $0xc0] sm:$0xff] }
 0x357   : > { %3894 = vst [vmem:[%s6344_s7 + $0x58] sm:$0xff] %v3862_v47  ;;  %v4606_v47 = vld [vmem:[%s5093_s22 + $0xd8] sm:$0xff] }
 0x358   : > { %3892 = vst [vmem:[%s6344_s7 + $0x48] sm:$0xff] %v3860_v60  ;;  %v4607_v60 = vld [vmem:[%s5093_s22 + $0xc8] sm:$0xff] }
 0x37b   : > { %v4426_v13 = vpop.f32.mrb[12].mxu1 }
 0x37c   : > { %v3781_v32 = vadd.f32 %v4426_v13, %v6325_v30  ;;  %v3772_v44 = vpop.f32.mrb[13].mxu1 }
 0x37d   : > { %v3773_v52 = vadd.f32 %v6325_v30, %v3772_v44  ;;  %v4427_v0 = vpop.f32.mrb[14].mxu1 }
 0x37e   : > { %v3865_v22 = vadd.f32 %v4592_v53, %v3781_v32  ;;  %v3784_v27 = vadd.f32 %v4427_v0, %v6325_v30  ;;  %v3775_v50 = vpop.f32.mrb[15].mxu1 }
 0x37f   : > { %v3863_v33 = vadd.f32 %v4593_v56, %v3773_v52  ;;  %v3776_v14 = vadd.f32 %v6325_v30, %v3775_v50 }
 0x380   : > { %3897 = vst [vmem:[%s6344_s7 + $0x70] sm:$0xff] %v3865_v22  ;;  %v3866_v1 = vadd.f32 %v4594_v3, %v3784_v27  ;;  %v4608_v22 = vld [vmem:[%s5093_s22 + $0xf0] sm:$0xff] }
 0x381   : > { %3895 = vst [vmem:[%s6344_s7 + $0x60] sm:$0xff] %v3863_v33  ;;  %v3864_v48 = vadd.f32 %v4595_v5, %v3776_v14  ;;  %v4609_v33 = vld [vmem:[%s5093_s22 + $0xe0] sm:$0xff] }
 0x382   : > { %3898 = vst [vmem:[%s6344_s7 + $0x78] sm:$0xff] %v3866_v1  ;;  %v4610_v1 = vld [vmem:[%s5093_s22 + $0xf8] sm:$0xff] }
 0x383   : > { %3896 = vst [vmem:[%s6344_s7 + $0x68] sm:$0xff] %v3864_v48  ;;  %v4611_v48 = vld [vmem:[%s5093_s22 + $0xe8] sm:$0xff] }
 0x3a7   : > { %v4430_v34 = vpop.f32.mrb[16].mxu1 }
 0x3a8   : > { %v3797_v62 = vadd.f32 %v4430_v34, %v6325_v30  ;;  %v3788_v45 = vpop.f32.mrb[17].mxu1 }
 0x3a9   : > { %v3789_v4 = vadd.f32 %v6325_v30, %v3788_v45  ;;  %v4431_v37 = vpop.f32.mrb[18].mxu1 }
 0x3aa   : > { %v3869_v10 = vadd.f32 %v4596_v49, %v3797_v62  ;;  %v3800_v54 = vadd.f32 %v4431_v37, %v6325_v30  ;;  %v3791_v11 = vpop.f32.mrb[19].mxu1 }
 0x3ab   : > { %v3867_v23 = vadd.f32 %v4597_v63, %v3789_v4  ;;  %v3792_v40 = vadd.f32 %v6325_v30, %v3791_v11 }
 0x3ac   : > { %3901 = vst [vmem:[%s6344_s7 + $0x90] sm:$0xff] %v3869_v10  ;;  %v3870_v61 = vadd.f32 %v4598_v26, %v3800_v54 }
 0x3ad   : > { %3899 = vst [vmem:[%s6344_s7 + $0x80] sm:$0xff] %v3867_v23  ;;  %v3868_v19 = vadd.f32 %v4599_v12, %v3792_v40 }
 0x3ae   : > { %3902 = vst [vmem:[%s6344_s7 + $0x98] sm:$0xff] %v3870_v61 }
 0x3af   : > { %3900 = vst [vmem:[%s6344_s7 + $0x88] sm:$0xff] %v3868_v19 }
 0x3d2   : > { %v4434_v46 = vpop.f32.mrb[20].mxu1 }
 0x3d3   : > { %v3813_v17 = vadd.f32 %v4434_v46, %v6325_v30  ;;  %v3804_v28 = vpop.f32.mrb[21].mxu1 }
 0x3d4   : > { %v3805_v18 = vadd.f32 %v6325_v30, %v3804_v28  ;;  %v4435_v2 = vpop.f32.mrb[22].mxu1 }
 0x3d5   : > { %v3873_v24 = vadd.f32 %v4600_v21, %v3813_v17  ;;  %v3816_v31 = vadd.f32 %v4435_v2, %v6325_v30  ;;  %v3807_v41 = vpop.f32.mrb[23].mxu1 }
 0x3d6   : > { %v3871_v7 = vadd.f32 %v4601_v29, %v3805_v18  ;;  %v3808_v35 = vadd.f32 %v6325_v30, %v3807_v41 }
 0x3d7   : > { %3905 = vst [vmem:[%s6344_s7 + $0xb0] sm:$0xff] %v3873_v24  ;;  %v3874_v6 = vadd.f32 %v4602_v55, %v3816_v31 }
 0x3d8   : > { %3903 = vst [vmem:[%s6344_s7 + $0xa0] sm:$0xff] %v3871_v7  ;;  %v3872_v39 = vadd.f32 %v4603_v36, %v3808_v35 }
 0x3d9   : > { %3906 = vst [vmem:[%s6344_s7 + $0xb8] sm:$0xff] %v3874_v6 }
 0x3da   : > { %3904 = vst [vmem:[%s6344_s7 + $0xa8] sm:$0xff] %v3872_v39 }
 0x3fe   : > { %v4438_v43 = vpop.f32.mrb[24].mxu1 }
 0x3ff   : > { %v3829_v42 = vadd.f32 %v4438_v43, %v6325_v30  ;;  %v3820_v38 = vpop.f32.mrb[25].mxu1 }
 0x400   : > { %v3821_v57 = vadd.f32 %v6325_v30, %v3820_v38  ;;  %v4439_v15 = vpop.f32.mrb[26].mxu1 }
 0x401   : > { %v3877_v16 = vadd.f32 %v4604_v51, %v3829_v42  ;;  %v3832_v25 = vadd.f32 %v4439_v15, %v6325_v30  ;;  %v3823_v8 = vpop.f32.mrb[27].mxu1 }
 0x402   : > { %v3875_v59 = vadd.f32 %v4605_v58, %v3821_v57  ;;  %v3824_v20 = vadd.f32 %v6325_v30, %v3823_v8 }
 0x403   : > { %3909 = vst [vmem:[%s6344_s7 + $0xd0] sm:$0xff] %v3877_v16  ;;  %v3878_v9 = vadd.f32 %v4606_v47, %v3832_v25 }
 0x404   : > { %3907 = vst [vmem:[%s6344_s7 + $0xc0] sm:$0xff] %v3875_v59  ;;  %v3876_v13 = vadd.f32 %v4607_v60, %v3824_v20 }
 0x405   : > { %3910 = vst [vmem:[%s6344_s7 + $0xd8] sm:$0xff] %v3878_v9 }
 0x406   : > { %3908 = vst [vmem:[%s6344_s7 + $0xc8] sm:$0xff] %v3876_v13 }
 0x429   : > { %v4442_v32 = vpop.f32.mrb[28].mxu1 }
 0x42a   : > { %v3845_v44 = vadd.f32 %v4442_v32, %v6325_v30  ;;  %v3836_v52 = vpop.f32.mrb[29].mxu1 }
 0x42b   : > { %v3837_v0 = vadd.f32 %v6325_v30, %v3836_v52  ;;  %v4443_v53 = vpop.f32.mrb[30].mxu1 }
 0x42c   : > { %v3881_v27 = vadd.f32 %v4608_v22, %v3845_v44  ;;  %v3848_v50 = vadd.f32 %v4443_v53, %v6325_v30  ;;  %v3839_v56 = vpop.f32.mrb[31].mxu1 }
 0x42d   : > { %v3879_v14 = vadd.f32 %v4609_v33, %v3837_v0  ;;  %v3840_v3 = vadd.f32 %v6325_v30, %v3839_v56 }
 0x42e   : > { %3913 = vst [vmem:[%s6344_s7 + $0xf0] sm:$0xff] %v3881_v27  ;;  %v3882_v5 = vadd.f32 %v4610_v1, %v3848_v50 }
 0x42f   : > { %3911 = vst [vmem:[%s6344_s7 + $0xe0] sm:$0xff] %v3879_v14  ;;  %v3880_v34 = vadd.f32 %v4611_v48, %v3840_v3 }
 0x430   : > { %3914 = vst [vmem:[%s6344_s7 + $0xf8] sm:$0xff] %v3882_v5 }
 0x431   : > { %3912 = vst [vmem:[%s6344_s7 + $0xe8] sm:$0xff] %v3880_v34 }
 0x432   : > { %4739 = shalt.err (!%p4736_p0)
}
 0x433   : > { %s4740_s22 = scalar_lea.hbm %s6446_s19, 4096  ;;  %s4744_s7 = scalar_lea.hbm %s6542_s10, 8192 }
 0x434   : > { %p4741_p4 = scmp.ne.s32.totalorder %s6446_s19, %s4740_s22  ;;  %p4745_p12 = scmp.lt.u32.totalorder %s6446_s19, %s6542_s10 }
 0x435   : > { %p4746_p1 = scmp.lt.u32.totalorder %s4744_s7, %s4740_s22  ;;  %p4748_p13 = scmp.lt.u32.totalorder %s4740_s22, %s6446_s19 }
 0x436   : > { %p4742_p2 = pnand %p4741_p4, %p5029_p10 }
 0x437   : > { %p4747_p11 = por %p4746_p1, %p4745_p12 }
 0x438   : > { %p4743_p8 = pneg %p4742_p2 }
 0x439   : > { %p4749_p6 = por %p4748_p13, %p4747_p11 }
 0x43b   : > { %p4750_p3 = pnand %p4749_p6, %p4743_p8 }
 0x43d   : > { %4753 = shalt.err (!%p4750_p3)
}
 0x43e   : > { %s4827_s11 = smov 128   ;;  %s4828_s13 = smov 8  }
 0x43f   : > { %4458 = dma.vmem_to_hbm [thread:$0]  (%p5029_p10), %s6448_s9, 4096, %s6446_s19, %s3916_s21, %s4827_s11, %s4827_s11, %s4828_s13  }
 0x440 PF: > { %s6543_s15 = sld [smem:[#allocation16_spill]]  ;;  %s6544_s27 = sld [smem:[#allocation18_spill]] }
 0x441   : > { %p6546_p7 = scmp.ge.s32.totalorder %s4816_s29, 2 }
 0x446   : > { %s3947_s30 = sand.u32 1, %s6543_s15   ;;  %p6545_p5 = scmp.ne.s32.totalorder %s6544_s27, 0 }
 0x447   : > { %s3948_s8 = scalar_lea.sflag [#allocation5], %s3947_s30 }
 0x448   : > { %p4475_p9 = pnand %p6546_p7, %p6545_p5 }
 0x44a   : > { %4791 = dma.done.wait (!%p4475_p9), %s3948_s8, 4096  }
 0x44b   : > { %4793 = vsyncadd (!%p4475_p9), %s3948_s8, 4294963200  ;;  %s25_s29 = sadd.s32 1, %s4816_s29   ;;  %s6547_s24 = smov %s4800_s25 }
 0x44c   : > { %p22_p0 = scmp.ge.s32.totalorder %s25_s29, 4   ;;  %s6548_s25 = smov %s4804_s26 }
 0x44d   : > { %s6549_s26 = smov %s5041_s23  ;;  %s6550_s27 = smov %s4812_s28 }
 0x44e   : > { %s6551_s28 = smov %s6553_s16  ;;  %24 = sbr.rel (!%p22_p0) target bundleno = 10 (0xa), region = 112 }
 0x455   :  { %3953 = vsyncpa [#allocation4], 1 }
 0x456   :  { %3955 = vsyncpa [#allocation4 + $0x1], 1 }
 0x457   :  { %3956 = vsyncpa [#allocation7], 1 }
 0x458   :  { %3957 = vsyncpa [#allocation10], 1 }
 0x459   :  { %3958 = vsyncpa [#allocation5], 1 }
 0x45a   :  { %3960 = vsyncpa [#allocation5 + $0x1], 1 }

</bundles_post_ra>
